<compile_context>
chip_gen: v5e
topology: v5e:2x2
jax: 0.10.0
libtpu: 0.0.40
codegen_flags: <defaults>
</compile_context>

<pallas_src>
import functools
import math

import numpy as np
import jax
import jax.numpy as jnp
from jax import lax
from jax.experimental import pallas as pl
from jax.experimental.pallas import tpu as pltpu


_PARALLEL1 = pltpu.CompilerParams(dimension_semantics=("parallel",))
_PARALLEL2 = pltpu.CompilerParams(dimension_semantics=("parallel", "parallel"))


# ----------------------------------------------------------------------------
# Pallas kernels
# ----------------------------------------------------------------------------
def ln_qkv_kernel(x_ref, g_ref, b_ref, w_ref, bias_ref, o_ref, *, eps):
    """o = LayerNorm(x) @ Wqkv + bqkv.  (qk scale already folded into Wqkv.)"""
    x = x_ref[...].astype(jnp.float32)
    mu = jnp.mean(x, axis=-1, keepdims=True)
    var = jnp.mean(jnp.square(x - mu), axis=-1, keepdims=True)
    xn = (x - mu) * lax.rsqrt(var + eps) * g_ref[0] + b_ref[0]
    y = jnp.dot(xn.astype(jnp.bfloat16), w_ref[...],
                preferred_element_type=jnp.float32) + bias_ref[0]
    o_ref[...] = y.astype(o_ref.dtype)


def window_attn_kernel(qkv_ref, bias_ref, o_ref, wqkv_scr, wout_scr, *,
                       num_heads, per_window_bias):
    """Window attention for one (batch, row-strip) of the image.

    qkv_ref : (1, ws, W, 3C) bf16     bias_ref: (1, nWb, nh, N, N) f32
    o_ref   : (1, ws, W,  C) bf16
    wqkv_scr: (N, 3C) bf16 VMEM       wout_scr: (N, C) f32 VMEM
    The scale is folded into q, the shift mask into bias; the per-window
    flatten/unflatten relayout happens entirely in VMEM scratch.
    """
    _, ws, W, C3 = qkv_ref.shape
    C = C3 // 3
    hd = C // num_heads
    nww = W // ws

    for w in range(nww):                          # static unroll over windows
        # gather the ws x ws window tokens (strided rows of the strip) into a
        # flat (N, 3C) buffer — on-chip relayout, no HBM round trip.
        for i in range(ws):
            wqkv_scr[i * ws:(i + 1) * ws, :] = \
                qkv_ref[0, i, w * ws:(w + 1) * ws, :]
        w_qkv = wqkv_scr[...]                     # (N, 3C) bf16
        b_idx = w if per_window_bias else 0

        for h in range(num_heads):                # static unroll (small)
            qh = w_qkv[:, h * hd:(h + 1) * hd]
            kh = w_qkv[:, C + h * hd:C + (h + 1) * hd]
            vh = w_qkv[:, 2 * C + h * hd:2 * C + (h + 1) * hd]
            a = jnp.einsum('nd,md->nm', qh, kh,
                           preferred_element_type=jnp.float32)
            a = a + bias_ref[0, b_idx, h]         # rel-pos bias (+ shift mask)
            a = a - jnp.max(a, axis=-1, keepdims=True)
            e = jnp.exp(a)
            p = e * pl.reciprocal(jnp.sum(e, axis=-1, keepdims=True),
                                  approx=True)
            # accumulate the head result into the local (N, C) buffer
            wout_scr[:, h * hd:(h + 1) * hd] = jnp.einsum(
                'nm,md->nd', p.astype(jnp.bfloat16), vh,
                preferred_element_type=jnp.float32)

        o_win = wout_scr[...]                     # (N, C) f32
        # scatter back into the natural (ws, W, C) strip layout (C-wide rows)
        for i in range(ws):
            o_ref[0, i, w * ws:(w + 1) * ws, :] = \
                o_win[i * ws:(i + 1) * ws, :].astype(o_ref.dtype)


def proj_mlp_kernel(short_ref, y_ref, wp_ref, bp_ref, g_ref, b_ref,
                    w1_ref, b1_ref, w2_ref, b2_ref, o_ref, *, eps):
    """o = r + fc2(gelu(fc1(LN(r)))) with r = shortcut + y@Wproj + bproj.

    Fuses output projection + residual #1 + norm2 + MLP + residual #2 so the
    residual stream never makes an extra HBM round trip.
    """
    proj = jnp.dot(y_ref[...], wp_ref[...],
                   preferred_element_type=jnp.float32) + bp_ref[0]
    x = short_ref[...].astype(jnp.float32) + proj          # residual #1
    mu = jnp.mean(x, axis=-1, keepdims=True)
    var = jnp.mean(jnp.square(x - mu), axis=-1, keepdims=True)
    xn = (x - mu) * lax.rsqrt(var + eps) * g_ref[0] + b_ref[0]
    h = jnp.dot(xn.astype(jnp.bfloat16), w1_ref[...],
                preferred_element_type=jnp.float32) + b1_ref[0]
    # exact (erf-based) GELU, matching torch.nn.GELU default
    h = 0.5 * h * (1.0 + lax.erf(h * (1.0 / math.sqrt(2.0))))
    y2 = jnp.dot(h.astype(jnp.bfloat16), w2_ref[...],
                 preferred_element_type=jnp.float32) + b2_ref[0]
    o_ref[...] = (x + y2).astype(o_ref.dtype)               # residual #2


def expand_norm_kernel(x_ref, w_ref, avg_ref, g_ref, b_ref, o_ref, *, eps):
    """PatchExpand: y = x @ Wexpand (no bias), then LayerNorm over each of the
    4 pixel-shuffle channel groups of size c, computed with a block-diagonal
    averaging matmul so the whole (tile, 4c) slab is normalized and stored in
    one lane-dense pass (no per-group slices / masked stores)."""
    y = jnp.dot(x_ref[...].astype(jnp.bfloat16), w_ref[...],
                preferred_element_type=jnp.float32)          # (tile, 4c) f32
    mu = jnp.dot(y, avg_ref[...], preferred_element_type=jnp.float32)
    var = jnp.dot(jnp.square(y - mu), avg_ref[...],
                  preferred_element_type=jnp.float32)
    o_ref[...] = ((y - mu) * lax.rsqrt(var + eps) * g_ref[0]
                  + b_ref[0]).astype(o_ref.dtype)


# ----------------------------------------------------------------------------
# Pallas wrappers
# ----------------------------------------------------------------------------
def _row_tile(rows, max_tile=512):
    # NOTE: falls back to tile=rows when no multiple-of-8 divisor <= max_tile
    # exists; for very large awkward row counts this can exceed the VMEM
    # budget (pad the token count upstream in that case).
    if rows <= max_tile:
        return rows
    t = max_tile - (max_tile % 8)
    while t >= 8:
        if rows % t == 0:
            return t
        t -= 8
    return rows


def ln_qkv_pallas(x2d, gamma, beta, wqkv, bqkv, eps=1e-5):
    rows, C = x2d.shape
    C3 = wqkv.shape[1]
    tile = _row_tile(rows, 1024)
    return pl.pallas_call(
        functools.partial(ln_qkv_kernel, eps=eps),
        out_shape=jax.ShapeDtypeStruct((rows, C3), jnp.bfloat16),
        grid=(rows // tile,),
        in_specs=[pl.BlockSpec((tile, C), lambda i: (i, 0)),
                  pl.BlockSpec((1, C), lambda i: (0, 0)),
                  pl.BlockSpec((1, C), lambda i: (0, 0)),
                  pl.BlockSpec((C, C3), lambda i: (0, 0)),
                  pl.BlockSpec((1, C3), lambda i: (0, 0))],
        out_specs=pl.BlockSpec((tile, C3), lambda i: (i, 0)),
        compiler_params=_PARALLEL1,
    )(x2d, gamma.reshape(1, C), beta.reshape(1, C), wqkv, bqkv.reshape(1, C3))


def window_attention_pallas(qkv, attn_bias, num_heads, ws, per_window_bias):
    """qkv: (B, H, W, 3C) bf16 (already shifted if needed);
    attn_bias: (H//ws, W//ws, nh, N, N) or (1, 1, nh, N, N) f32."""
    B, H, W, C3 = qkv.shape
    C = C3 // 3
    N = ws * ws
    nww = W // ws
    nrows = H // ws
    nh = num_heads

    if per_window_bias:
        bias_block = (1, nww, nh, N, N)
        bias_map = lambda b, r: (r, 0, 0, 0, 0)
    else:
        bias_block = (1, 1, nh, N, N)
        bias_map = lambda b, r: (0, 0, 0, 0, 0)

    kern = functools.partial(window_attn_kernel, num_heads=nh,
                             per_window_bias=per_window_bias)
    return pl.pallas_call(
        kern,
        out_shape=jax.ShapeDtypeStruct((B, H, W, C), jnp.bfloat16),
        grid=(B, nrows),
        in_specs=[pl.BlockSpec((1, ws, W, C3), lambda b, r: (b, r, 0, 0)),
                  pl.BlockSpec(bias_block, bias_map)],
        out_specs=pl.BlockSpec((1, ws, W, C), lambda b, r: (b, r, 0, 0)),
        scratch_shapes=[pltpu.VMEM((N, C3), jnp.bfloat16),
                        pltpu.VMEM((N, C), jnp.float32)],
        compiler_params=_PARALLEL2,
    )(qkv, attn_bias)


def proj_mlp_pallas(shortcut, y, wproj, bproj, g2, b2, w1, b1m, w2, b2m,
                    eps=1e-5):
    rows, C = shortcut.shape
    Hd = w1.shape[1]
    tile = _row_tile(rows, 512)
    return pl.pallas_call(
        functools.partial(proj_mlp_kernel, eps=eps),
        out_shape=jax.ShapeDtypeStruct((rows, C), jnp.float32),
        grid=(rows // tile,),
        in_specs=[pl.BlockSpec((tile, C), lambda i: (i, 0)),    # shortcut
                  pl.BlockSpec((tile, C), lambda i: (i, 0)),    # attn out
                  pl.BlockSpec((C, C), lambda i: (0, 0)),       # Wproj
                  pl.BlockSpec((1, C), lambda i: (0, 0)),       # bproj
                  pl.BlockSpec((1, C), lambda i: (0, 0)),       # gamma2
                  pl.BlockSpec((1, C), lambda i: (0, 0)),       # beta2
                  pl.BlockSpec((C, Hd), lambda i: (0, 0)),      # W1
                  pl.BlockSpec((1, Hd), lambda i: (0, 0)),      # b1
                  pl.BlockSpec((Hd, C), lambda i: (0, 0)),      # W2
                  pl.BlockSpec((1, C), lambda i: (0, 0))],      # b2
        out_specs=pl.BlockSpec((tile, C), lambda i: (i, 0)),
        compiler_params=_PARALLEL1,
    )(shortcut, y, wproj, bproj.reshape(1, C), g2.reshape(1, C),
      b2.reshape(1, C), w1, b1m.reshape(1, Hd), w2, b2m.reshape(1, C))


def expand_norm_pallas(x2d, w_expand, avg, g4, b4, eps=1e-5):
    rows, C = x2d.shape
    C2 = w_expand.shape[1]
    tile = _row_tile(rows, 1024)
    return pl.pallas_call(
        functools.partial(expand_norm_kernel, eps=eps),
        out_shape=jax.ShapeDtypeStruct((rows, C2), jnp.float32),
        grid=(rows // tile,),
        in_specs=[pl.BlockSpec((tile, C), lambda i: (i, 0)),
                  pl.BlockSpec((C, C2), lambda i: (0, 0)),
                  pl.BlockSpec((C2, C2), lambda i: (0, 0)),
                  pl.BlockSpec((1, C2), lambda i: (0, 0)),
                  pl.BlockSpec((1, C2), lambda i: (0, 0))],
        out_specs=pl.BlockSpec((tile, C2), lambda i: (i, 0)),
        compiler_params=_PARALLEL1,
    )(x2d, w_expand, avg, g4.reshape(1, C2), b4.reshape(1, C2))


# ----------------------------------------------------------------------------
# JAX glue
# ----------------------------------------------------------------------------
def make_relative_position_index(ws):
    coords = np.stack(np.meshgrid(np.arange(ws), np.arange(ws), indexing="ij"))
    flat = coords.reshape(2, -1)
    rel = flat[:, :, None] - flat[:, None, :]
    rel = rel.transpose(1, 2, 0).astype(np.int64)
    rel[:, :, 0] += ws - 1
    rel[:, :, 1] += ws - 1
    rel[:, :, 0] *= 2 * ws - 1
    return rel.sum(-1)  # (N, N)


def make_shift_attn_mask(H, W, ws, shift):
    img_mask = np.zeros((1, H, W, 1), dtype=np.float32)
    slices = (slice(0, -ws), slice(-ws, -shift), slice(-shift, None))
    cnt = 0
    for hs in slices:
        for wsl in slices:
            img_mask[:, hs, wsl, :] = cnt
            cnt += 1
    m = img_mask.reshape(1, H // ws, ws, W // ws, ws, 1)
    m = m.transpose(0, 1, 3, 2, 4, 5).reshape(-1, ws * ws)
    attn_mask = m[:, None, :] - m[:, :, None]
    return np.where(attn_mask != 0, -100.0, 0.0).astype(np.float32)  # (nW,N,N)


def swin_block_forward(x, p, H, W, window_size, shift_size, num_heads):
    B, L, C = x.shape
    ws = window_size
    x2d = x.reshape(B * L, C)

    # fused norm1 + (scale-folded) QKV projection over all tokens
    qkv = ln_qkv_pallas(x2d, p["g1"], p["b1"], p["wqkv"], p["bqkv"])
    qkv = qkv.reshape(B, H, W, 3 * C)
    if shift_size > 0:
        qkv = jnp.roll(qkv, shift=(-shift_size, -shift_size), axis=(1, 2))

    # strip-blocked window attention: window partition/reverse are expressed
    # through BlockSpecs + in-kernel VMEM relayout (no XLA transposes).
    attn = window_attention_pallas(qkv, p["attn_bias"], num_heads, ws,
                                   per_window_bias=(shift_size > 0))
    if shift_size > 0:
        attn = jnp.roll(attn, shift=(shift_size, shift_size), axis=(1, 2))
    y = attn.reshape(B * L, C)

    # fused output projection + residual + norm2 + MLP + residual
    x2d = proj_mlp_pallas(x2d, y, p["wproj"], p["bproj"], p["g2"], p["b2"],
                          p["w1"], p["b1m"], p["w2"], p["b2m"])
    return x2d.reshape(B, L, C)


def patch_expand_forward(x, up, H, W):
    B, L, C = x.shape
    c = C // 2
    y = expand_norm_pallas(x.reshape(B * L, C), up["w_expand"],
                           up["avg"], up["g4"], up["b4"])
    y = y.reshape(B, H, W, 2, 2, c).transpose(0, 1, 3, 2, 4, 5)
    return y.reshape(B, 4 * L, c)


def basic_layer_up_forward(x, params, *, H, W, depth, num_heads, window_size):
    ws = min(window_size, min(H, W))
    for i in range(depth):
        shift = 0 if i % 2 == 0 else ws // 2
        if min(H, W) <= window_size:
            shift = 0
        x = swin_block_forward(x, params["blocks"][i], H, W, ws, shift,
                               num_heads)
    if params.get("upsample") is not None:
        x = patch_expand_forward(x, params["upsample"], H, W)
    return x


# ----------------------------------------------------------------------------
# Deterministic parameter construction (synthetic, not a checkpoint load)
# ----------------------------------------------------------------------------
def init_params(key, dim, depth, num_heads, window_size, mlp_ratio, H, W,
                with_upsample=True):
    hidden = int(dim * mlp_ratio)
    ws = min(window_size, min(H, W))
    N = ws * ws
    scale = (dim // num_heads) ** -0.5
    rel_index = make_relative_position_index(ws)

    blocks = []
    for i in range(depth):
        ks = jax.random.split(jax.random.fold_in(key, i), 6)
        shift = 0 if i % 2 == 0 else ws // 2
        if min(H, W) <= window_size:
            shift = 0

        # relative-position bias (num_heads, N, N)
        rel_table = 0.02 * jax.random.truncated_normal(
            ks[2], -2.0, 2.0, ((2 * ws - 1) ** 2, num_heads), jnp.float32)
        rel_bias = rel_table[rel_index.reshape(-1)].reshape(N, N, num_heads)
        rel_bias = jnp.transpose(rel_bias, (2, 0, 1)).astype(jnp.float32)
        if shift > 0:
            mask = jnp.asarray(make_shift_attn_mask(H, W, ws, shift))
            attn_bias = rel_bias[None, :, :, :] + mask[:, None, :, :]
            attn_bias = attn_bias.reshape(H // ws, W // ws, num_heads, N, N)
        else:
            attn_bias = rel_bias[None, None]          # (1, 1, nh, N, N)

        # QKV weights with qk scale folded into the q columns (f32, pre-cast)
        wqkv = 0.02 * jax.random.normal(ks[0], (dim, 3 * dim), jnp.float32)
        wqkv = wqkv.at[:, :dim].multiply(scale)
        bqkv = jnp.zeros((3 * dim,), jnp.float32).at[:dim].multiply(scale)

        p = {
            "g1": jnp.ones((dim,), jnp.float32),
            "b1": jnp.zeros((dim,), jnp.float32),
            "wqkv": wqkv.astype(jnp.bfloat16),
            "bqkv": bqkv,
            "wproj": (0.02 * jax.random.normal(ks[1], (dim, dim), jnp.float32)
                      ).astype(jnp.bfloat16),
            "bproj": jnp.zeros((dim,), jnp.float32),
            "attn_bias": attn_bias.astype(jnp.float32),
            "g2": jnp.ones((dim,), jnp.float32),
            "b2": jnp.zeros((dim,), jnp.float32),
            "w1": (0.02 * jax.random.normal(ks[3], (dim, hidden), jnp.float32)
                   ).astype(jnp.bfloat16),
            "b1m": jnp.zeros((hidden,), jnp.float32),
            "w2": (0.02 * jax.random.normal(ks[4], (hidden, dim), jnp.float32)
                   ).astype(jnp.bfloat16),
            "b2m": jnp.zeros((dim,), jnp.float32),
        }
        blocks.append(p)

    params = {"blocks": blocks}
    if with_upsample:
        ku = jax.random.fold_in(key, 1000)
        c = dim // 2
        # block-diagonal group-averaging matrix for the 4-group LayerNorm
        avg = np.kron(np.eye(4, dtype=np.float32),
                      np.full((c, c), 1.0 / c, dtype=np.float32))
        gamma = jnp.ones((c,), jnp.float32)
        beta = jnp.zeros((c,), jnp.float32)
        params["upsample"] = {
            "w_expand": (0.02 * jax.random.normal(ku, (dim, 2 * dim),
                                                  jnp.float32)
                         ).astype(jnp.bfloat16),
            "avg": jnp.asarray(avg),
            "g4": jnp.tile(gamma, 4),
            "b4": jnp.tile(beta, 4),
        }
    else:
        params["upsample"] = None
    return params


# ----------------------------------------------------------------------------
if __name__ == "__main__":
    # Config consistent with BasicLayer_up:
    #   dim=32, input_resolution=(8, 8), depth=2, num_heads=2, window_size=4,
    #   mlp_ratio=4.0, upsample=PatchExpand  -> output (B, 4*L, dim//2)
    # (The dim=32 / head_dim=16 / N=16 smoke-test shapes under-fill the MXU by
    #  construction; realistic Swin-UNet dims of 96..768 fill it properly.)
    B, H, W = 2, 8, 8
    dim, depth, num_heads, window_size, mlp_ratio = 32, 2, 2, 4, 4.0
    L = H * W

    key = jax.random.PRNGKey(0)
    kx, kp = jax.random.split(key)
    x = jax.random.normal(kx, (B, L, dim), jnp.float32)
    params = init_params(kp, dim, depth, num_heads, window_size, mlp_ratio,
                         H, W, with_upsample=True)

    fwd = jax.jit(functools.partial(
        basic_layer_up_forward, H=H, W=W, depth=depth,
        num_heads=num_heads, window_size=window_size))
    out = fwd(x, params)
    out = jax.block_until_ready(out)
    assert out.shape == (B, 4 * L, dim // 2), out.shape
    print("KERNEL_OK")
</pallas_src>

<mosaic_0001>
module attributes {stable_mosaic.version = 11 : i64} {
  func.func @ln_qkv_kernel(%arg0: i32, %arg1: memref<128x32xf32, #tpu.memory_space<vmem>>, %arg2: memref<1x32xf32, #tpu.memory_space<vmem>>, %arg3: memref<1x32xf32, #tpu.memory_space<vmem>>, %arg4: memref<32x96xbf16, #tpu.memory_space<vmem>>, %arg5: memref<1x96xf32, #tpu.memory_space<vmem>>, %arg6: memref<128x96xbf16, #tpu.memory_space<vmem>>) attributes {dimension_semantics = [#tpu.dimension_semantics<parallel>], iteration_bounds = array<i64: 1>, scalar_prefetch = 0 : i64, scratch_operands = 0 : i64, tpu.core_type = #tpu.core_type<tc>, window_params = [{transform_indices = @transform_0, window_bounds = array<i64: 128, 32>}, {pipeline_mode = #tpu.pipeline_mode<synchronous>, transform_indices = @transform_1, window_bounds = array<i64: 1, 32>}, {pipeline_mode = #tpu.pipeline_mode<synchronous>, transform_indices = @transform_2, window_bounds = array<i64: 1, 32>}, {pipeline_mode = #tpu.pipeline_mode<synchronous>, transform_indices = @transform_3, window_bounds = array<i64: 32, 96>}, {pipeline_mode = #tpu.pipeline_mode<synchronous>, transform_indices = @transform_4, window_bounds = array<i64: 1, 96>}, {transform_indices = @transform_5, window_bounds = array<i64: 128, 96>}]} {
    %c0 = arith.constant 0 : index
    %c0_0 = arith.constant 0 : index
    %0 = vector.load %arg1[%c0, %c0_0] : memref<128x32xf32, #tpu.memory_space<vmem>>, vector<128x32xf32>
    %cst = arith.constant dense<0.000000e+00> : vector<128xf32>
    %1 = vector.multi_reduction <add>, %0, %cst [1] : vector<128x32xf32> to vector<128xf32>
    %2 = vector.shape_cast %1 : vector<128xf32> to vector<128x1xf32>
    %cst_1 = arith.constant 3.200000e+01 : f32
    %3 = vector.broadcast %cst_1 : f32 to vector<128x1xf32>
    %4 = arith.divf %2, %3 : vector<128x1xf32>
    %5 = vector.broadcast %4 : vector<128x1xf32> to vector<128x32xf32>
    %6 = arith.subf %0, %5 : vector<128x32xf32>
    %7 = arith.mulf %6, %6 : vector<128x32xf32>
    %cst_2 = arith.constant dense<0.000000e+00> : vector<128xf32>
    %8 = vector.multi_reduction <add>, %7, %cst_2 [1] : vector<128x32xf32> to vector<128xf32>
    %9 = vector.shape_cast %8 : vector<128xf32> to vector<128x1xf32>
    %cst_3 = arith.constant 3.200000e+01 : f32
    %10 = vector.broadcast %cst_3 : f32 to vector<128x1xf32>
    %11 = arith.divf %9, %10 : vector<128x1xf32>
    %12 = vector.broadcast %4 : vector<128x1xf32> to vector<128x32xf32>
    %13 = arith.subf %0, %12 : vector<128x32xf32>
    %cst_4 = arith.constant 9.99999974E-6 : f32
    %14 = vector.broadcast %cst_4 : f32 to vector<128x1xf32>
    %15 = arith.addf %11, %14 : vector<128x1xf32>
    %16 = math.rsqrt %15 : vector<128x1xf32>
    %17 = vector.broadcast %16 : vector<128x1xf32> to vector<128x32xf32>
    %18 = arith.mulf %13, %17 : vector<128x32xf32>
    %c0_5 = arith.constant 0 : index
    %c0_6 = arith.constant 0 : index
    %19 = vector.load %arg2[%c0_5, %c0_6] : memref<1x32xf32, #tpu.memory_space<vmem>>, vector<1x32xf32>
    %20 = vector.shape_cast %19 : vector<1x32xf32> to vector<32xf32>
    %21 = vector.shape_cast %20 : vector<32xf32> to vector<1x32xf32>
    %22 = vector.broadcast %21 : vector<1x32xf32> to vector<128x32xf32>
    %23 = arith.mulf %18, %22 : vector<128x32xf32>
    %c0_7 = arith.constant 0 : index
    %c0_8 = arith.constant 0 : index
    %24 = vector.load %arg3[%c0_7, %c0_8] : memref<1x32xf32, #tpu.memory_space<vmem>>, vector<1x32xf32>
    %25 = vector.shape_cast %24 : vector<1x32xf32> to vector<32xf32>
    %26 = vector.shape_cast %25 : vector<32xf32> to vector<1x32xf32>
    %27 = vector.broadcast %26 : vector<1x32xf32> to vector<128x32xf32>
    %28 = arith.addf %23, %27 : vector<128x32xf32>
    %29 = arith.truncf %28 : vector<128x32xf32> to vector<128x32xbf16>
    %c0_9 = arith.constant 0 : index
    %c0_10 = arith.constant 0 : index
    %30 = vector.load %arg4[%c0_9, %c0_10] : memref<32x96xbf16, #tpu.memory_space<vmem>>, vector<32x96xbf16>
    %cst_11 = arith.constant dense<0.000000e+00> : vector<128x96xf32>
    %31 = tpu.matmul %29, %30, %cst_11 {dimension_numbers = #tpu.dot_dimension_numbers<[1], [0], [0], [1], [0, 0, 1, 1], [], []>} : vector<128x32xbf16>, vector<32x96xbf16>, vector<128x96xf32> -> vector<128x96xf32>
    %c0_12 = arith.constant 0 : index
    %c0_13 = arith.constant 0 : index
    %32 = vector.load %arg5[%c0_12, %c0_13] : memref<1x96xf32, #tpu.memory_space<vmem>>, vector<1x96xf32>
    %33 = vector.shape_cast %32 : vector<1x96xf32> to vector<96xf32>
    %34 = vector.shape_cast %33 : vector<96xf32> to vector<1x96xf32>
    %35 = vector.broadcast %34 : vector<1x96xf32> to vector<128x96xf32>
    %36 = arith.addf %31, %35 : vector<128x96xf32>
    %37 = arith.truncf %36 : vector<128x96xf32> to vector<128x96xbf16>
    %c0_14 = arith.constant 0 : index
    %c0_15 = arith.constant 0 : index
    %38 = vector.load %arg6[%c0_14, %c0_15] : memref<128x96xbf16, #tpu.memory_space<vmem>>, vector<128x96xbf16>
    tpu.vector_store %arg6[%c0_14, %c0_15], %37 {strides = array<i32>} : memref<128x96xbf16, #tpu.memory_space<vmem>>, vector<128x96xbf16>,
    return
  }
  func.func @transform_0(%arg0: i32) -> (i32, i32) {
    %c0_i32 = arith.constant 0 : i32
    %c0_i32_0 = arith.constant 0 : i32
    return %arg0, %c0_i32 : i32, i32
  }
  func.func @transform_1(%arg0: i32) -> (i32, i32) {
    %c0_i32 = arith.constant 0 : i32
    %c0_i32_0 = arith.constant 0 : i32
    %c0_i32_1 = arith.constant 0 : i32
    return %c0_i32, %c0_i32_0 : i32, i32
  }
  func.func @transform_2(%arg0: i32) -> (i32, i32) {
    %c0_i32 = arith.constant 0 : i32
    %c0_i32_0 = arith.constant 0 : i32
    %c0_i32_1 = arith.constant 0 : i32
    return %c0_i32, %c0_i32_0 : i32, i32
  }
  func.func @transform_3(%arg0: i32) -> (i32, i32) {
    %c0_i32 = arith.constant 0 : i32
    %c0_i32_0 = arith.constant 0 : i32
    %c0_i32_1 = arith.constant 0 : i32
    return %c0_i32, %c0_i32_0 : i32, i32
  }
  func.func @transform_4(%arg0: i32) -> (i32, i32) {
    %c0_i32 = arith.constant 0 : i32
    %c0_i32_0 = arith.constant 0 : i32
    %c0_i32_1 = arith.constant 0 : i32
    return %c0_i32, %c0_i32_0 : i32, i32
  }
  func.func @transform_5(%arg0: i32) -> (i32, i32) {
    %c0_i32 = arith.constant 0 : i32
    %c0_i32_0 = arith.constant 0 : i32
    return %arg0, %c0_i32 : i32, i32
  }
}

module attributes {stable_mosaic.version = 11 : i64} {
  func.func @window_attn_kernel(%arg0: i32, %arg1: i32, %arg2: memref<1x4x8x96xbf16, #tpu.memory_space<vmem>>, %arg3: memref<1x1x2x16x16xf32, #tpu.memory_space<vmem>>, %arg4: memref<1x4x8x32xbf16, #tpu.memory_space<vmem>>, %arg5: memref<16x96xbf16, #tpu.memory_space<vmem>>, %arg6: memref<16x32xf32, #tpu.memory_space<vmem>>) attributes {dimension_semantics = [#tpu.dimension_semantics<parallel>, #tpu.dimension_semantics<parallel>], iteration_bounds = array<i64: 2, 2>, scalar_prefetch = 0 : i64, scratch_operands = 2 : i64, tpu.core_type = #tpu.core_type<tc>, window_params = [{transform_indices = @transform_0, window_bounds = array<i64: 1, 4, 8, 96>}, {pipeline_mode = #tpu.pipeline_mode<synchronous>, transform_indices = @transform_1, window_bounds = array<i64: 1, 1, 2, 16, 16>}, {transform_indices = @transform_2, window_bounds = array<i64: 1, 4, 8, 32>}]} {
    %c0 = arith.constant 0 : index
    %c0_0 = arith.constant 0 : index
    %c0_1 = arith.constant 0 : index
    %c0_2 = arith.constant 0 : index
    %0 = vector.load %arg2[%c0, %c0_0, %c0_1, %c0_2] : memref<1x4x8x96xbf16, #tpu.memory_space<vmem>>, vector<1x1x4x96xbf16>
    %1 = vector.shape_cast %0 : vector<1x1x4x96xbf16> to vector<4x96xbf16>
    %c0_3 = arith.constant 0 : index
    %c0_4 = arith.constant 0 : index
    %2 = vector.load %arg5[%c0_3, %c0_4] : memref<16x96xbf16, #tpu.memory_space<vmem>>, vector<4x96xbf16>
    tpu.vector_store %arg5[%c0_3, %c0_4], %1 {strides = array<i32>} : memref<16x96xbf16, #tpu.memory_space<vmem>>, vector<4x96xbf16>,
    %c0_5 = arith.constant 0 : index
    %c1 = arith.constant 1 : index
    %c0_6 = arith.constant 0 : index
    %c0_7 = arith.constant 0 : index
    %3 = vector.load %arg2[%c0_5, %c1, %c0_6, %c0_7] : memref<1x4x8x96xbf16, #tpu.memory_space<vmem>>, vector<1x1x4x96xbf16>
    %4 = vector.shape_cast %3 : vector<1x1x4x96xbf16> to vector<4x96xbf16>
    %c4 = arith.constant 4 : index
    %c0_8 = arith.constant 0 : index
    %5 = vector.load %arg5[%c4, %c0_8] : memref<16x96xbf16, #tpu.memory_space<vmem>>, vector<4x96xbf16>
    tpu.vector_store %arg5[%c4, %c0_8], %4 {strides = array<i32>} : memref<16x96xbf16, #tpu.memory_space<vmem>>, vector<4x96xbf16>,
    %c0_9 = arith.constant 0 : index
    %c2 = arith.constant 2 : index
    %c0_10 = arith.constant 0 : index
    %c0_11 = arith.constant 0 : index
    %6 = vector.load %arg2[%c0_9, %c2, %c0_10, %c0_11] : memref<1x4x8x96xbf16, #tpu.memory_space<vmem>>, vector<1x1x4x96xbf16>
    %7 = vector.shape_cast %6 : vector<1x1x4x96xbf16> to vector<4x96xbf16>
    %c8 = arith.constant 8 : index
    %c0_12 = arith.constant 0 : index
    %8 = vector.load %arg5[%c8, %c0_12] : memref<16x96xbf16, #tpu.memory_space<vmem>>, vector<4x96xbf16>
    tpu.vector_store %arg5[%c8, %c0_12], %7 {strides = array<i32>} : memref<16x96xbf16, #tpu.memory_space<vmem>>, vector<4x96xbf16>,
    %c0_13 = arith.constant 0 : index
    %c3 = arith.constant 3 : index
    %c0_14 = arith.constant 0 : index
    %c0_15 = arith.constant 0 : index
    %9 = vector.load %arg2[%c0_13, %c3, %c0_14, %c0_15] : memref<1x4x8x96xbf16, #tpu.memory_space<vmem>>, vector<1x1x4x96xbf16>
    %10 = vector.shape_cast %9 : vector<1x1x4x96xbf16> to vector<4x96xbf16>
    %c12 = arith.constant 12 : index
    %c0_16 = arith.constant 0 : index
    %11 = vector.load %arg5[%c12, %c0_16] : memref<16x96xbf16, #tpu.memory_space<vmem>>, vector<4x96xbf16>
    tpu.vector_store %arg5[%c12, %c0_16], %10 {strides = array<i32>} : memref<16x96xbf16, #tpu.memory_space<vmem>>, vector<4x96xbf16>,
    %c0_17 = arith.constant 0 : index
    %c0_18 = arith.constant 0 : index
    %12 = vector.load %arg5[%c0_17, %c0_18] : memref<16x96xbf16, #tpu.memory_space<vmem>>, vector<16x96xbf16>
    %13 = vector.extract_strided_slice %12 {offsets = [0, 0], sizes = [16, 16], strides = [1, 1]} : vector<16x96xbf16> to vector<16x16xbf16>
    %14 = vector.extract_strided_slice %12 {offsets = [0, 32], sizes = [16, 16], strides = [1, 1]} : vector<16x96xbf16> to vector<16x16xbf16>
    %15 = vector.extract_strided_slice %12 {offsets = [0, 64], sizes = [16, 16], strides = [1, 1]} : vector<16x96xbf16> to vector<16x16xbf16>
    "tpu.trace_start"() <{level = 10 : i32, message = "nd,md->nm"}> : () -> ()
    %cst = arith.constant dense<0.000000e+00> : vector<16x16xf32>
    %16 = tpu.matmul %13, %14, %cst {dimension_numbers = #tpu.dot_dimension_numbers<[1], [1], [0], [0], [0, 0, 1, 0], [], []>} : vector<16x16xbf16>, vector<16x16xbf16>, vector<16x16xf32> -> vector<16x16xf32>
    "tpu.trace_stop"() : () -> ()
    %c0_19 = arith.constant 0 : index
    %c0_20 = arith.constant 0 : index
    %c0_21 = arith.constant 0 : index
    %c0_22 = arith.constant 0 : index
    %c0_23 = arith.constant 0 : index
    %17 = vector.load %arg3[%c0_19, %c0_20, %c0_21, %c0_22, %c0_23] : memref<1x1x2x16x16xf32, #tpu.memory_space<vmem>>, vector<1x1x1x16x16xf32>
    %18 = vector.shape_cast %17 : vector<1x1x1x16x16xf32> to vector<16x16xf32>
    %19 = arith.addf %16, %18 : vector<16x16xf32>
    %cst_24 = arith.constant dense<0xFF800000> : vector<16xf32>
    %20 = vector.multi_reduction <maximumf>, %19, %cst_24 [1] : vector<16x16xf32> to vector<16xf32>
    %21 = vector.shape_cast %20 : vector<16xf32> to vector<16x1xf32>
    %22 = vector.broadcast %21 : vector<16x1xf32> to vector<16x16xf32>
    %23 = arith.subf %19, %22 : vector<16x16xf32>
    %24 = math.exp %23 : vector<16x16xf32>
    %cst_25 = arith.constant dense<0.000000e+00> : vector<16xf32>
    %25 = vector.multi_reduction <add>, %24, %cst_25 [1] : vector<16x16xf32> to vector<16xf32>
    %26 = vector.shape_cast %25 : vector<16xf32> to vector<16x1xf32>
    %27 = tpu.reciprocal %26 {approx = true} : vector<16x1xf32> -> vector<16x1xf32>
    %28 = vector.broadcast %27 : vector<16x1xf32> to vector<16x16xf32>
    %29 = arith.mulf %24, %28 : vector<16x16xf32>
    %30 = arith.truncf %29 : vector<16x16xf32> to vector<16x16xbf16>
    "tpu.trace_start"() <{level = 10 : i32, message = "nm,md->nd"}> : () -> ()
    %cst_26 = arith.constant dense<0.000000e+00> : vector<16x16xf32>
    %31 = tpu.matmul %30, %15, %cst_26 {dimension_numbers = #tpu.dot_dimension_numbers<[1], [0], [0], [1], [0, 0, 1, 1], [], []>} : vector<16x16xbf16>, vector<16x16xbf16>, vector<16x16xf32> -> vector<16x16xf32>
    "tpu.trace_stop"() : () -> ()
    %c0_27 = arith.constant 0 : index
    %c0_28 = arith.constant 0 : index
    %32 = vector.load %arg6[%c0_27, %c0_28] : memref<16x32xf32, #tpu.memory_space<vmem>>, vector<16x16xf32>
    tpu.vector_store %arg6[%c0_27, %c0_28], %31 {strides = array<i32>} : memref<16x32xf32, #tpu.memory_space<vmem>>, vector<16x16xf32>,
    %33 = vector.extract_strided_slice %12 {offsets = [0, 16], sizes = [16, 16], strides = [1, 1]} : vector<16x96xbf16> to vector<16x16xbf16>
    %34 = vector.extract_strided_slice %12 {offsets = [0, 48], sizes = [16, 16], strides = [1, 1]} : vector<16x96xbf16> to vector<16x16xbf16>
    %35 = vector.extract_strided_slice %12 {offsets = [0, 80], sizes = [16, 16], strides = [1, 1]} : vector<16x96xbf16> to vector<16x16xbf16>
    "tpu.trace_start"() <{level = 10 : i32, message = "nd,md->nm"}> : () -> ()
    %cst_29 = arith.constant dense<0.000000e+00> : vector<16x16xf32>
    %36 = tpu.matmul %33, %34, %cst_29 {dimension_numbers = #tpu.dot_dimension_numbers<[1], [1], [0], [0], [0, 0, 1, 0], [], []>} : vector<16x16xbf16>, vector<16x16xbf16>, vector<16x16xf32> -> vector<16x16xf32>
    "tpu.trace_stop"() : () -> ()
    %c0_30 = arith.constant 0 : index
    %c0_31 = arith.constant 0 : index
    %c1_32 = arith.constant 1 : index
    %c0_33 = arith.constant 0 : index
    %c0_34 = arith.constant 0 : index
    %37 = vector.load %arg3[%c0_30, %c0_31, %c1_32, %c0_33, %c0_34] : memref<1x1x2x16x16xf32, #tpu.memory_space<vmem>>, vector<1x1x1x16x16xf32>
    %38 = vector.shape_cast %37 : vector<1x1x1x16x16xf32> to vector<16x16xf32>
    %39 = arith.addf %36, %38 : vector<16x16xf32>
    %cst_35 = arith.constant dense<0xFF800000> : vector<16xf32>
    %40 = vector.multi_reduction <maximumf>, %39, %cst_35 [1] : vector<16x16xf32> to vector<16xf32>
    %41 = vector.shape_cast %40 : vector<16xf32> to vector<16x1xf32>
    %42 = vector.broadcast %41 : vector<16x1xf32> to vector<16x16xf32>
    %43 = arith.subf %39, %42 : vector<16x16xf32>
    %44 = math.exp %43 : vector<16x16xf32>
    %cst_36 = arith.constant dense<0.000000e+00> : vector<16xf32>
    %45 = vector.multi_reduction <add>, %44, %cst_36 [1] : vector<16x16xf32> to vector<16xf32>
    %46 = vector.shape_cast %45 : vector<16xf32> to vector<16x1xf32>
    %47 = tpu.reciprocal %46 {approx = true} : vector<16x1xf32> -> vector<16x1xf32>
    %48 = vector.broadcast %47 : vector<16x1xf32> to vector<16x16xf32>
    %49 = arith.mulf %44, %48 : vector<16x16xf32>
    %50 = arith.truncf %49 : vector<16x16xf32> to vector<16x16xbf16>
    "tpu.trace_start"() <{level = 10 : i32, message = "nm,md->nd"}> : () -> ()
    %cst_37 = arith.constant dense<0.000000e+00> : vector<16x16xf32>
    %51 = tpu.matmul %50, %35, %cst_37 {dimension_numbers = #tpu.dot_dimension_numbers<[1], [0], [0], [1], [0, 0, 1, 1], [], []>} : vector<16x16xbf16>, vector<16x16xbf16>, vector<16x16xf32> -> vector<16x16xf32>
    "tpu.trace_stop"() : () -> ()
    %c0_38 = arith.constant 0 : index
    %c16 = arith.constant 16 : index
    %52 = vector.load %arg6[%c0_38, %c16] : memref<16x32xf32, #tpu.memory_space<vmem>>, vector<16x16xf32>
    tpu.vector_store %arg6[%c0_38, %c16], %51 {strides = array<i32>} : memref<16x32xf32, #tpu.memory_space<vmem>>, vector<16x16xf32>,
    %c0_39 = arith.constant 0 : index
    %c0_40 = arith.constant 0 : index
    %53 = vector.load %arg6[%c0_39, %c0_40] : memref<16x32xf32, #tpu.memory_space<vmem>>, vector<16x32xf32>
    %54 = vector.extract_strided_slice %53 {offsets = [0, 0], sizes = [4, 32], strides = [1, 1]} : vector<16x32xf32> to vector<4x32xf32>
    %55 = arith.truncf %54 : vector<4x32xf32> to vector<4x32xbf16>
    %c0_41 = arith.constant 0 : index
    %c0_42 = arith.constant 0 : index
    %c0_43 = arith.constant 0 : index
    %c0_44 = arith.constant 0 : index
    %56 = vector.load %arg4[%c0_41, %c0_42, %c0_43, %c0_44] : memref<1x4x8x32xbf16, #tpu.memory_space<vmem>>, vector<1x1x4x32xbf16>
    %57 = vector.shape_cast %56 : vector<1x1x4x32xbf16> to vector<4x32xbf16>
    %58 = vector.shape_cast %55 : vector<4x32xbf16> to vector<1x1x4x32xbf16>
    tpu.vector_store %arg4[%c0_41, %c0_42, %c0_43, %c0_44], %58 {strides = array<i32>} : memref<1x4x8x32xbf16, #tpu.memory_space<vmem>>, vector<1x1x4x32xbf16>,
    %59 = vector.extract_strided_slice %53 {offsets = [4, 0], sizes = [4, 32], strides = [1, 1]} : vector<16x32xf32> to vector<4x32xf32>
    %60 = arith.truncf %59 : vector<4x32xf32> to vector<4x32xbf16>
    %c0_45 = arith.constant 0 : index
    %c1_46 = arith.constant 1 : index
    %c0_47 = arith.constant 0 : index
    %c0_48 = arith.constant 0 : index
    %61 = vector.load %arg4[%c0_45, %c1_46, %c0_47, %c0_48] : memref<1x4x8x32xbf16, #tpu.memory_space<vmem>>, vector<1x1x4x32xbf16>
    %62 = vector.shape_cast %61 : vector<1x1x4x32xbf16> to vector<4x32xbf16>
    %63 = vector.shape_cast %60 : vector<4x32xbf16> to vector<1x1x4x32xbf16>
    tpu.vector_store %arg4[%c0_45, %c1_46, %c0_47, %c0_48], %63 {strides = array<i32>} : memref<1x4x8x32xbf16, #tpu.memory_space<vmem>>, vector<1x1x4x32xbf16>,
    %64 = vector.extract_strided_slice %53 {offsets = [8, 0], sizes = [4, 32], strides = [1, 1]} : vector<16x32xf32> to vector<4x32xf32>
    %65 = arith.truncf %64 : vector<4x32xf32> to vector<4x32xbf16>
    %c0_49 = arith.constant 0 : index
    %c2_50 = arith.constant 2 : index
    %c0_51 = arith.constant 0 : index
    %c0_52 = arith.constant 0 : index
    %66 = vector.load %arg4[%c0_49, %c2_50, %c0_51, %c0_52] : memref<1x4x8x32xbf16, #tpu.memory_space<vmem>>, vector<1x1x4x32xbf16>
    %67 = vector.shape_cast %66 : vector<1x1x4x32xbf16> to vector<4x32xbf16>
    %68 = vector.shape_cast %65 : vector<4x32xbf16> to vector<1x1x4x32xbf16>
    tpu.vector_store %arg4[%c0_49, %c2_50, %c0_51, %c0_52], %68 {strides = array<i32>} : memref<1x4x8x32xbf16, #tpu.memory_space<vmem>>, vector<1x1x4x32xbf16>,
    %69 = vector.extract_strided_slice %53 {offsets = [12, 0], sizes = [4, 32], strides = [1, 1]} : vector<16x32xf32> to vector<4x32xf32>
    %70 = arith.truncf %69 : vector<4x32xf32> to vector<4x32xbf16>
    %c0_53 = arith.constant 0 : index
    %c3_54 = arith.constant 3 : index
    %c0_55 = arith.constant 0 : index
    %c0_56 = arith.constant 0 : index
    %71 = vector.load %arg4[%c0_53, %c3_54, %c0_55, %c0_56] : memref<1x4x8x32xbf16, #tpu.memory_space<vmem>>, vector<1x1x4x32xbf16>
    %72 = vector.shape_cast %71 : vector<1x1x4x32xbf16> to vector<4x32xbf16>
    %73 = vector.shape_cast %70 : vector<4x32xbf16> to vector<1x1x4x32xbf16>
    tpu.vector_store %arg4[%c0_53, %c3_54, %c0_55, %c0_56], %73 {strides = array<i32>} : memref<1x4x8x32xbf16, #tpu.memory_space<vmem>>, vector<1x1x4x32xbf16>,
    %c0_57 = arith.constant 0 : index
    %c0_58 = arith.constant 0 : index
    %c4_59 = arith.constant 4 : index
    %c0_60 = arith.constant 0 : index
    %74 = vector.load %arg2[%c0_57, %c0_58, %c4_59, %c0_60] : memref<1x4x8x96xbf16, #tpu.memory_space<vmem>>, vector<1x1x4x96xbf16>
    %75 = vector.shape_cast %74 : vector<1x1x4x96xbf16> to vector<4x96xbf16>
    %c0_61 = arith.constant 0 : index
    %c0_62 = arith.constant 0 : index
    %76 = vector.load %arg5[%c0_61, %c0_62] : memref<16x96xbf16, #tpu.memory_space<vmem>>, vector<4x96xbf16>
    tpu.vector_store %arg5[%c0_61, %c0_62], %75 {strides = array<i32>} : memref<16x96xbf16, #tpu.memory_space<vmem>>, vector<4x96xbf16>,
    %c0_63 = arith.constant 0 : index
    %c1_64 = arith.constant 1 : index
    %c4_65 = arith.constant 4 : index
    %c0_66 = arith.constant 0 : index
    %77 = vector.load %arg2[%c0_63, %c1_64, %c4_65, %c0_66] : memref<1x4x8x96xbf16, #tpu.memory_space<vmem>>, vector<1x1x4x96xbf16>
    %78 = vector.shape_cast %77 : vector<1x1x4x96xbf16> to vector<4x96xbf16>
    %c4_67 = arith.constant 4 : index
    %c0_68 = arith.constant 0 : index
    %79 = vector.load %arg5[%c4_67, %c0_68] : memref<16x96xbf16, #tpu.memory_space<vmem>>, vector<4x96xbf16>
    tpu.vector_store %arg5[%c4_67, %c0_68], %78 {strides = array<i32>} : memref<16x96xbf16, #tpu.memory_space<vmem>>, vector<4x96xbf16>,
    %c0_69 = arith.constant 0 : index
    %c2_70 = arith.constant 2 : index
    %c4_71 = arith.constant 4 : index
    %c0_72 = arith.constant 0 : index
    %80 = vector.load %arg2[%c0_69, %c2_70, %c4_71, %c0_72] : memref<1x4x8x96xbf16, #tpu.memory_space<vmem>>, vector<1x1x4x96xbf16>
    %81 = vector.shape_cast %80 : vector<1x1x4x96xbf16> to vector<4x96xbf16>
    %c8_73 = arith.constant 8 : index
    %c0_74 = arith.constant 0 : index
    %82 = vector.load %arg5[%c8_73, %c0_74] : memref<16x96xbf16, #tpu.memory_space<vmem>>, vector<4x96xbf16>
    tpu.vector_store %arg5[%c8_73, %c0_74], %81 {strides = array<i32>} : memref<16x96xbf16, #tpu.memory_space<vmem>>, vector<4x96xbf16>,
    %c0_75 = arith.constant 0 : index
    %c3_76 = arith.constant 3 : index
    %c4_77 = arith.constant 4 : index
    %c0_78 = arith.constant 0 : index
    %83 = vector.load %arg2[%c0_75, %c3_76, %c4_77, %c0_78] : memref<1x4x8x96xbf16, #tpu.memory_space<vmem>>, vector<1x1x4x96xbf16>
    %84 = vector.shape_cast %83 : vector<1x1x4x96xbf16> to vector<4x96xbf16>
    %c12_79 = arith.constant 12 : index
    %c0_80 = arith.constant 0 : index
    %85 = vector.load %arg5[%c12_79, %c0_80] : memref<16x96xbf16, #tpu.memory_space<vmem>>, vector<4x96xbf16>
    tpu.vector_store %arg5[%c12_79, %c0_80], %84 {strides = array<i32>} : memref<16x96xbf16, #tpu.memory_space<vmem>>, vector<4x96xbf16>,
    %c0_81 = arith.constant 0 : index
    %c0_82 = arith.constant 0 : index
    %86 = vector.load %arg5[%c0_81, %c0_82] : memref<16x96xbf16, #tpu.memory_space<vmem>>, vector<16x96xbf16>
    %87 = vector.extract_strided_slice %86 {offsets = [0, 0], sizes = [16, 16], strides = [1, 1]} : vector<16x96xbf16> to vector<16x16xbf16>
    %88 = vector.extract_strided_slice %86 {offsets = [0, 32], sizes = [16, 16], strides = [1, 1]} : vector<16x96xbf16> to vector<16x16xbf16>
    %89 = vector.extract_strided_slice %86 {offsets = [0, 64], sizes = [16, 16], strides = [1, 1]} : vector<16x96xbf16> to vector<16x16xbf16>
    "tpu.trace_start"() <{level = 10 : i32, message = "nd,md->nm"}> : () -> ()
    %cst_83 = arith.constant dense<0.000000e+00> : vector<16x16xf32>
    %90 = tpu.matmul %87, %88, %cst_83 {dimension_numbers = #tpu.dot_dimension_numbers<[1], [1], [0], [0], [0, 0, 1, 0], [], []>} : vector<16x16xbf16>, vector<16x16xbf16>, vector<16x16xf32> -> vector<16x16xf32>
    "tpu.trace_stop"() : () -> ()
    %c0_84 = arith.constant 0 : index
    %c0_85 = arith.constant 0 : index
    %c0_86 = arith.constant 0 : index
    %c0_87 = arith.constant 0 : index
    %c0_88 = arith.constant 0 : index
    %91 = vector.load %arg3[%c0_84, %c0_85, %c0_86, %c0_87, %c0_88] : memref<1x1x2x16x16xf32, #tpu.memory_space<vmem>>, vector<1x1x1x16x16xf32>
    %92 = vector.shape_cast %91 : vector<1x1x1x16x16xf32> to vector<16x16xf32>
    %93 = arith.addf %90, %92 : vector<16x16xf32>
    %cst_89 = arith.constant dense<0xFF800000> : vector<16xf32>
    %94 = vector.multi_reduction <maximumf>, %93, %cst_89 [1] : vector<16x16xf32> to vector<16xf32>
    %95 = vector.shape_cast %94 : vector<16xf32> to vector<16x1xf32>
    %96 = vector.broadcast %95 : vector<16x1xf32> to vector<16x16xf32>
    %97 = arith.subf %93, %96 : vector<16x16xf32>
    %98 = math.exp %97 : vector<16x16xf32>
    %cst_90 = arith.constant dense<0.000000e+00> : vector<16xf32>
    %99 = vector.multi_reduction <add>, %98, %cst_90 [1] : vector<16x16xf32> to vector<16xf32>
    %100 = vector.shape_cast %99 : vector<16xf32> to vector<16x1xf32>
    %101 = tpu.reciprocal %100 {approx = true} : vector<16x1xf32> -> vector<16x1xf32>
    %102 = vector.broadcast %101 : vector<16x1xf32> to vector<16x16xf32>
    %103 = arith.mulf %98, %102 : vector<16x16xf32>
    %104 = arith.truncf %103 : vector<16x16xf32> to vector<16x16xbf16>
    "tpu.trace_start"() <{level = 10 : i32, message = "nm,md->nd"}> : () -> ()
    %cst_91 = arith.constant dense<0.000000e+00> : vector<16x16xf32>
    %105 = tpu.matmul %104, %89, %cst_91 {dimension_numbers = #tpu.dot_dimension_numbers<[1], [0], [0], [1], [0, 0, 1, 1], [], []>} : vector<16x16xbf16>, vector<16x16xbf16>, vector<16x16xf32> -> vector<16x16xf32>
    "tpu.trace_stop"() : () -> ()
    %c0_92 = arith.constant 0 : index
    %c0_93 = arith.constant 0 : index
    %106 = vector.load %arg6[%c0_92, %c0_93] : memref<16x32xf32, #tpu.memory_space<vmem>>, vector<16x16xf32>
    tpu.vector_store %arg6[%c0_92, %c0_93], %105 {strides = array<i32>} : memref<16x32xf32, #tpu.memory_space<vmem>>, vector<16x16xf32>,
    %107 = vector.extract_strided_slice %86 {offsets = [0, 16], sizes = [16, 16], strides = [1, 1]} : vector<16x96xbf16> to vector<16x16xbf16>
    %108 = vector.extract_strided_slice %86 {offsets = [0, 48], sizes = [16, 16], strides = [1, 1]} : vector<16x96xbf16> to vector<16x16xbf16>
    %109 = vector.extract_strided_slice %86 {offsets = [0, 80], sizes = [16, 16], strides = [1, 1]} : vector<16x96xbf16> to vector<16x16xbf16>
    "tpu.trace_start"() <{level = 10 : i32, message = "nd,md->nm"}> : () -> ()
    %cst_94 = arith.constant dense<0.000000e+00> : vector<16x16xf32>
    %110 = tpu.matmul %107, %108, %cst_94 {dimension_numbers = #tpu.dot_dimension_numbers<[1], [1], [0], [0], [0, 0, 1, 0], [], []>} : vector<16x16xbf16>, vector<16x16xbf16>, vector<16x16xf32> -> vector<16x16xf32>
    "tpu.trace_stop"() : () -> ()
    %c0_95 = arith.constant 0 : index
    %c0_96 = arith.constant 0 : index
    %c1_97 = arith.constant 1 : index
    %c0_98 = arith.constant 0 : index
    %c0_99 = arith.constant 0 : index
    %111 = vector.load %arg3[%c0_95, %c0_96, %c1_97, %c0_98, %c0_99] : memref<1x1x2x16x16xf32, #tpu.memory_space<vmem>>, vector<1x1x1x16x16xf32>
    %112 = vector.shape_cast %111 : vector<1x1x1x16x16xf32> to vector<16x16xf32>
    %113 = arith.addf %110, %112 : vector<16x16xf32>
    %cst_100 = arith.constant dense<0xFF800000> : vector<16xf32>
    %114 = vector.multi_reduction <maximumf>, %113, %cst_100 [1] : vector<16x16xf32> to vector<16xf32>
    %115 = vector.shape_cast %114 : vector<16xf32> to vector<16x1xf32>
    %116 = vector.broadcast %115 : vector<16x1xf32> to vector<16x16xf32>
    %117 = arith.subf %113, %116 : vector<16x16xf32>
    %118 = math.exp %117 : vector<16x16xf32>
    %cst_101 = arith.constant dense<0.000000e+00> : vector<16xf32>
    %119 = vector.multi_reduction <add>, %118, %cst_101 [1] : vector<16x16xf32> to vector<16xf32>
    %120 = vector.shape_cast %119 : vector<16xf32> to vector<16x1xf32>
    %121 = tpu.reciprocal %120 {approx = true} : vector<16x1xf32> -> vector<16x1xf32>
    %122 = vector.broadcast %121 : vector<16x1xf32> to vector<16x16xf32>
    %123 = arith.mulf %118, %122 : vector<16x16xf32>
    %124 = arith.truncf %123 : vector<16x16xf32> to vector<16x16xbf16>
    "tpu.trace_start"() <{level = 10 : i32, message = "nm,md->nd"}> : () -> ()
    %cst_102 = arith.constant dense<0.000000e+00> : vector<16x16xf32>
    %125 = tpu.matmul %124, %109, %cst_102 {dimension_numbers = #tpu.dot_dimension_numbers<[1], [0], [0], [1], [0, 0, 1, 1], [], []>} : vector<16x16xbf16>, vector<16x16xbf16>, vector<16x16xf32> -> vector<16x16xf32>
    "tpu.trace_stop"() : () -> ()
    %c0_103 = arith.constant 0 : index
    %c16_104 = arith.constant 16 : index
    %126 = vector.load %arg6[%c0_103, %c16_104] : memref<16x32xf32, #tpu.memory_space<vmem>>, vector<16x16xf32>
    tpu.vector_store %arg6[%c0_103, %c16_104], %125 {strides = array<i32>} : memref<16x32xf32, #tpu.memory_space<vmem>>, vector<16x16xf32>,
    %c0_105 = arith.constant 0 : index
    %c0_106 = arith.constant 0 : index
    %127 = vector.load %arg6[%c0_105, %c0_106] : memref<16x32xf32, #tpu.memory_space<vmem>>, vector<16x32xf32>
    %128 = vector.extract_strided_slice %127 {offsets = [0, 0], sizes = [4, 32], strides = [1, 1]} : vector<16x32xf32> to vector<4x32xf32>
    %129 = arith.truncf %128 : vector<4x32xf32> to vector<4x32xbf16>
    %c0_107 = arith.constant 0 : index
    %c0_108 = arith.constant 0 : index
    %c4_109 = arith.constant 4 : index
    %c0_110 = arith.constant 0 : index
    %130 = vector.load %arg4[%c0_107, %c0_108, %c4_109, %c0_110] : memref<1x4x8x32xbf16, #tpu.memory_space<vmem>>, vector<1x1x4x32xbf16>
    %131 = vector.shape_cast %130 : vector<1x1x4x32xbf16> to vector<4x32xbf16>
    %132 = vector.shape_cast %129 : vector<4x32xbf16> to vector<1x1x4x32xbf16>
    tpu.vector_store %arg4[%c0_107, %c0_108, %c4_109, %c0_110], %132 {strides = array<i32>} : memref<1x4x8x32xbf16, #tpu.memory_space<vmem>>, vector<1x1x4x32xbf16>,
    %133 = vector.extract_strided_slice %127 {offsets = [4, 0], sizes = [4, 32], strides = [1, 1]} : vector<16x32xf32> to vector<4x32xf32>
    %134 = arith.truncf %133 : vector<4x32xf32> to vector<4x32xbf16>
    %c0_111 = arith.constant 0 : index
    %c1_112 = arith.constant 1 : index
    %c4_113 = arith.constant 4 : index
    %c0_114 = arith.constant 0 : index
    %135 = vector.load %arg4[%c0_111, %c1_112, %c4_113, %c0_114] : memref<1x4x8x32xbf16, #tpu.memory_space<vmem>>, vector<1x1x4x32xbf16>
    %136 = vector.shape_cast %135 : vector<1x1x4x32xbf16> to vector<4x32xbf16>
    %137 = vector.shape_cast %134 : vector<4x32xbf16> to vector<1x1x4x32xbf16>
    tpu.vector_store %arg4[%c0_111, %c1_112, %c4_113, %c0_114], %137 {strides = array<i32>} : memref<1x4x8x32xbf16, #tpu.memory_space<vmem>>, vector<1x1x4x32xbf16>,
    %138 = vector.extract_strided_slice %127 {offsets = [8, 0], sizes = [4, 32], strides = [1, 1]} : vector<16x32xf32> to vector<4x32xf32>
    %139 = arith.truncf %138 : vector<4x32xf32> to vector<4x32xbf16>
    %c0_115 = arith.constant 0 : index
    %c2_116 = arith.constant 2 : index
    %c4_117 = arith.constant 4 : index
    %c0_118 = arith.constant 0 : index
    %140 = vector.load %arg4[%c0_115, %c2_116, %c4_117, %c0_118] : memref<1x4x8x32xbf16, #tpu.memory_space<vmem>>, vector<1x1x4x32xbf16>
    %141 = vector.shape_cast %140 : vector<1x1x4x32xbf16> to vector<4x32xbf16>
    %142 = vector.shape_cast %139 : vector<4x32xbf16> to vector<1x1x4x32xbf16>
    tpu.vector_store %arg4[%c0_115, %c2_116, %c4_117, %c0_118], %142 {strides = array<i32>} : memref<1x4x8x32xbf16, #tpu.memory_space<vmem>>, vector<1x1x4x32xbf16>,
    %143 = vector.extract_strided_slice %127 {offsets = [12, 0], sizes = [4, 32], strides = [1, 1]} : vector<16x32xf32> to vector<4x32xf32>
    %144 = arith.truncf %143 : vector<4x32xf32> to vector<4x32xbf16>
    %c0_119 = arith.constant 0 : index
    %c3_120 = arith.constant 3 : index
    %c4_121 = arith.constant 4 : index
    %c0_122 = arith.constant 0 : index
    %145 = vector.load %arg4[%c0_119, %c3_120, %c4_121, %c0_122] : memref<1x4x8x32xbf16, #tpu.memory_space<vmem>>, vector<1x1x4x32xbf16>
    %146 = vector.shape_cast %145 : vector<1x1x4x32xbf16> to vector<4x32xbf16>
    %147 = vector.shape_cast %144 : vector<4x32xbf16> to vector<1x1x4x32xbf16>
    tpu.vector_store %arg4[%c0_119, %c3_120, %c4_121, %c0_122], %147 {strides = array<i32>} : memref<1x4x8x32xbf16, #tpu.memory_space<vmem>>, vector<1x1x4x32xbf16>,
    return
  }
  func.func @transform_0(%arg0: i32, %arg1: i32) -> (i32, i32, i32, i32) {
    %c0_i32 = arith.constant 0 : i32
    %c0_i32_0 = arith.constant 0 : i32
    %c0_i32_1 = arith.constant 0 : i32
    return %arg0, %arg1, %c0_i32, %c0_i32_0 : i32, i32, i32, i32
  }
  func.func @transform_1(%arg0: i32, %arg1: i32) -> (i32, i32, i32, i32, i32) {
    %c0_i32 = arith.constant 0 : i32
    %c0_i32_0 = arith.constant 0 : i32
    %c0_i32_1 = arith.constant 0 : i32
    %c0_i32_2 = arith.constant 0 : i32
    %c0_i32_3 = arith.constant 0 : i32
    %c0_i32_4 = arith.constant 0 : i32
    return %c0_i32, %c0_i32_0, %c0_i32_1, %c0_i32_2, %c0_i32_3 : i32, i32, i32, i32, i32
  }
  func.func @transform_2(%arg0: i32, %arg1: i32) -> (i32, i32, i32, i32) {
    %c0_i32 = arith.constant 0 : i32
    %c0_i32_0 = arith.constant 0 : i32
    %c0_i32_1 = arith.constant 0 : i32
    return %arg0, %arg1, %c0_i32, %c0_i32_0 : i32, i32, i32, i32
  }
}

module attributes {stable_mosaic.version = 11 : i64} {
  func.func @proj_mlp_kernel(%arg0: i32, %arg1: memref<128x32xf32, #tpu.memory_space<vmem>>, %arg2: memref<128x32xbf16, #tpu.memory_space<vmem>>, %arg3: memref<32x32xbf16, #tpu.memory_space<vmem>>, %arg4: memref<1x32xf32, #tpu.memory_space<vmem>>, %arg5: memref<1x32xf32, #tpu.memory_space<vmem>>, %arg6: memref<1x32xf32, #tpu.memory_space<vmem>>, %arg7: memref<32x128xbf16, #tpu.memory_space<vmem>>, %arg8: memref<1x128xf32, #tpu.memory_space<vmem>>, %arg9: memref<128x32xbf16, #tpu.memory_space<vmem>>, %arg10: memref<1x32xf32, #tpu.memory_space<vmem>>, %arg11: memref<128x32xf32, #tpu.memory_space<vmem>>) attributes {dimension_semantics = [#tpu.dimension_semantics<parallel>], iteration_bounds = array<i64: 1>, scalar_prefetch = 0 : i64, scratch_operands = 0 : i64, tpu.core_type = #tpu.core_type<tc>, window_params = [{transform_indices = @transform_0, window_bounds = array<i64: 128, 32>}, {transform_indices = @transform_1, window_bounds = array<i64: 128, 32>}, {pipeline_mode = #tpu.pipeline_mode<synchronous>, transform_indices = @transform_2, window_bounds = array<i64: 32, 32>}, {pipeline_mode = #tpu.pipeline_mode<synchronous>, transform_indices = @transform_3, window_bounds = array<i64: 1, 32>}, {pipeline_mode = #tpu.pipeline_mode<synchronous>, transform_indices = @transform_4, window_bounds = array<i64: 1, 32>}, {pipeline_mode = #tpu.pipeline_mode<synchronous>, transform_indices = @transform_5, window_bounds = array<i64: 1, 32>}, {pipeline_mode = #tpu.pipeline_mode<synchronous>, transform_indices = @transform_6, window_bounds = array<i64: 32, 128>}, {pipeline_mode = #tpu.pipeline_mode<synchronous>, transform_indices = @transform_7, window_bounds = array<i64: 1, 128>}, {pipeline_mode = #tpu.pipeline_mode<synchronous>, transform_indices = @transform_8, window_bounds = array<i64: 128, 32>}, {pipeline_mode = #tpu.pipeline_mode<synchronous>, transform_indices = @transform_9, window_bounds = array<i64: 1, 32>}, {transform_indices = @transform_10, window_bounds = array<i64: 128, 32>}]} {
    %c0 = arith.constant 0 : index
    %c0_0 = arith.constant 0 : index
    %0 = vector.load %arg2[%c0, %c0_0] : memref<128x32xbf16, #tpu.memory_space<vmem>>, vector<128x32xbf16>
    %c0_1 = arith.constant 0 : index
    %c0_2 = arith.constant 0 : index
    %1 = vector.load %arg3[%c0_1, %c0_2] : memref<32x32xbf16, #tpu.memory_space<vmem>>, vector<32x32xbf16>
    %cst = arith.constant dense<0.000000e+00> : vector<128x32xf32>
    %2 = tpu.matmul %0, %1, %cst {dimension_numbers = #tpu.dot_dimension_numbers<[1], [0], [0], [1], [0, 0, 1, 1], [], []>} : vector<128x32xbf16>, vector<32x32xbf16>, vector<128x32xf32> -> vector<128x32xf32>
    %c0_3 = arith.constant 0 : index
    %c0_4 = arith.constant 0 : index
    %3 = vector.load %arg4[%c0_3, %c0_4] : memref<1x32xf32, #tpu.memory_space<vmem>>, vector<1x32xf32>
    %4 = vector.shape_cast %3 : vector<1x32xf32> to vector<32xf32>
    %5 = vector.shape_cast %4 : vector<32xf32> to vector<1x32xf32>
    %6 = vector.broadcast %5 : vector<1x32xf32> to vector<128x32xf32>
    %7 = arith.addf %2, %6 : vector<128x32xf32>
    %c0_5 = arith.constant 0 : index
    %c0_6 = arith.constant 0 : index
    %8 = vector.load %arg1[%c0_5, %c0_6] : memref<128x32xf32, #tpu.memory_space<vmem>>, vector<128x32xf32>
    %9 = arith.addf %8, %7 : vector<128x32xf32>
    %cst_7 = arith.constant dense<0.000000e+00> : vector<128xf32>
    %10 = vector.multi_reduction <add>, %9, %cst_7 [1] : vector<128x32xf32> to vector<128xf32>
    %11 = vector.shape_cast %10 : vector<128xf32> to vector<128x1xf32>
    %cst_8 = arith.constant 3.200000e+01 : f32
    %12 = vector.broadcast %cst_8 : f32 to vector<128x1xf32>
    %13 = arith.divf %11, %12 : vector<128x1xf32>
    %14 = vector.broadcast %13 : vector<128x1xf32> to vector<128x32xf32>
    %15 = arith.subf %9, %14 : vector<128x32xf32>
    %16 = arith.mulf %15, %15 : vector<128x32xf32>
    %cst_9 = arith.constant dense<0.000000e+00> : vector<128xf32>
    %17 = vector.multi_reduction <add>, %16, %cst_9 [1] : vector<128x32xf32> to vector<128xf32>
    %18 = vector.shape_cast %17 : vector<128xf32> to vector<128x1xf32>
    %cst_10 = arith.constant 3.200000e+01 : f32
    %19 = vector.broadcast %cst_10 : f32 to vector<128x1xf32>
    %20 = arith.divf %18, %19 : vector<128x1xf32>
    %21 = vector.broadcast %13 : vector<128x1xf32> to vector<128x32xf32>
    %22 = arith.subf %9, %21 : vector<128x32xf32>
    %cst_11 = arith.constant 9.99999974E-6 : f32
    %23 = vector.broadcast %cst_11 : f32 to vector<128x1xf32>
    %24 = arith.addf %20, %23 : vector<128x1xf32>
    %25 = math.rsqrt %24 : vector<128x1xf32>
    %26 = vector.broadcast %25 : vector<128x1xf32> to vector<128x32xf32>
    %27 = arith.mulf %22, %26 : vector<128x32xf32>
    %c0_12 = arith.constant 0 : index
    %c0_13 = arith.constant 0 : index
    %28 = vector.load %arg5[%c0_12, %c0_13] : memref<1x32xf32, #tpu.memory_space<vmem>>, vector<1x32xf32>
    %29 = vector.shape_cast %28 : vector<1x32xf32> to vector<32xf32>
    %30 = vector.shape_cast %29 : vector<32xf32> to vector<1x32xf32>
    %31 = vector.broadcast %30 : vector<1x32xf32> to vector<128x32xf32>
    %32 = arith.mulf %27, %31 : vector<128x32xf32>
    %c0_14 = arith.constant 0 : index
    %c0_15 = arith.constant 0 : index
    %33 = vector.load %arg6[%c0_14, %c0_15] : memref<1x32xf32, #tpu.memory_space<vmem>>, vector<1x32xf32>
    %34 = vector.shape_cast %33 : vector<1x32xf32> to vector<32xf32>
    %35 = vector.shape_cast %34 : vector<32xf32> to vector<1x32xf32>
    %36 = vector.broadcast %35 : vector<1x32xf32> to vector<128x32xf32>
    %37 = arith.addf %32, %36 : vector<128x32xf32>
    %38 = arith.truncf %37 : vector<128x32xf32> to vector<128x32xbf16>
    %c0_16 = arith.constant 0 : index
    %c0_17 = arith.constant 0 : index
    %39 = vector.load %arg7[%c0_16, %c0_17] : memref<32x128xbf16, #tpu.memory_space<vmem>>, vector<32x128xbf16>
    %cst_18 = arith.constant dense<0.000000e+00> : vector<128x128xf32>
    %40 = tpu.matmul %38, %39, %cst_18 {dimension_numbers = #tpu.dot_dimension_numbers<[1], [0], [0], [1], [0, 0, 1, 1], [], []>} : vector<128x32xbf16>, vector<32x128xbf16>, vector<128x128xf32> -> vector<128x128xf32>
    %c0_19 = arith.constant 0 : index
    %c0_20 = arith.constant 0 : index
    %41 = vector.load %arg8[%c0_19, %c0_20] : memref<1x128xf32, #tpu.memory_space<vmem>>, vector<1x128xf32>
    %42 = vector.shape_cast %41 : vector<1x128xf32> to vector<128xf32>
    %43 = vector.shape_cast %42 : vector<128xf32> to vector<1x128xf32>
    %44 = vector.broadcast %43 : vector<1x128xf32> to vector<128x128xf32>
    %45 = arith.addf %40, %44 : vector<128x128xf32>
    %cst_21 = arith.constant 5.000000e-01 : f32
    %46 = vector.broadcast %cst_21 : f32 to vector<128x128xf32>
    %47 = arith.mulf %46, %45 : vector<128x128xf32>
    %cst_22 = arith.constant 0.707106769 : f32
    %48 = vector.broadcast %cst_22 : f32 to vector<128x128xf32>
    %49 = arith.mulf %45, %48 : vector<128x128xf32>
    %50 = math.erf %49 : vector<128x128xf32>
    %cst_23 = arith.constant 1.000000e+00 : f32
    %51 = vector.broadcast %cst_23 : f32 to vector<128x128xf32>
    %52 = arith.addf %51, %50 : vector<128x128xf32>
    %53 = arith.mulf %47, %52 : vector<128x128xf32>
    %54 = arith.truncf %53 : vector<128x128xf32> to vector<128x128xbf16>
    %c0_24 = arith.constant 0 : index
    %c0_25 = arith.constant 0 : index
    %55 = vector.load %arg9[%c0_24, %c0_25] : memref<128x32xbf16, #tpu.memory_space<vmem>>, vector<128x32xbf16>
    %cst_26 = arith.constant dense<0.000000e+00> : vector<128x32xf32>
    %56 = tpu.matmul %54, %55, %cst_26 {dimension_numbers = #tpu.dot_dimension_numbers<[1], [0], [0], [1], [0, 0, 1, 1], [], []>} : vector<128x128xbf16>, vector<128x32xbf16>, vector<128x32xf32> -> vector<128x32xf32>
    %c0_27 = arith.constant 0 : index
    %c0_28 = arith.constant 0 : index
    %57 = vector.load %arg10[%c0_27, %c0_28] : memref<1x32xf32, #tpu.memory_space<vmem>>, vector<1x32xf32>
    %58 = vector.shape_cast %57 : vector<1x32xf32> to vector<32xf32>
    %59 = vector.shape_cast %58 : vector<32xf32> to vector<1x32xf32>
    %60 = vector.broadcast %59 : vector<1x32xf32> to vector<128x32xf32>
    %61 = arith.addf %56, %60 : vector<128x32xf32>
    %62 = arith.addf %9, %61 : vector<128x32xf32>
    %c0_29 = arith.constant 0 : index
    %c0_30 = arith.constant 0 : index
    %63 = vector.load %arg11[%c0_29, %c0_30] : memref<128x32xf32, #tpu.memory_space<vmem>>, vector<128x32xf32>
    tpu.vector_store %arg11[%c0_29, %c0_30], %62 {strides = array<i32>} : memref<128x32xf32, #tpu.memory_space<vmem>>, vector<128x32xf32>,
    return
  }
  func.func @transform_0(%arg0: i32) -> (i32, i32) {
    %c0_i32 = arith.constant 0 : i32
    %c0_i32_0 = arith.constant 0 : i32
    return %arg0, %c0_i32 : i32, i32
  }
  func.func @transform_1(%arg0: i32) -> (i32, i32) {
    %c0_i32 = arith.constant 0 : i32
    %c0_i32_0 = arith.constant 0 : i32
    return %arg0, %c0_i32 : i32, i32
  }
  func.func @transform_2(%arg0: i32) -> (i32, i32) {
    %c0_i32 = arith.constant 0 : i32
    %c0_i32_0 = arith.constant 0 : i32
    %c0_i32_1 = arith.constant 0 : i32
    return %c0_i32, %c0_i32_0 : i32, i32
  }
  func.func @transform_3(%arg0: i32) -> (i32, i32) {
    %c0_i32 = arith.constant 0 : i32
    %c0_i32_0 = arith.constant 0 : i32
    %c0_i32_1 = arith.constant 0 : i32
    return %c0_i32, %c0_i32_0 : i32, i32
  }
  func.func @transform_4(%arg0: i32) -> (i32, i32) {
    %c0_i32 = arith.constant 0 : i32
    %c0_i32_0 = arith.constant 0 : i32
    %c0_i32_1 = arith.constant 0 : i32
    return %c0_i32, %c0_i32_0 : i32, i32
  }
  func.func @transform_5(%arg0: i32) -> (i32, i32) {
    %c0_i32 = arith.constant 0 : i32
    %c0_i32_0 = arith.constant 0 : i32
    %c0_i32_1 = arith.constant 0 : i32
    return %c0_i32, %c0_i32_0 : i32, i32
  }
  func.func @transform_6(%arg0: i32) -> (i32, i32) {
    %c0_i32 = arith.constant 0 : i32
    %c0_i32_0 = arith.constant 0 : i32
    %c0_i32_1 = arith.constant 0 : i32
    return %c0_i32, %c0_i32_0 : i32, i32
  }
  func.func @transform_7(%arg0: i32) -> (i32, i32) {
    %c0_i32 = arith.constant 0 : i32
    %c0_i32_0 = arith.constant 0 : i32
    %c0_i32_1 = arith.constant 0 : i32
    return %c0_i32, %c0_i32_0 : i32, i32
  }
  func.func @transform_8(%arg0: i32) -> (i32, i32) {
    %c0_i32 = arith.constant 0 : i32
    %c0_i32_0 = arith.constant 0 : i32
    %c0_i32_1 = arith.constant 0 : i32
    return %c0_i32, %c0_i32_0 : i32, i32
  }
  func.func @transform_9(%arg0: i32) -> (i32, i32) {
    %c0_i32 = arith.constant 0 : i32
    %c0_i32_0 = arith.constant 0 : i32
    %c0_i32_1 = arith.constant 0 : i32
    return %c0_i32, %c0_i32_0 : i32, i32
  }
  func.func @transform_10(%arg0: i32) -> (i32, i32) {
    %c0_i32 = arith.constant 0 : i32
    %c0_i32_0 = arith.constant 0 : i32
    return %arg0, %c0_i32 : i32, i32
  }
}

module attributes {stable_mosaic.version = 11 : i64} {
  func.func @window_attn_kernel(%arg0: i32, %arg1: i32, %arg2: memref<1x4x8x96xbf16, #tpu.memory_space<vmem>>, %arg3: memref<1x2x2x16x16xf32, #tpu.memory_space<vmem>>, %arg4: memref<1x4x8x32xbf16, #tpu.memory_space<vmem>>, %arg5: memref<16x96xbf16, #tpu.memory_space<vmem>>, %arg6: memref<16x32xf32, #tpu.memory_space<vmem>>) attributes {dimension_semantics = [#tpu.dimension_semantics<parallel>, #tpu.dimension_semantics<parallel>], iteration_bounds = array<i64: 2, 2>, scalar_prefetch = 0 : i64, scratch_operands = 2 : i64, tpu.core_type = #tpu.core_type<tc>, window_params = [{transform_indices = @transform_0, window_bounds = array<i64: 1, 4, 8, 96>}, {transform_indices = @transform_1, window_bounds = array<i64: 1, 2, 2, 16, 16>}, {transform_indices = @transform_2, window_bounds = array<i64: 1, 4, 8, 32>}]} {
    %c0 = arith.constant 0 : index
    %c0_0 = arith.constant 0 : index
    %c0_1 = arith.constant 0 : index
    %c0_2 = arith.constant 0 : index
    %0 = vector.load %arg2[%c0, %c0_0, %c0_1, %c0_2] : memref<1x4x8x96xbf16, #tpu.memory_space<vmem>>, vector<1x1x4x96xbf16>
    %1 = vector.shape_cast %0 : vector<1x1x4x96xbf16> to vector<4x96xbf16>
    %c0_3 = arith.constant 0 : index
    %c0_4 = arith.constant 0 : index
    %2 = vector.load %arg5[%c0_3, %c0_4] : memref<16x96xbf16, #tpu.memory_space<vmem>>, vector<4x96xbf16>
    tpu.vector_store %arg5[%c0_3, %c0_4], %1 {strides = array<i32>} : memref<16x96xbf16, #tpu.memory_space<vmem>>, vector<4x96xbf16>,
    %c0_5 = arith.constant 0 : index
    %c1 = arith.constant 1 : index
    %c0_6 = arith.constant 0 : index
    %c0_7 = arith.constant 0 : index
    %3 = vector.load %arg2[%c0_5, %c1, %c0_6, %c0_7] : memref<1x4x8x96xbf16, #tpu.memory_space<vmem>>, vector<1x1x4x96xbf16>
    %4 = vector.shape_cast %3 : vector<1x1x4x96xbf16> to vector<4x96xbf16>
    %c4 = arith.constant 4 : index
    %c0_8 = arith.constant 0 : index
    %5 = vector.load %arg5[%c4, %c0_8] : memref<16x96xbf16, #tpu.memory_space<vmem>>, vector<4x96xbf16>
    tpu.vector_store %arg5[%c4, %c0_8], %4 {strides = array<i32>} : memref<16x96xbf16, #tpu.memory_space<vmem>>, vector<4x96xbf16>,
    %c0_9 = arith.constant 0 : index
    %c2 = arith.constant 2 : index
    %c0_10 = arith.constant 0 : index
    %c0_11 = arith.constant 0 : index
    %6 = vector.load %arg2[%c0_9, %c2, %c0_10, %c0_11] : memref<1x4x8x96xbf16, #tpu.memory_space<vmem>>, vector<1x1x4x96xbf16>
    %7 = vector.shape_cast %6 : vector<1x1x4x96xbf16> to vector<4x96xbf16>
    %c8 = arith.constant 8 : index
    %c0_12 = arith.constant 0 : index
    %8 = vector.load %arg5[%c8, %c0_12] : memref<16x96xbf16, #tpu.memory_space<vmem>>, vector<4x96xbf16>
    tpu.vector_store %arg5[%c8, %c0_12], %7 {strides = array<i32>} : memref<16x96xbf16, #tpu.memory_space<vmem>>, vector<4x96xbf16>,
    %c0_13 = arith.constant 0 : index
    %c3 = arith.constant 3 : index
    %c0_14 = arith.constant 0 : index
    %c0_15 = arith.constant 0 : index
    %9 = vector.load %arg2[%c0_13, %c3, %c0_14, %c0_15] : memref<1x4x8x96xbf16, #tpu.memory_space<vmem>>, vector<1x1x4x96xbf16>
    %10 = vector.shape_cast %9 : vector<1x1x4x96xbf16> to vector<4x96xbf16>
    %c12 = arith.constant 12 : index
    %c0_16 = arith.constant 0 : index
    %11 = vector.load %arg5[%c12, %c0_16] : memref<16x96xbf16, #tpu.memory_space<vmem>>, vector<4x96xbf16>
    tpu.vector_store %arg5[%c12, %c0_16], %10 {strides = array<i32>} : memref<16x96xbf16, #tpu.memory_space<vmem>>, vector<4x96xbf16>,
    %c0_17 = arith.constant 0 : index
    %c0_18 = arith.constant 0 : index
    %12 = vector.load %arg5[%c0_17, %c0_18] : memref<16x96xbf16, #tpu.memory_space<vmem>>, vector<16x96xbf16>
    %13 = vector.extract_strided_slice %12 {offsets = [0, 0], sizes = [16, 16], strides = [1, 1]} : vector<16x96xbf16> to vector<16x16xbf16>
    %14 = vector.extract_strided_slice %12 {offsets = [0, 32], sizes = [16, 16], strides = [1, 1]} : vector<16x96xbf16> to vector<16x16xbf16>
    %15 = vector.extract_strided_slice %12 {offsets = [0, 64], sizes = [16, 16], strides = [1, 1]} : vector<16x96xbf16> to vector<16x16xbf16>
    "tpu.trace_start"() <{level = 10 : i32, message = "nd,md->nm"}> : () -> ()
    %cst = arith.constant dense<0.000000e+00> : vector<16x16xf32>
    %16 = tpu.matmul %13, %14, %cst {dimension_numbers = #tpu.dot_dimension_numbers<[1], [1], [0], [0], [0, 0, 1, 0], [], []>} : vector<16x16xbf16>, vector<16x16xbf16>, vector<16x16xf32> -> vector<16x16xf32>
    "tpu.trace_stop"() : () -> ()
    %c0_19 = arith.constant 0 : index
    %c0_20 = arith.constant 0 : index
    %c0_21 = arith.constant 0 : index
    %c0_22 = arith.constant 0 : index
    %c0_23 = arith.constant 0 : index
    %17 = vector.load %arg3[%c0_19, %c0_20, %c0_21, %c0_22, %c0_23] : memref<1x2x2x16x16xf32, #tpu.memory_space<vmem>>, vector<1x1x1x16x16xf32>
    %18 = vector.shape_cast %17 : vector<1x1x1x16x16xf32> to vector<16x16xf32>
    %19 = arith.addf %16, %18 : vector<16x16xf32>
    %cst_24 = arith.constant dense<0xFF800000> : vector<16xf32>
    %20 = vector.multi_reduction <maximumf>, %19, %cst_24 [1] : vector<16x16xf32> to vector<16xf32>
    %21 = vector.shape_cast %20 : vector<16xf32> to vector<16x1xf32>
    %22 = vector.broadcast %21 : vector<16x1xf32> to vector<16x16xf32>
    %23 = arith.subf %19, %22 : vector<16x16xf32>
    %24 = math.exp %23 : vector<16x16xf32>
    %cst_25 = arith.constant dense<0.000000e+00> : vector<16xf32>
    %25 = vector.multi_reduction <add>, %24, %cst_25 [1] : vector<16x16xf32> to vector<16xf32>
    %26 = vector.shape_cast %25 : vector<16xf32> to vector<16x1xf32>
    %27 = tpu.reciprocal %26 {approx = true} : vector<16x1xf32> -> vector<16x1xf32>
    %28 = vector.broadcast %27 : vector<16x1xf32> to vector<16x16xf32>
    %29 = arith.mulf %24, %28 : vector<16x16xf32>
    %30 = arith.truncf %29 : vector<16x16xf32> to vector<16x16xbf16>
    "tpu.trace_start"() <{level = 10 : i32, message = "nm,md->nd"}> : () -> ()
    %cst_26 = arith.constant dense<0.000000e+00> : vector<16x16xf32>
    %31 = tpu.matmul %30, %15, %cst_26 {dimension_numbers = #tpu.dot_dimension_numbers<[1], [0], [0], [1], [0, 0, 1, 1], [], []>} : vector<16x16xbf16>, vector<16x16xbf16>, vector<16x16xf32> -> vector<16x16xf32>
    "tpu.trace_stop"() : () -> ()
    %c0_27 = arith.constant 0 : index
    %c0_28 = arith.constant 0 : index
    %32 = vector.load %arg6[%c0_27, %c0_28] : memref<16x32xf32, #tpu.memory_space<vmem>>, vector<16x16xf32>
    tpu.vector_store %arg6[%c0_27, %c0_28], %31 {strides = array<i32>} : memref<16x32xf32, #tpu.memory_space<vmem>>, vector<16x16xf32>,
    %33 = vector.extract_strided_slice %12 {offsets = [0, 16], sizes = [16, 16], strides = [1, 1]} : vector<16x96xbf16> to vector<16x16xbf16>
    %34 = vector.extract_strided_slice %12 {offsets = [0, 48], sizes = [16, 16], strides = [1, 1]} : vector<16x96xbf16> to vector<16x16xbf16>
    %35 = vector.extract_strided_slice %12 {offsets = [0, 80], sizes = [16, 16], strides = [1, 1]} : vector<16x96xbf16> to vector<16x16xbf16>
    "tpu.trace_start"() <{level = 10 : i32, message = "nd,md->nm"}> : () -> ()
    %cst_29 = arith.constant dense<0.000000e+00> : vector<16x16xf32>
    %36 = tpu.matmul %33, %34, %cst_29 {dimension_numbers = #tpu.dot_dimension_numbers<[1], [1], [0], [0], [0, 0, 1, 0], [], []>} : vector<16x16xbf16>, vector<16x16xbf16>, vector<16x16xf32> -> vector<16x16xf32>
    "tpu.trace_stop"() : () -> ()
    %c0_30 = arith.constant 0 : index
    %c0_31 = arith.constant 0 : index
    %c1_32 = arith.constant 1 : index
    %c0_33 = arith.constant 0 : index
    %c0_34 = arith.constant 0 : index
    %37 = vector.load %arg3[%c0_30, %c0_31, %c1_32, %c0_33, %c0_34] : memref<1x2x2x16x16xf32, #tpu.memory_space<vmem>>, vector<1x1x1x16x16xf32>
    %38 = vector.shape_cast %37 : vector<1x1x1x16x16xf32> to vector<16x16xf32>
    %39 = arith.addf %36, %38 : vector<16x16xf32>
    %cst_35 = arith.constant dense<0xFF800000> : vector<16xf32>
    %40 = vector.multi_reduction <maximumf>, %39, %cst_35 [1] : vector<16x16xf32> to vector<16xf32>
    %41 = vector.shape_cast %40 : vector<16xf32> to vector<16x1xf32>
    %42 = vector.broadcast %41 : vector<16x1xf32> to vector<16x16xf32>
    %43 = arith.subf %39, %42 : vector<16x16xf32>
    %44 = math.exp %43 : vector<16x16xf32>
    %cst_36 = arith.constant dense<0.000000e+00> : vector<16xf32>
    %45 = vector.multi_reduction <add>, %44, %cst_36 [1] : vector<16x16xf32> to vector<16xf32>
    %46 = vector.shape_cast %45 : vector<16xf32> to vector<16x1xf32>
    %47 = tpu.reciprocal %46 {approx = true} : vector<16x1xf32> -> vector<16x1xf32>
    %48 = vector.broadcast %47 : vector<16x1xf32> to vector<16x16xf32>
    %49 = arith.mulf %44, %48 : vector<16x16xf32>
    %50 = arith.truncf %49 : vector<16x16xf32> to vector<16x16xbf16>
    "tpu.trace_start"() <{level = 10 : i32, message = "nm,md->nd"}> : () -> ()
    %cst_37 = arith.constant dense<0.000000e+00> : vector<16x16xf32>
    %51 = tpu.matmul %50, %35, %cst_37 {dimension_numbers = #tpu.dot_dimension_numbers<[1], [0], [0], [1], [0, 0, 1, 1], [], []>} : vector<16x16xbf16>, vector<16x16xbf16>, vector<16x16xf32> -> vector<16x16xf32>
    "tpu.trace_stop"() : () -> ()
    %c0_38 = arith.constant 0 : index
    %c16 = arith.constant 16 : index
    %52 = vector.load %arg6[%c0_38, %c16] : memref<16x32xf32, #tpu.memory_space<vmem>>, vector<16x16xf32>
    tpu.vector_store %arg6[%c0_38, %c16], %51 {strides = array<i32>} : memref<16x32xf32, #tpu.memory_space<vmem>>, vector<16x16xf32>,
    %c0_39 = arith.constant 0 : index
    %c0_40 = arith.constant 0 : index
    %53 = vector.load %arg6[%c0_39, %c0_40] : memref<16x32xf32, #tpu.memory_space<vmem>>, vector<16x32xf32>
    %54 = vector.extract_strided_slice %53 {offsets = [0, 0], sizes = [4, 32], strides = [1, 1]} : vector<16x32xf32> to vector<4x32xf32>
    %55 = arith.truncf %54 : vector<4x32xf32> to vector<4x32xbf16>
    %c0_41 = arith.constant 0 : index
    %c0_42 = arith.constant 0 : index
    %c0_43 = arith.constant 0 : index
    %c0_44 = arith.constant 0 : index
    %56 = vector.load %arg4[%c0_41, %c0_42, %c0_43, %c0_44] : memref<1x4x8x32xbf16, #tpu.memory_space<vmem>>, vector<1x1x4x32xbf16>
    %57 = vector.shape_cast %56 : vector<1x1x4x32xbf16> to vector<4x32xbf16>
    %58 = vector.shape_cast %55 : vector<4x32xbf16> to vector<1x1x4x32xbf16>
    tpu.vector_store %arg4[%c0_41, %c0_42, %c0_43, %c0_44], %58 {strides = array<i32>} : memref<1x4x8x32xbf16, #tpu.memory_space<vmem>>, vector<1x1x4x32xbf16>,
    %59 = vector.extract_strided_slice %53 {offsets = [4, 0], sizes = [4, 32], strides = [1, 1]} : vector<16x32xf32> to vector<4x32xf32>
    %60 = arith.truncf %59 : vector<4x32xf32> to vector<4x32xbf16>
    %c0_45 = arith.constant 0 : index
    %c1_46 = arith.constant 1 : index
    %c0_47 = arith.constant 0 : index
    %c0_48 = arith.constant 0 : index
    %61 = vector.load %arg4[%c0_45, %c1_46, %c0_47, %c0_48] : memref<1x4x8x32xbf16, #tpu.memory_space<vmem>>, vector<1x1x4x32xbf16>
    %62 = vector.shape_cast %61 : vector<1x1x4x32xbf16> to vector<4x32xbf16>
    %63 = vector.shape_cast %60 : vector<4x32xbf16> to vector<1x1x4x32xbf16>
    tpu.vector_store %arg4[%c0_45, %c1_46, %c0_47, %c0_48], %63 {strides = array<i32>} : memref<1x4x8x32xbf16, #tpu.memory_space<vmem>>, vector<1x1x4x32xbf16>,
    %64 = vector.extract_strided_slice %53 {offsets = [8, 0], sizes = [4, 32], strides = [1, 1]} : vector<16x32xf32> to vector<4x32xf32>
    %65 = arith.truncf %64 : vector<4x32xf32> to vector<4x32xbf16>
    %c0_49 = arith.constant 0 : index
    %c2_50 = arith.constant 2 : index
    %c0_51 = arith.constant 0 : index
    %c0_52 = arith.constant 0 : index
    %66 = vector.load %arg4[%c0_49, %c2_50, %c0_51, %c0_52] : memref<1x4x8x32xbf16, #tpu.memory_space<vmem>>, vector<1x1x4x32xbf16>
    %67 = vector.shape_cast %66 : vector<1x1x4x32xbf16> to vector<4x32xbf16>
    %68 = vector.shape_cast %65 : vector<4x32xbf16> to vector<1x1x4x32xbf16>
    tpu.vector_store %arg4[%c0_49, %c2_50, %c0_51, %c0_52], %68 {strides = array<i32>} : memref<1x4x8x32xbf16, #tpu.memory_space<vmem>>, vector<1x1x4x32xbf16>,
    %69 = vector.extract_strided_slice %53 {offsets = [12, 0], sizes = [4, 32], strides = [1, 1]} : vector<16x32xf32> to vector<4x32xf32>
    %70 = arith.truncf %69 : vector<4x32xf32> to vector<4x32xbf16>
    %c0_53 = arith.constant 0 : index
    %c3_54 = arith.constant 3 : index
    %c0_55 = arith.constant 0 : index
    %c0_56 = arith.constant 0 : index
    %71 = vector.load %arg4[%c0_53, %c3_54, %c0_55, %c0_56] : memref<1x4x8x32xbf16, #tpu.memory_space<vmem>>, vector<1x1x4x32xbf16>
    %72 = vector.shape_cast %71 : vector<1x1x4x32xbf16> to vector<4x32xbf16>
    %73 = vector.shape_cast %70 : vector<4x32xbf16> to vector<1x1x4x32xbf16>
    tpu.vector_store %arg4[%c0_53, %c3_54, %c0_55, %c0_56], %73 {strides = array<i32>} : memref<1x4x8x32xbf16, #tpu.memory_space<vmem>>, vector<1x1x4x32xbf16>,
    %c0_57 = arith.constant 0 : index
    %c0_58 = arith.constant 0 : index
    %c4_59 = arith.constant 4 : index
    %c0_60 = arith.constant 0 : index
    %74 = vector.load %arg2[%c0_57, %c0_58, %c4_59, %c0_60] : memref<1x4x8x96xbf16, #tpu.memory_space<vmem>>, vector<1x1x4x96xbf16>
    %75 = vector.shape_cast %74 : vector<1x1x4x96xbf16> to vector<4x96xbf16>
    %c0_61 = arith.constant 0 : index
    %c0_62 = arith.constant 0 : index
    %76 = vector.load %arg5[%c0_61, %c0_62] : memref<16x96xbf16, #tpu.memory_space<vmem>>, vector<4x96xbf16>
    tpu.vector_store %arg5[%c0_61, %c0_62], %75 {strides = array<i32>} : memref<16x96xbf16, #tpu.memory_space<vmem>>, vector<4x96xbf16>,
    %c0_63 = arith.constant 0 : index
    %c1_64 = arith.constant 1 : index
    %c4_65 = arith.constant 4 : index
    %c0_66 = arith.constant 0 : index
    %77 = vector.load %arg2[%c0_63, %c1_64, %c4_65, %c0_66] : memref<1x4x8x96xbf16, #tpu.memory_space<vmem>>, vector<1x1x4x96xbf16>
    %78 = vector.shape_cast %77 : vector<1x1x4x96xbf16> to vector<4x96xbf16>
    %c4_67 = arith.constant 4 : index
    %c0_68 = arith.constant 0 : index
    %79 = vector.load %arg5[%c4_67, %c0_68] : memref<16x96xbf16, #tpu.memory_space<vmem>>, vector<4x96xbf16>
    tpu.vector_store %arg5[%c4_67, %c0_68], %78 {strides = array<i32>} : memref<16x96xbf16, #tpu.memory_space<vmem>>, vector<4x96xbf16>,
    %c0_69 = arith.constant 0 : index
    %c2_70 = arith.constant 2 : index
    %c4_71 = arith.constant 4 : index
    %c0_72 = arith.constant 0 : index
    %80 = vector.load %arg2[%c0_69, %c2_70, %c4_71, %c0_72] : memref<1x4x8x96xbf16, #tpu.memory_space<vmem>>, vector<1x1x4x96xbf16>
    %81 = vector.shape_cast %80 : vector<1x1x4x96xbf16> to vector<4x96xbf16>
    %c8_73 = arith.constant 8 : index
    %c0_74 = arith.constant 0 : index
    %82 = vector.load %arg5[%c8_73, %c0_74] : memref<16x96xbf16, #tpu.memory_space<vmem>>, vector<4x96xbf16>
    tpu.vector_store %arg5[%c8_73, %c0_74], %81 {strides = array<i32>} : memref<16x96xbf16, #tpu.memory_space<vmem>>, vector<4x96xbf16>,
    %c0_75 = arith.constant 0 : index
    %c3_76 = arith.constant 3 : index
    %c4_77 = arith.constant 4 : index
    %c0_78 = arith.constant 0 : index
    %83 = vector.load %arg2[%c0_75, %c3_76, %c4_77, %c0_78] : memref<1x4x8x96xbf16, #tpu.memory_space<vmem>>, vector<1x1x4x96xbf16>
    %84 = vector.shape_cast %83 : vector<1x1x4x96xbf16> to vector<4x96xbf16>
    %c12_79 = arith.constant 12 : index
    %c0_80 = arith.constant 0 : index
    %85 = vector.load %arg5[%c12_79, %c0_80] : memref<16x96xbf16, #tpu.memory_space<vmem>>, vector<4x96xbf16>
    tpu.vector_store %arg5[%c12_79, %c0_80], %84 {strides = array<i32>} : memref<16x96xbf16, #tpu.memory_space<vmem>>, vector<4x96xbf16>,
    %c0_81 = arith.constant 0 : index
    %c0_82 = arith.constant 0 : index
    %86 = vector.load %arg5[%c0_81, %c0_82] : memref<16x96xbf16, #tpu.memory_space<vmem>>, vector<16x96xbf16>
    %87 = vector.extract_strided_slice %86 {offsets = [0, 0], sizes = [16, 16], strides = [1, 1]} : vector<16x96xbf16> to vector<16x16xbf16>
    %88 = vector.extract_strided_slice %86 {offsets = [0, 32], sizes = [16, 16], strides = [1, 1]} : vector<16x96xbf16> to vector<16x16xbf16>
    %89 = vector.extract_strided_slice %86 {offsets = [0, 64], sizes = [16, 16], strides = [1, 1]} : vector<16x96xbf16> to vector<16x16xbf16>
    "tpu.trace_start"() <{level = 10 : i32, message = "nd,md->nm"}> : () -> ()
    %cst_83 = arith.constant dense<0.000000e+00> : vector<16x16xf32>
    %90 = tpu.matmul %87, %88, %cst_83 {dimension_numbers = #tpu.dot_dimension_numbers<[1], [1], [0], [0], [0, 0, 1, 0], [], []>} : vector<16x16xbf16>, vector<16x16xbf16>, vector<16x16xf32> -> vector<16x16xf32>
    "tpu.trace_stop"() : () -> ()
    %c0_84 = arith.constant 0 : index
    %c1_85 = arith.constant 1 : index
    %c0_86 = arith.constant 0 : index
    %c0_87 = arith.constant 0 : index
    %c0_88 = arith.constant 0 : index
    %91 = vector.load %arg3[%c0_84, %c1_85, %c0_86, %c0_87, %c0_88] : memref<1x2x2x16x16xf32, #tpu.memory_space<vmem>>, vector<1x1x1x16x16xf32>
    %92 = vector.shape_cast %91 : vector<1x1x1x16x16xf32> to vector<16x16xf32>
    %93 = arith.addf %90, %92 : vector<16x16xf32>
    %cst_89 = arith.constant dense<0xFF800000> : vector<16xf32>
    %94 = vector.multi_reduction <maximumf>, %93, %cst_89 [1] : vector<16x16xf32> to vector<16xf32>
    %95 = vector.shape_cast %94 : vector<16xf32> to vector<16x1xf32>
    %96 = vector.broadcast %95 : vector<16x1xf32> to vector<16x16xf32>
    %97 = arith.subf %93, %96 : vector<16x16xf32>
    %98 = math.exp %97 : vector<16x16xf32>
    %cst_90 = arith.constant dense<0.000000e+00> : vector<16xf32>
    %99 = vector.multi_reduction <add>, %98, %cst_90 [1] : vector<16x16xf32> to vector<16xf32>
    %100 = vector.shape_cast %99 : vector<16xf32> to vector<16x1xf32>
    %101 = tpu.reciprocal %100 {approx = true} : vector<16x1xf32> -> vector<16x1xf32>
    %102 = vector.broadcast %101 : vector<16x1xf32> to vector<16x16xf32>
    %103 = arith.mulf %98, %102 : vector<16x16xf32>
    %104 = arith.truncf %103 : vector<16x16xf32> to vector<16x16xbf16>
    "tpu.trace_start"() <{level = 10 : i32, message = "nm,md->nd"}> : () -> ()
    %cst_91 = arith.constant dense<0.000000e+00> : vector<16x16xf32>
    %105 = tpu.matmul %104, %89, %cst_91 {dimension_numbers = #tpu.dot_dimension_numbers<[1], [0], [0], [1], [0, 0, 1, 1], [], []>} : vector<16x16xbf16>, vector<16x16xbf16>, vector<16x16xf32> -> vector<16x16xf32>
    "tpu.trace_stop"() : () -> ()
    %c0_92 = arith.constant 0 : index
    %c0_93 = arith.constant 0 : index
    %106 = vector.load %arg6[%c0_92, %c0_93] : memref<16x32xf32, #tpu.memory_space<vmem>>, vector<16x16xf32>
    tpu.vector_store %arg6[%c0_92, %c0_93], %105 {strides = array<i32>} : memref<16x32xf32, #tpu.memory_space<vmem>>, vector<16x16xf32>,
    %107 = vector.extract_strided_slice %86 {offsets = [0, 16], sizes = [16, 16], strides = [1, 1]} : vector<16x96xbf16> to vector<16x16xbf16>
    %108 = vector.extract_strided_slice %86 {offsets = [0, 48], sizes = [16, 16], strides = [1, 1]} : vector<16x96xbf16> to vector<16x16xbf16>
    %109 = vector.extract_strided_slice %86 {offsets = [0, 80], sizes = [16, 16], strides = [1, 1]} : vector<16x96xbf16> to vector<16x16xbf16>
    "tpu.trace_start"() <{level = 10 : i32, message = "nd,md->nm"}> : () -> ()
    %cst_94 = arith.constant dense<0.000000e+00> : vector<16x16xf32>
    %110 = tpu.matmul %107, %108, %cst_94 {dimension_numbers = #tpu.dot_dimension_numbers<[1], [1], [0], [0], [0, 0, 1, 0], [], []>} : vector<16x16xbf16>, vector<16x16xbf16>, vector<16x16xf32> -> vector<16x16xf32>
    "tpu.trace_stop"() : () -> ()
    %c0_95 = arith.constant 0 : index
    %c1_96 = arith.constant 1 : index
    %c1_97 = arith.constant 1 : index
    %c0_98 = arith.constant 0 : index
    %c0_99 = arith.constant 0 : index
    %111 = vector.load %arg3[%c0_95, %c1_96, %c1_97, %c0_98, %c0_99] : memref<1x2x2x16x16xf32, #tpu.memory_space<vmem>>, vector<1x1x1x16x16xf32>
    %112 = vector.shape_cast %111 : vector<1x1x1x16x16xf32> to vector<16x16xf32>
    %113 = arith.addf %110, %112 : vector<16x16xf32>
    %cst_100 = arith.constant dense<0xFF800000> : vector<16xf32>
    %114 = vector.multi_reduction <maximumf>, %113, %cst_100 [1] : vector<16x16xf32> to vector<16xf32>
    %115 = vector.shape_cast %114 : vector<16xf32> to vector<16x1xf32>
    %116 = vector.broadcast %115 : vector<16x1xf32> to vector<16x16xf32>
    %117 = arith.subf %113, %116 : vector<16x16xf32>
    %118 = math.exp %117 : vector<16x16xf32>
    %cst_101 = arith.constant dense<0.000000e+00> : vector<16xf32>
    %119 = vector.multi_reduction <add>, %118, %cst_101 [1] : vector<16x16xf32> to vector<16xf32>
    %120 = vector.shape_cast %119 : vector<16xf32> to vector<16x1xf32>
    %121 = tpu.reciprocal %120 {approx = true} : vector<16x1xf32> -> vector<16x1xf32>
    %122 = vector.broadcast %121 : vector<16x1xf32> to vector<16x16xf32>
    %123 = arith.mulf %118, %122 : vector<16x16xf32>
    %124 = arith.truncf %123 : vector<16x16xf32> to vector<16x16xbf16>
    "tpu.trace_start"() <{level = 10 : i32, message = "nm,md->nd"}> : () -> ()
    %cst_102 = arith.constant dense<0.000000e+00> : vector<16x16xf32>
    %125 = tpu.matmul %124, %109, %cst_102 {dimension_numbers = #tpu.dot_dimension_numbers<[1], [0], [0], [1], [0, 0, 1, 1], [], []>} : vector<16x16xbf16>, vector<16x16xbf16>, vector<16x16xf32> -> vector<16x16xf32>
    "tpu.trace_stop"() : () -> ()
    %c0_103 = arith.constant 0 : index
    %c16_104 = arith.constant 16 : index
    %126 = vector.load %arg6[%c0_103, %c16_104] : memref<16x32xf32, #tpu.memory_space<vmem>>, vector<16x16xf32>
    tpu.vector_store %arg6[%c0_103, %c16_104], %125 {strides = array<i32>} : memref<16x32xf32, #tpu.memory_space<vmem>>, vector<16x16xf32>,
    %c0_105 = arith.constant 0 : index
    %c0_106 = arith.constant 0 : index
    %127 = vector.load %arg6[%c0_105, %c0_106] : memref<16x32xf32, #tpu.memory_space<vmem>>, vector<16x32xf32>
    %128 = vector.extract_strided_slice %127 {offsets = [0, 0], sizes = [4, 32], strides = [1, 1]} : vector<16x32xf32> to vector<4x32xf32>
    %129 = arith.truncf %128 : vector<4x32xf32> to vector<4x32xbf16>
    %c0_107 = arith.constant 0 : index
    %c0_108 = arith.constant 0 : index
    %c4_109 = arith.constant 4 : index
    %c0_110 = arith.constant 0 : index
    %130 = vector.load %arg4[%c0_107, %c0_108, %c4_109, %c0_110] : memref<1x4x8x32xbf16, #tpu.memory_space<vmem>>, vector<1x1x4x32xbf16>
    %131 = vector.shape_cast %130 : vector<1x1x4x32xbf16> to vector<4x32xbf16>
    %132 = vector.shape_cast %129 : vector<4x32xbf16> to vector<1x1x4x32xbf16>
    tpu.vector_store %arg4[%c0_107, %c0_108, %c4_109, %c0_110], %132 {strides = array<i32>} : memref<1x4x8x32xbf16, #tpu.memory_space<vmem>>, vector<1x1x4x32xbf16>,
    %133 = vector.extract_strided_slice %127 {offsets = [4, 0], sizes = [4, 32], strides = [1, 1]} : vector<16x32xf32> to vector<4x32xf32>
    %134 = arith.truncf %133 : vector<4x32xf32> to vector<4x32xbf16>
    %c0_111 = arith.constant 0 : index
    %c1_112 = arith.constant 1 : index
    %c4_113 = arith.constant 4 : index
    %c0_114 = arith.constant 0 : index
    %135 = vector.load %arg4[%c0_111, %c1_112, %c4_113, %c0_114] : memref<1x4x8x32xbf16, #tpu.memory_space<vmem>>, vector<1x1x4x32xbf16>
    %136 = vector.shape_cast %135 : vector<1x1x4x32xbf16> to vector<4x32xbf16>
    %137 = vector.shape_cast %134 : vector<4x32xbf16> to vector<1x1x4x32xbf16>
    tpu.vector_store %arg4[%c0_111, %c1_112, %c4_113, %c0_114], %137 {strides = array<i32>} : memref<1x4x8x32xbf16, #tpu.memory_space<vmem>>, vector<1x1x4x32xbf16>,
    %138 = vector.extract_strided_slice %127 {offsets = [8, 0], sizes = [4, 32], strides = [1, 1]} : vector<16x32xf32> to vector<4x32xf32>
    %139 = arith.truncf %138 : vector<4x32xf32> to vector<4x32xbf16>
    %c0_115 = arith.constant 0 : index
    %c2_116 = arith.constant 2 : index
    %c4_117 = arith.constant 4 : index
    %c0_118 = arith.constant 0 : index
    %140 = vector.load %arg4[%c0_115, %c2_116, %c4_117, %c0_118] : memref<1x4x8x32xbf16, #tpu.memory_space<vmem>>, vector<1x1x4x32xbf16>
    %141 = vector.shape_cast %140 : vector<1x1x4x32xbf16> to vector<4x32xbf16>
    %142 = vector.shape_cast %139 : vector<4x32xbf16> to vector<1x1x4x32xbf16>
    tpu.vector_store %arg4[%c0_115, %c2_116, %c4_117, %c0_118], %142 {strides = array<i32>} : memref<1x4x8x32xbf16, #tpu.memory_space<vmem>>, vector<1x1x4x32xbf16>,
    %143 = vector.extract_strided_slice %127 {offsets = [12, 0], sizes = [4, 32], strides = [1, 1]} : vector<16x32xf32> to vector<4x32xf32>
    %144 = arith.truncf %143 : vector<4x32xf32> to vector<4x32xbf16>
    %c0_119 = arith.constant 0 : index
    %c3_120 = arith.constant 3 : index
    %c4_121 = arith.constant 4 : index
    %c0_122 = arith.constant 0 : index
    %145 = vector.load %arg4[%c0_119, %c3_120, %c4_121, %c0_122] : memref<1x4x8x32xbf16, #tpu.memory_space<vmem>>, vector<1x1x4x32xbf16>
    %146 = vector.shape_cast %145 : vector<1x1x4x32xbf16> to vector<4x32xbf16>
    %147 = vector.shape_cast %144 : vector<4x32xbf16> to vector<1x1x4x32xbf16>
    tpu.vector_store %arg4[%c0_119, %c3_120, %c4_121, %c0_122], %147 {strides = array<i32>} : memref<1x4x8x32xbf16, #tpu.memory_space<vmem>>, vector<1x1x4x32xbf16>,
    return
  }
  func.func @transform_0(%arg0: i32, %arg1: i32) -> (i32, i32, i32, i32) {
    %c0_i32 = arith.constant 0 : i32
    %c0_i32_0 = arith.constant 0 : i32
    %c0_i32_1 = arith.constant 0 : i32
    return %arg0, %arg1, %c0_i32, %c0_i32_0 : i32, i32, i32, i32
  }
  func.func @transform_1(%arg0: i32, %arg1: i32) -> (i32, i32, i32, i32, i32) {
    %c0_i32 = arith.constant 0 : i32
    %c0_i32_0 = arith.constant 0 : i32
    %c0_i32_1 = arith.constant 0 : i32
    %c0_i32_2 = arith.constant 0 : i32
    %c0_i32_3 = arith.constant 0 : i32
    return %arg1, %c0_i32, %c0_i32_0, %c0_i32_1, %c0_i32_2 : i32, i32, i32, i32, i32
  }
  func.func @transform_2(%arg0: i32, %arg1: i32) -> (i32, i32, i32, i32) {
    %c0_i32 = arith.constant 0 : i32
    %c0_i32_0 = arith.constant 0 : i32
    %c0_i32_1 = arith.constant 0 : i32
    return %arg0, %arg1, %c0_i32, %c0_i32_0 : i32, i32, i32, i32
  }
}

module attributes {stable_mosaic.version = 11 : i64} {
  func.func @expand_norm_kernel(%arg0: i32, %arg1: memref<128x32xf32, #tpu.memory_space<vmem>>, %arg2: memref<32x64xbf16, #tpu.memory_space<vmem>>, %arg3: memref<64x64xf32, #tpu.memory_space<vmem>>, %arg4: memref<1x64xf32, #tpu.memory_space<vmem>>, %arg5: memref<1x64xf32, #tpu.memory_space<vmem>>, %arg6: memref<128x64xf32, #tpu.memory_space<vmem>>) attributes {dimension_semantics = [#tpu.dimension_semantics<parallel>], iteration_bounds = array<i64: 1>, scalar_prefetch = 0 : i64, scratch_operands = 0 : i64, tpu.core_type = #tpu.core_type<tc>, window_params = [{transform_indices = @transform_0, window_bounds = array<i64: 128, 32>}, {pipeline_mode = #tpu.pipeline_mode<synchronous>, transform_indices = @transform_1, window_bounds = array<i64: 32, 64>}, {pipeline_mode = #tpu.pipeline_mode<synchronous>, transform_indices = @transform_2, window_bounds = array<i64: 64, 64>}, {pipeline_mode = #tpu.pipeline_mode<synchronous>, transform_indices = @transform_3, window_bounds = array<i64: 1, 64>}, {pipeline_mode = #tpu.pipeline_mode<synchronous>, transform_indices = @transform_4, window_bounds = array<i64: 1, 64>}, {transform_indices = @transform_5, window_bounds = array<i64: 128, 64>}]} {
    %c0 = arith.constant 0 : index
    %c0_0 = arith.constant 0 : index
    %0 = vector.load %arg1[%c0, %c0_0] : memref<128x32xf32, #tpu.memory_space<vmem>>, vector<128x32xf32>
    %1 = arith.truncf %0 : vector<128x32xf32> to vector<128x32xbf16>
    %c0_1 = arith.constant 0 : index
    %c0_2 = arith.constant 0 : index
    %2 = vector.load %arg2[%c0_1, %c0_2] : memref<32x64xbf16, #tpu.memory_space<vmem>>, vector<32x64xbf16>
    %cst = arith.constant dense<0.000000e+00> : vector<128x64xf32>
    %3 = tpu.matmul %1, %2, %cst {dimension_numbers = #tpu.dot_dimension_numbers<[1], [0], [0], [1], [0, 0, 1, 1], [], []>} : vector<128x32xbf16>, vector<32x64xbf16>, vector<128x64xf32> -> vector<128x64xf32>
    %c0_3 = arith.constant 0 : index
    %c0_4 = arith.constant 0 : index
    %4 = vector.load %arg3[%c0_3, %c0_4] : memref<64x64xf32, #tpu.memory_space<vmem>>, vector<64x64xf32>
    %cst_5 = arith.constant dense<0.000000e+00> : vector<128x64xf32>
    %5 = tpu.matmul %3, %4, %cst_5 {dimension_numbers = #tpu.dot_dimension_numbers<[1], [0], [0], [1], [0, 0, 1, 1], [], []>} : vector<128x64xf32>, vector<64x64xf32>, vector<128x64xf32> -> vector<128x64xf32>
    %6 = arith.subf %3, %5 : vector<128x64xf32>
    %7 = arith.mulf %6, %6 : vector<128x64xf32>
    %c0_6 = arith.constant 0 : index
    %c0_7 = arith.constant 0 : index
    %8 = vector.load %arg3[%c0_6, %c0_7] : memref<64x64xf32, #tpu.memory_space<vmem>>, vector<64x64xf32>
    %cst_8 = arith.constant dense<0.000000e+00> : vector<128x64xf32>
    %9 = tpu.matmul %7, %8, %cst_8 {dimension_numbers = #tpu.dot_dimension_numbers<[1], [0], [0], [1], [0, 0, 1, 1], [], []>} : vector<128x64xf32>, vector<64x64xf32>, vector<128x64xf32> -> vector<128x64xf32>
    %10 = arith.subf %3, %5 : vector<128x64xf32>
    %cst_9 = arith.constant 9.99999974E-6 : f32
    %11 = vector.broadcast %cst_9 : f32 to vector<128x64xf32>
    %12 = arith.addf %9, %11 : vector<128x64xf32>
    %13 = math.rsqrt %12 : vector<128x64xf32>
    %14 = arith.mulf %10, %13 : vector<128x64xf32>
    %c0_10 = arith.constant 0 : index
    %c0_11 = arith.constant 0 : index
    %15 = vector.load %arg4[%c0_10, %c0_11] : memref<1x64xf32, #tpu.memory_space<vmem>>, vector<1x64xf32>
    %16 = vector.shape_cast %15 : vector<1x64xf32> to vector<64xf32>
    %17 = vector.shape_cast %16 : vector<64xf32> to vector<1x64xf32>
    %18 = vector.broadcast %17 : vector<1x64xf32> to vector<128x64xf32>
    %19 = arith.mulf %14, %18 : vector<128x64xf32>
    %c0_12 = arith.constant 0 : index
    %c0_13 = arith.constant 0 : index
    %20 = vector.load %arg5[%c0_12, %c0_13] : memref<1x64xf32, #tpu.memory_space<vmem>>, vector<1x64xf32>
    %21 = vector.shape_cast %20 : vector<1x64xf32> to vector<64xf32>
    %22 = vector.shape_cast %21 : vector<64xf32> to vector<1x64xf32>
    %23 = vector.broadcast %22 : vector<1x64xf32> to vector<128x64xf32>
    %24 = arith.addf %19, %23 : vector<128x64xf32>
    %c0_14 = arith.constant 0 : index
    %c0_15 = arith.constant 0 : index
    %25 = vector.load %arg6[%c0_14, %c0_15] : memref<128x64xf32, #tpu.memory_space<vmem>>, vector<128x64xf32>
    tpu.vector_store %arg6[%c0_14, %c0_15], %24 {strides = array<i32>} : memref<128x64xf32, #tpu.memory_space<vmem>>, vector<128x64xf32>,
    return
  }
  func.func @transform_0(%arg0: i32) -> (i32, i32) {
    %c0_i32 = arith.constant 0 : i32
    %c0_i32_0 = arith.constant 0 : i32
    return %arg0, %c0_i32 : i32, i32
  }
  func.func @transform_1(%arg0: i32) -> (i32, i32) {
    %c0_i32 = arith.constant 0 : i32
    %c0_i32_0 = arith.constant 0 : i32
    %c0_i32_1 = arith.constant 0 : i32
    return %c0_i32, %c0_i32_0 : i32, i32
  }
  func.func @transform_2(%arg0: i32) -> (i32, i32) {
    %c0_i32 = arith.constant 0 : i32
    %c0_i32_0 = arith.constant 0 : i32
    %c0_i32_1 = arith.constant 0 : i32
    return %c0_i32, %c0_i32_0 : i32, i32
  }
  func.func @transform_3(%arg0: i32) -> (i32, i32) {
    %c0_i32 = arith.constant 0 : i32
    %c0_i32_0 = arith.constant 0 : i32
    %c0_i32_1 = arith.constant 0 : i32
    return %c0_i32, %c0_i32_0 : i32, i32
  }
  func.func @transform_4(%arg0: i32) -> (i32, i32) {
    %c0_i32 = arith.constant 0 : i32
    %c0_i32_0 = arith.constant 0 : i32
    %c0_i32_1 = arith.constant 0 : i32
    return %c0_i32, %c0_i32_0 : i32, i32
  }
  func.func @transform_5(%arg0: i32) -> (i32, i32) {
    %c0_i32 = arith.constant 0 : i32
    %c0_i32_0 = arith.constant 0 : i32
    return %arg0, %c0_i32 : i32, i32
  }
}

</mosaic_0001>

<bundles_post_ra>
// kernel: basic_layer_up_forward.8
= control target key start
LH: loop header
LB: loop body
LE: loop exit
PB: predicated region body
PF: predicated region fallthrough
CT: control target
= control target key end

     0   :  { %s847_s9 = smov 0   ;;  %s849_s10 = smov 0   ;;  %s1005_s0 = inlined_call_operand.vmem [shape: bf16[2,8,8,96], index: 0, kind: input, shape index: {}]   ;;  %s1006_s1 = inlined_call_operand.vmem [shape: f32[1,1,2,16,16], index: 1, kind: input, shape index: {}]   ;;  %s1007_s2 = inlined_call_operand.vmem [shape: bf16[2,8,8,32], index: 2, kind: output, shape index: {}]  }
   0x1   :  { %s851_s11 = smov 0   ;;  %s853_s12 = smov 0  }
   0x2   :  { %s855_s13 = smov 0  }
   0x3 LB: > { %s21_s14 = sadd.s32 1, %s816_s11  ;;  %s24_s15 = sadd.s32 1, %s820_s12  ;;  %s824_s13 = sphi %s855_s13, %s12_s13   ;;  %s820_s12 = sphi %s853_s12, %s1011_s12   ;;  %s816_s11 = sphi %s851_s11, %s1010_s11   ;;  %s812_s10 = sphi %s849_s10, %s1009_s10   ;;  %s808_s9 = sphi %s847_s9, %s1008_s9  }
   0x4   : > { %p22_p0 = scmp.ge.s32.totalorder %s21_s14, 2  ;;  %p661_p1 = scmp.ge.s32.totalorder %s824_s13, 1 }
   0x5   : > { %p133_p2 = scmp.lt.s32.totalorder %s824_s13, 5 }
   0x6   : > { %s1013_s14 = smov (%p22_p0, %s21_s14), 0  ;;  %s1015_s15 = smov (!%p22_p0, %s24_s15), %s820_s12 }
   0x7   : > { %p134_p3 = pnand %p661_p1, %p133_p2  ;;  %p26_p4 = scmp.ge.s32.totalorder %s1015_s15, 2 }
   0x8   : > { %s662_s16 = sshll.u32 (!%p134_p3), %s808_s9, 2  ;;  %p164_p5 = scmp.lt.s32.totalorder (!%p134_p3), %s812_s10, 1 }
   0x9   : > { %s1017_s15 = smov (%p26_p4, %s1015_s15), 0  ;;  %137 = sbr.rel (%p134_p3) target bundleno = 1132 (0x46c), region = 28 }
   0xa   : > { %p166_p6 = scmp.lt.s32.totalorder (!%p134_p3), %s662_s16, 7  ;;  %s826_s23 = smov (!%p134_p3), 96  }
   0xb   : > { %s827_s24 = smov (!%p134_p3), 112   ;;  %s828_s25 = smov (!%p134_p3), 80  }
   0xc   : > { %s829_s30 = smov (!%p134_p3), 64   ;;  %s830_s7 = smov (!%p134_p3), 48  }
   0xd   : > { %s831_s8 = smov (!%p134_p3), 16  }
   0xe   : > { %s1019_s10 = smov (!%p164_p5, %s812_s10), 1  ;;  %s1021_s16 = smov (!%p166_p6, %s662_s16), 7  ;;  %vm185_vm0 = vcmask 779264   ;;  %vm192_vm1 = vcmask 781314   ;;  %vm214_vm2 = vcmask 130048   ;;  %v908_v16 = vld [vmem:[%s1006_s1] sm:$0xff] }
   0xf   : > { %s663_s17 = sshll.u32 %s1019_s10, 3  ;;  %v915_v21 = vld [vmem:[%s1006_s1 + $0x8] sm:$0xff]  ;;  %v698_v41 = vld [vmem:[%s1006_s1 + $0x18] sm:$0xff]  ;;  %v697_v55 = vld [vmem:[%s1006_s1 + $0x10] sm:$0xff]  ;;  %vm358_vm3 = vcmask 261248   ;;  %vm364_vm4 = vcmask 254976  }
  0x10   : > { %s877_s18 = sadd.s32 %s663_s17, %s1021_s16  ;;  %vm558_vm5 = vcmask 257026  }
  0x11   : > { %s664_s19 = sshll.u32 %s877_s18, 2 }
  0x12   : > { %s171_s22 = scalar_lea.vmem %s1005_s0, %s664_s19  ;;  %s975_s16 = scalar_lea.vmem %s1007_s2, %s664_s19 }
  0x13   : > { %v184_v0 = vld [vmem:[%s171_s22] sm:$0x3]  ;;  %v668_v1 = vld [vmem:[%s171_s22 + $0x4] sm:$0x3]  ;;  %v669_v2 = vld [vmem:[%s171_s22 + $0x8] sm:$0x3] }
  0x14   : > { %186 = vst.msk [vmem:[#allocation2] sm:$0x3] %vm185_vm0, %v184_v0  ;;  %v190_v3 = vrot.slane %v668_v1, 6  ;;  %v670_v4 = vld [vmem:[%s171_s22 + $0xc] sm:$0x3] }
  0x15   : > { %196 = vst.msk [vmem:[#allocation2 + $0x4] sm:$0x3] %vm185_vm0, %v669_v2  ;;  %v200_v5 = vrot.slane %v670_v4, 6  ;;  %v381_v6 = vld [vmem:[%s171_s22] sm:$0xc] }
  0x16   : > { %193 = vst.msk [vmem:[#allocation2] sm:$0xc] %vm192_vm1, %v190_v3  ;;  %v686_v7 = vrot.slane %v381_v6, 10  ;;  %v687_v8 = vld [vmem:[%s171_s22 + $0x4] sm:$0xc] }
  0x17   : > { %202 = vst.msk [vmem:[#allocation2 + $0x4] sm:$0xc] %vm192_vm1, %v200_v5  ;;  %v688_v9 = vld [vmem:[%s171_s22 + $0x8] sm:$0xc]  ;;  %v690_v11 = vld [vmem:[%s171_s22 + $0xc] sm:$0xc] }
  0x18   : > { %386 = vst.msk [vmem:[#allocation2] sm:$0x3] %vm185_vm0, %v686_v7  ;;  %v689_v10 = vrot.slane %v688_v9, 10 }
  0x19   : > { %388 = vst.msk [vmem:[#allocation2] sm:$0xc] %vm192_vm1, %v687_v8 }
  0x20   : > { %v891_v12 = vld [vmem:[#allocation2] sm:$0xff] }
  0x21   : > { %394 = vst.msk [vmem:[#allocation2 + $0x4] sm:$0x3] %vm185_vm0, %v689_v10  ;;  %212 = vrot.lane.b32.xlu0 %v891_v12, %s826_s23  ;;  %283 = vrot.lane.b32.xlu2 %v891_v12, %s827_s24 }
  0x22   : > { %396 = vst.msk [vmem:[#allocation2 + $0x4] sm:$0xc] %vm192_vm1, %v690_v11 }
  0x29   : > { %v898_v13 = vld [vmem:[#allocation2] sm:$0xff] }
  0x2a   : > { %477 = vrot.lane.b32.xlu2 %v898_v13, %s828_s25 }
  0x32   : > { %475 = vrot.lane.b32.xlu2 %v898_v13, %s827_s24 }
  0x7b   : > { %v284_v20 = vpop.permute.xlu2 %283 }
  0x84   : > { %v478_v25 = vpop.permute.xlu2 %477 }
  0x85   : > { %v483_v26 = vsel %vm214_vm2, %v478_v25, 0 }
  0x8c   : > { %v476_v27 = vpop.permute.xlu2 %475 }
  0x93   : > { %v213_v14 = vpop.permute.xlu0 %212 }
  0x94   : > { %v219_v15 = vsel %vm214_vm2, %v213_v14, 0 }
  0x95   : > { %228 = vmatpush.bf16.xpose.msra.mxu0 %v219_v15 }
  0x9c   : > { %675 = vmatmul.msk.bf16.vlgmr.msra.gmra.mxu0 %vm214_vm2, %v891_v12 }
  0x9d   : > { %492 = vmatpush.bf16.xpose.msrb.mxu0 %v483_v26 }
  0xac   : > { %699 = vmatmul.msk.bf16.vlgmr.msrb.gmra.mxu0 %vm214_vm2, %v476_v27 }
 0x119   : > { %v230_v17 = vpop.f32.mrf.mxu0 }
 0x11a   : > { %v231_v18 = vadd.f32 %v230_v17, %v908_v16 }
 0x11c   : > { %v235_v19 = vsel %vm214_vm2, %v231_v18, -inf }
 0x11d   : > { %236 = vmax.xlane.f32.xlu0 %v235_v19 }
 0x121   : > { %v232_v22 = vpop.f32.mrf.mxu0 }
 0x122   : > { %v233_v23 = vadd.f32 %v232_v22, %v915_v21 }
 0x124   : > { %v238_v24 = vsel %vm214_vm2, %v233_v23, -inf }
 0x125   : > { %239 = vmax.xlane.f32.xlu1 %v238_v24 }
 0x129   : > { %v494_v40 = vpop.f32.mrf.mxu0 }
 0x12a   : > { %v495_v62 = vadd.f32 %v697_v55, %v494_v40 }
 0x12c   : > { %v499_v63 = vsel %vm214_vm2, %v495_v62, -inf }
 0x131   : > { %258 = vrot.lane.b32.xlu0 %v891_v12, %s829_s30  ;;  %v496_v42 = vpop.f32.mrf.mxu0 }
 0x132   : > { %v497_v43 = vadd.f32 %v698_v41, %v496_v42 }
 0x134   : > { %v502_v44 = vsel %vm214_vm2, %v497_v43, -inf }
 0x13e   : > { %285 = vrot.lane.b32.xlu1 %v891_v12, %s828_s25 }
 0x190   : > { %v237_v28 = vpop.xlane.xlu0 %236 }
 0x191   : > { %v241_v29 = vsub.f32 %v231_v18, %v237_v28 }
 0x193   : > { %v243_v30 = vmul.f32 1.442695, %v241_v29 }
 0x195   : > { %754 = vpow2.f32 %v243_v30 }
 0x198   : > { %v240_v31 = vpop.xlane.xlu1 %239 }
 0x199   : > { %v242_v32 = vsub.f32 %v233_v23, %v240_v31 }
 0x19b   : > { %v755_v33 = vpop.eup %754  ;;  %v245_v34 = vmul.f32 1.442695, %v242_v32 }
 0x19c   : > { %v247_v35 = vsel %vm214_vm2, %v755_v33, 0.0 }
 0x19d   : > { %756 = vpow2.f32 %v245_v34  ;;  %248 = vadd.xlane.f32.xlu2 %v247_v35 }
 0x1a3   : > { %v757_v36 = vpop.eup %756  ;;  %v259_v45 = vpop.permute.xlu0 %258 }
 0x1a4   : > { %v250_v37 = vsel %vm214_vm2, %v757_v36, 0.0  ;;  %271 = vmatpush.bf16.msra.mxu1 %v259_v45 }
 0x1a5   : > { %251 = vadd.xlane.f32.xlu1 %v250_v37 }
 0x1b0   : > { %v286_v38 = vpop.permute.xlu1 %285 }
 0x1b1   : > { %v291_v39 = vsel %vm214_vm2, %v286_v38, 0 }
 0x1b2   : > { %300 = vmatpush.bf16.xpose.msra.mxu2 %v291_v39 }
 0x1b5   : > { %406 = vrot.lane.b32.xlu2 %v898_v13, %s826_s23 }
 0x1b9   : > { %679 = vmatmul.msk.bf16.vlgmr.msra.gmra.mxu2 %vm214_vm2, %v284_v20 }
 0x1de   : > { %503 = vmax.xlane.f32.xlu2 %v502_v44 }
 0x1f6   : > { %522 = vrot.lane.b32.xlu2 %v898_v13, %s830_s7 }
 0x210   : > { %v249_v46 = vpop.xlane.xlu2 %248 }
 0x211   : > { %758 = vrcp.f32 %v249_v46 }
 0x217   : > { %v759_v50 = vpop.eup %758 }
 0x218   : > { %v252_v47 = vpop.xlane.xlu1 %251  ;;  %v407_v48 = vpop.permute.xlu2 %406  ;;  %v255_v52 = vmul.f32 %v759_v50, %v755_v33 }
 0x219   : > { %760 = vrcp.f32 %v252_v47  ;;  %v412_v49 = vsel %vm214_vm2, %v407_v48, 0 }
 0x21a   : > { %421 = vmatpush.bf16.xpose.msrb.mxu1 %v412_v49 }
 0x21f   : > { %v761_v51 = vpop.eup %760 }
 0x220   : > { %v256_v53 = vmul.f32 %v761_v51, %v757_v36 }
 0x222   : > { %v257_v54 = vpack.c.bf16 %v256_v53, %v255_v52 }
 0x224   : > { %676 = vmatmul.msk.bf16.vlgmr.msra.gmra.mxu1 %vm214_vm2, %v257_v54 }
 0x234   : > { %695 = vmatmul.msk.bf16.vlgmr.msrb.gmra.mxu1 %vm214_vm2, %v898_v13 }
 0x23c   : > { %v302_v56 = vpop.f32.mrf.mxu2 }
 0x23d   : > { %v303_v57 = vadd.f32 %v697_v55, %v302_v56 }
 0x23f   : > { %v307_v58 = vsel %vm214_vm2, %v303_v57, -inf }
 0x240   : > { %308 = vmax.xlane.f32.xlu0 %v307_v58 }
 0x244   : > { %v304_v59 = vpop.f32.mrf.mxu2 }
 0x245   : > { %v305_v60 = vadd.f32 %v698_v41, %v304_v59 }
 0x247   : > { %v310_v61 = vsel %vm214_vm2, %v305_v60, -inf }
 0x248   : > { %311 = vmax.xlane.f32.xlu1 %v310_v61 }
 0x250   : > { %500 = vmax.xlane.f32.xlu1 %v499_v63 }
 0x251   : > { %v504_v14 = vpop.xlane.xlu2 %503 }
 0x252   : > { %v506_v20 = vsub.f32 %v497_v43, %v504_v14 }
 0x254   : > { %v509_v25 = vmul.f32 1.442695, %v506_v20 }
 0x259   : > { %v523_v32 = vpop.permute.xlu2 %522 }
 0x25a   : > { %535 = vmatpush.bf16.msrb.mxu2 %v523_v32 }
 0x2a1   : > { %v273_v0 = vpop.f32.mrf.mxu1 }
 0x2a2   : > { %278 = vst.msk [vmem:[#allocation3] sm:$0xff] %vm214_vm2, %v273_v0 }
 0x2a9   : > { %v275_v1 = vpop.f32.mrf.mxu1 }
 0x2aa   : > { %279 = vst.msk [vmem:[#allocation3 + $0x8] sm:$0xff] %vm214_vm2, %v275_v1 }
 0x2b1   : > { %v423_v9 = vpop.f32.mrf.mxu1 }
 0x2b2   : > { %v424_v11 = vadd.f32 %v423_v9, %v908_v16 }
 0x2b3   : > { %v309_v2 = vpop.xlane.xlu0 %308 }
 0x2b4   : > { %v313_v3 = vsub.f32 %v303_v57, %v309_v2  ;;  %v428_v18 = vsel %vm214_vm2, %v424_v11, -inf }
 0x2b6   : > { %v315_v4 = vmul.f32 1.442695, %v313_v3 }
 0x2b8   : > { %762 = vpow2.f32 %v315_v4 }
 0x2b9   : > { %v425_v24 = vpop.f32.mrf.mxu1 }
 0x2ba   : > { %v426_v26 = vadd.f32 %v425_v24, %v915_v21 }
 0x2bb   : > { %v312_v5 = vpop.xlane.xlu1 %311 }
 0x2bc   : > { %v314_v6 = vsub.f32 %v305_v60, %v312_v5  ;;  %v431_v28 = vsel %vm214_vm2, %v426_v26, -inf }
 0x2be   : > { %v948_v7 = vpop.eup %762  ;;  %v317_v8 = vmul.f32 1.442695, %v314_v6 }
 0x2bf   : > { %v319_v10 = vsel %vm214_vm2, %v948_v7, 0.0 }
 0x2c0   : > { %764 = vpow2.f32 %v317_v8  ;;  %320 = vadd.xlane.f32.xlu1 %v319_v10 }
 0x2c3   : > { %v501_v15 = vpop.xlane.xlu1 %500 }
 0x2c4   : > { %v505_v17 = vsub.f32 %v495_v62, %v501_v15 }
 0x2c6   : > { %v765_v19 = vpop.eup %764  ;;  %v507_v22 = vmul.f32 1.442695, %v505_v17 }
 0x2c7   : > { %v322_v23 = vsel %vm214_vm2, %v765_v19, 0.0 }
 0x2c8   : > { %766 = vpow2.f32 %v507_v22  ;;  %323 = vadd.xlane.f32.xlu0 %v322_v23  ;;  %429 = vmax.xlane.f32.xlu1 %v428_v18 }
 0x2c9   : > { %768 = vpow2.f32 %v509_v25 }
 0x2ce   : > { %v767_v27 = vpop.eup %766 }
 0x2cf   : > { %v511_v16 = vsel %vm214_vm2, %v767_v27, 0.0  ;;  %v769_v29 = vpop.eup %768 }
 0x2d0   : > { %512 = vadd.xlane.f32.xlu0 %v511_v16  ;;  %432 = vmax.xlane.f32.xlu1 %v431_v28  ;;  %v514_v30 = vsel %vm214_vm2, %v769_v29, 0.0 }
 0x2d8   : > { %515 = vadd.xlane.f32.xlu0 %v514_v30 }
 0x2e9   : > { %330 = vrot.lane.b32.xlu1 %v891_v12, %s830_s7 }
 0x333   : > { %v321_v31 = vpop.xlane.xlu1 %320 }
 0x33b   : > { %v430_v33 = vpop.xlane.xlu1 %429  ;;  %v324_v21 = vpop.xlane.xlu0 %323 }
 0x33c   : > { %v434_v34 = vsub.f32 %v424_v11, %v430_v33 }
 0x33e   : > { %v436_v35 = vmul.f32 1.442695, %v434_v34 }
 0x340   : > { %770 = vpow2.f32 %v436_v35 }
 0x343   : > { %v433_v36 = vpop.xlane.xlu1 %432  ;;  %v513_v37 = vpop.xlane.xlu0 %512 }
 0x344   : > { %v435_v38 = vsub.f32 %v426_v26, %v433_v36 }
 0x346   : > { %v771_v39 = vpop.eup %770  ;;  %v438_v40 = vmul.f32 1.442695, %v435_v38 }
 0x347   : > { %v440_v41 = vsel %vm214_vm2, %v771_v39, 0.0 }
 0x348   : > { %772 = vpow2.f32 %v438_v40  ;;  %441 = vadd.xlane.f32.xlu0 %v440_v41 }
 0x349   : > { %774 = vrcp.f32 %v513_v37 }
 0x34b   : > { %v516_v42 = vpop.xlane.xlu0 %515 }
 0x34c   : > { %776 = vrcp.f32 %v516_v42 }
 0x34d   : > { %778 = vrcp.f32 %v324_v21 }
 0x34e   : > { %v773_v12 = vpop.eup %772  ;;  %780 = vrcp.f32 %v321_v31 }
 0x34f   : > { %v443_v43 = vsel %vm214_vm2, %v773_v12, 0.0  ;;  %v775_v44 = vpop.eup %774 }
 0x350   : > { %444 = vadd.xlane.f32.xlu1 %v443_v43  ;;  %v519_v46 = vmul.f32 %v775_v44, %v767_v27 }
 0x352   : > { %v777_v45 = vpop.eup %776 }
 0x353   : > { %v520_v47 = vmul.f32 %v777_v45, %v769_v29  ;;  %v779_v49 = vpop.eup %778 }
 0x354   : > { %v781_v50 = vpop.eup %780  ;;  %v328_v51 = vmul.f32 %v779_v49, %v765_v19 }
 0x355   : > { %v521_v48 = vpack.c.bf16 %v520_v47, %v519_v46  ;;  %v327_v53 = vmul.f32 %v781_v50, %v948_v7 }
 0x357   : > { %700 = vmatmul.msk.bf16.vlgmr.msrb.gmra.mxu2 %vm214_vm2, %v521_v48  ;;  %v329_v54 = vpack.c.bf16 %v328_v51, %v327_v53 }
 0x35b   : > { %v331_v52 = vpop.permute.xlu1 %330 }
 0x35c   : > { %451 = vrot.lane.b32.xlu0 %v898_v13, %s829_s30  ;;  %343 = vmatpush.bf16.msra.mxu3 %v331_v52 }
 0x35f   : > { %680 = vmatmul.msk.bf16.vlgmr.msra.gmra.mxu3 %vm214_vm2, %v329_v54 }
 0x3bb   : > { %v442_v55 = vpop.xlane.xlu0 %441 }
 0x3c3   : > { %v445_v56 = vpop.xlane.xlu1 %444 }
 0x3c4   : > { %782 = vrcp.f32 %v445_v56 }
 0x3c5   : > { %784 = vrcp.f32 %v442_v55 }
 0x3ca   : > { %v783_v57 = vpop.eup %782 }
 0x3cb   : > { %v785_v58 = vpop.eup %784  ;;  %v449_v59 = vmul.f32 %v783_v57, %v773_v12 }
 0x3cc   : > { %v448_v60 = vmul.f32 %v785_v58, %v771_v39 }
 0x3ce   : > { %v452_v61 = vpop.permute.xlu0 %451  ;;  %v450_v62 = vpack.c.bf16 %v449_v59, %v448_v60 }
 0x3cf   : > { %464 = vmatpush.bf16.msrb.mxu3 %v452_v61 }
 0x3d2   : > { %696 = vmatmul.msk.bf16.vlgmr.msrb.gmra.mxu3 %vm214_vm2, %v450_v62 }
 0x3da   : > { %v537_v63 = vpop.f32.mrf.mxu2 }
 0x3db   : > { %544 = vrot.lane.b32.xlu0 %v537_v63, %s831_s8 }
 0x3e2   : > { %v345_v13 = vpop.f32.mrf.mxu3  ;;  %v539_v1 = vpop.f32.mrf.mxu2 }
 0x3e3   : > { %352 = vrot.lane.b32.xlu2 %v345_v13, %s831_s8 }
 0x3ea   : > { %v347_v0 = vpop.f32.mrf.mxu3 }
 0x3eb   : > { %354 = vrot.lane.b32.xlu2 %v347_v0, %s831_s8 }
 0x3f3   : > { %546 = vrot.lane.b32.xlu2 %v539_v1, %s831_s8 }
 0x43d   : > { %v353_v2 = vpop.permute.xlu2 %352 }
 0x43e   : > { %359 = vst.msk [vmem:[#allocation3] sm:$0xff] %vm358_vm3, %v353_v2 }
 0x445   : > { %v355_v3 = vpop.permute.xlu2 %354  ;;  %v361_v4 = vld [vmem:[#allocation3] sm:$0xff] }
 0x446   : > { %360 = vst.msk [vmem:[#allocation3 + $0x8] sm:$0xff] %vm358_vm3, %v355_v3  ;;  %v363_v5 = vpack.c.bf16 %v361_v4, %v361_v4 }
 0x448   : > { %365 = vst.msk [vmem:[%s975_s16] sm:$0x3] %vm364_vm4, %v363_v5  ;;  %v681_v6 = vrot.slane %v363_v5, 10 }
 0x44a   : > { %682 = vst.msk [vmem:[%s975_s16 + $0x4] sm:$0x3] %vm364_vm4, %v681_v6 }
 0x44d   : > { %v362_v7 = vld [vmem:[#allocation3 + $0x8] sm:$0xff]  ;;  %v545_v11 = vpop.permute.xlu0 %544  ;;  %v547_v15 = vpop.permute.xlu2 %546 }
 0x44e   : > { %v372_v8 = vpack.c.bf16 %v362_v7, %v362_v7 }
 0x450   : > { %683 = vst.msk [vmem:[%s975_s16 + $0x8] sm:$0x3] %vm364_vm4, %v372_v8  ;;  %v684_v9 = vrot.slane %v372_v8, 10 }
 0x452   : > { %685 = vst.msk [vmem:[%s975_s16 + $0xc] sm:$0x3] %vm364_vm4, %v684_v9 }
 0x455   : > { %v466_v10 = vpop.f32.mrf.mxu3 }
 0x456   : > { %471 = vst.msk [vmem:[#allocation3] sm:$0xff] %vm214_vm2, %v466_v10 }
 0x457   : > { %550 = vst.msk [vmem:[#allocation3] sm:$0xff] %vm358_vm3, %v545_v11 }
 0x45d   : > { %v468_v14 = vpop.f32.mrf.mxu3 }
 0x45e   : > { %v552_v17 = vld [vmem:[#allocation3] sm:$0xff]  ;;  %472 = vst.msk [vmem:[#allocation3 + $0x8] sm:$0xff] %vm214_vm2, %v468_v14 }
 0x45f   : > { %v554_v18 = vpack.c.bf16 %v552_v17, %v552_v17  ;;  %551 = vst.msk [vmem:[#allocation3 + $0x8] sm:$0xff] %vm358_vm3, %v547_v15 }
 0x461   : > { %v556_v19 = vrot.slane %v554_v18, 6  ;;  %701 = vst.msk [vmem:[%s975_s16 + $0x4] sm:$0xc] %vm558_vm5, %v554_v18 }
 0x463   : > { %559 = vst.msk [vmem:[%s975_s16] sm:$0xc] %vm558_vm5, %v556_v19 }
 0x466   : > { %v553_v20 = vld [vmem:[#allocation3 + $0x8] sm:$0xff] }
 0x467   : > { %v561_v22 = vpack.c.bf16 %v553_v20, %v553_v20 }
 0x469   : > { %v563_v23 = vrot.slane %v561_v22, 6  ;;  %703 = vst.msk [vmem:[%s975_s16 + $0xc] sm:$0xc] %vm558_vm5, %v561_v22 }
 0x46b   : > { %702 = vst.msk [vmem:[%s975_s16 + $0x8] sm:$0xc] %vm558_vm5, %v563_v23 }
 0x46c PF: > { %s12_s13 = sadd.s32 1, %s824_s13   ;;  %s1008_s9 = smov %s816_s11 }
 0x46d   : > { %p9_p7 = scmp.ge.s32.totalorder %s12_s13, 6   ;;  %s1009_s10 = smov %s820_s12 }
 0x46e   : > { %s1010_s11 = smov %s1013_s14  ;;  %s1011_s12 = smov %s1017_s15 }
 0x46f   :  { %11 = sbr.rel (!%p9_p7) target bundleno = 3 (0x3), region = 65 }

// kernel: basic_layer_up_forward.7
= control target key start
LH: loop header
LB: loop body
LE: loop exit
PB: predicated region body
PF: predicated region fallthrough
CT: control target
= control target key end

     0   :  { %vm37_vm0 = vcmask 261120   ;;  %v637_v32 = vmov 32.0   ;;  %s1302_s0 = inlined_call_operand.vmem [shape: f32[128,32], index: 0, kind: input, shape index: {}]   ;;  %s1303_s1 = inlined_call_operand.vmem [shape: f32[1,32], index: 1, kind: input, shape index: {}]   ;;  %s1304_s2 = inlined_call_operand.vmem [shape: f32[1,32], index: 2, kind: input, shape index: {}]   ;;  %s1305_s4 = inlined_call_operand.vmem [shape: f32[1,96], index: 4, kind: input, shape index: {}]   ;;  %s1306_s3 = inlined_call_operand.vmem [shape: bf16[32,96], index: 3, kind: input, shape index: {}]   ;;  %s1307_s5 = inlined_call_operand.vmem [shape: bf16[128,96], index: 5, kind: output, shape index: {}]  }
   0x1   :  { %v33_v0 = vld [vmem:[%s1302_s0 + $0x60] sm:$0xff]  ;;  %v686_v6 = vld [vmem:[%s1302_s0 + $0x68] sm:$0xff]  ;;  %v717_v14 = vld [vmem:[%s1302_s0 + $0x50] sm:$0xff]  ;;  %603 = vrcp.f32 %v637_v32 }
   0x2   :  { %v29_v1 = vld [vmem:[%s1302_s0 + $0x40] sm:$0xff]  ;;  %v74_v3 = vsel %vm37_vm0, %v33_v0, 0.0  ;;  %v691_v7 = vld [vmem:[%s1302_s0 + $0x48] sm:$0xff]  ;;  %v77_v9 = vsel %vm37_vm0, %v686_v6, 0.0  ;;  %v68_v17 = vsel %vm37_vm0, %v717_v14, 0.0  ;;  %v728_v18 = vld [vmem:[%s1302_s0 + $0x58] sm:$0xff] }
   0x3   :  { %v677_v2 = vld [vmem:[%s1302_s0] sm:$0xff]  ;;  %v62_v4 = vsel %vm37_vm0, %v29_v1, 0.0  ;;  %75 = vadd.xlane.f32.xlu1 %v74_v3  ;;  %v696_v8 = vld [vmem:[%s1302_s0 + $0x8] sm:$0xff]  ;;  %v65_v10 = vsel %vm37_vm0, %v691_v7, 0.0  ;;  %v733_v19 = vld [vmem:[%s1302_s0 + $0x70] sm:$0xff]  ;;  %v71_v21 = vsel %vm37_vm0, %v728_v18, 0.0 }
   0x4   :  { %v38_v5 = vsel %vm37_vm0, %v677_v2, 0.0  ;;  %63 = vadd.xlane.f32.xlu0 %v62_v4  ;;  %v41_v11 = vsel %vm37_vm0, %v696_v8, 0.0  ;;  %v707_v12 = vld [vmem:[%s1302_s0 + $0x20] sm:$0xff]  ;;  %v712_v13 = vld [vmem:[%s1302_s0 + $0x28] sm:$0xff]  ;;  %v738_v20 = vld [vmem:[%s1302_s0 + $0x78] sm:$0xff]  ;;  %v80_v22 = vsel %vm37_vm0, %v733_v19, 0.0 }
   0x5   :  { %39 = vadd.xlane.f32.xlu2 %v38_v5  ;;  %v50_v15 = vsel %vm37_vm0, %v707_v12, 0.0  ;;  %v53_v16 = vsel %vm37_vm0, %v712_v13, 0.0  ;;  %v83_v23 = vsel %vm37_vm0, %v738_v20, 0.0  ;;  %v749_v24 = vld [vmem:[%s1302_s0 + $0x10] sm:$0xff]  ;;  %v754_v25 = vld [vmem:[%s1302_s0 + $0x18] sm:$0xff] }
   0x6   :  { %v759_v26 = vld [vmem:[%s1302_s0 + $0x30] sm:$0xff]  ;;  %v44_v27 = vsel %vm37_vm0, %v749_v24, 0.0  ;;  %v47_v28 = vsel %vm37_vm0, %v754_v25, 0.0  ;;  %v770_v30 = vld [vmem:[%s1302_s0 + $0x38] sm:$0xff] }
   0x7   :  { %v56_v29 = vsel %vm37_vm0, %v759_v26, 0.0  ;;  %v59_v31 = vsel %vm37_vm0, %v770_v30, 0.0  ;;  %v604_v33 = vpop.eup %603 }
   0x8   :  { %v87_v34 = vmul.f32 32.0, %v604_v33  ;;  %vm91_vm1 = vweird.f32 %v604_v33 }
   0xa   :  { %v88_v35 = vsub.f32 1.0, %v87_v34 }
   0xb   :  { %78 = vadd.xlane.f32.xlu1 %v77_v9 }
   0xc   :  { %66 = vadd.xlane.f32.xlu0 %v65_v10  ;;  %v89_v36 = vmul.f32 %v604_v33, %v88_v35 }
   0xd   :  { %42 = vadd.xlane.f32.xlu2 %v41_v11 }
   0xe   :  { %v90_v37 = vadd.f32 %v604_v33, %v89_v36 }
  0x10   :  { %v774_v38 = vsel %vm91_vm1, %v604_v33, %v90_v37 }
  0x13   :  { %54 = vadd.xlane.f32.xlu1 %v53_v16 }
  0x14   :  { %51 = vadd.xlane.f32.xlu0 %v50_v15 }
  0x15   :  { %69 = vadd.xlane.f32.xlu2 %v68_v17 }
  0x1b   :  { %81 = vadd.xlane.f32.xlu1 %v80_v22 }
  0x1c   :  { %72 = vadd.xlane.f32.xlu0 %v71_v21 }
  0x1d   :  { %84 = vadd.xlane.f32.xlu2 %v83_v23 }
  0x23   :  { %48 = vadd.xlane.f32.xlu1 %v47_v28 }
  0x24   :  { %45 = vadd.xlane.f32.xlu0 %v44_v27 }
  0x25   :  { %57 = vadd.xlane.f32.xlu2 %v56_v29 }
  0x2c   :  { %60 = vadd.xlane.f32.xlu0 %v59_v31 }
  0x76   :  { %v76_v39 = vpop.xlane.xlu1 %75 }
  0x77   :  { %v64_v40 = vpop.xlane.xlu0 %63  ;;  %v105_v41 = vmul.f32 %v774_v38, %v76_v39 }
  0x78   :  { %v101_v42 = vmul.f32 %v774_v38, %v64_v40  ;;  %v40_v43 = vpop.xlane.xlu2 %39 }
  0x79   :  { %v778_v44 = vsub.f32 %v33_v0, %v105_v41  ;;  %v93_v56 = vmul.f32 %v774_v38, %v40_v43 }
  0x7a   :  { %v780_v45 = vsub.f32 %v29_v1, %v101_v42 }
  0x7b   :  { %v137_v47 = vmul.f32 %v778_v44, %v778_v44  ;;  %v808_v63 = vsub.f32 %v677_v2, %v93_v56 }
  0x7c   :  { %v133_v46 = vmul.f32 %v780_v45, %v780_v45 }
  0x7d   :  { %v177_v49 = vsel %vm37_vm0, %v137_v47, 0.0  ;;  %v125_v10 = vmul.f32 %v808_v63, %v808_v63 }
  0x7e   :  { %v165_v48 = vsel %vm37_vm0, %v133_v46, 0.0  ;;  %v79_v50 = vpop.xlane.xlu1 %78  ;;  %178 = vadd.xlane.f32.xlu0 %v177_v49 }
  0x7f   :  { %v67_v51 = vpop.xlane.xlu0 %66  ;;  %166 = vadd.xlane.f32.xlu1 %v165_v48  ;;  %v106_v52 = vmul.f32 %v774_v38, %v79_v50 }
  0x80   :  { %v102_v53 = vmul.f32 %v774_v38, %v67_v51  ;;  %v43_v54 = vpop.xlane.xlu2 %42 }
  0x81   :  { %v94_v55 = vmul.f32 %v774_v38, %v43_v54  ;;  %v793_v57 = vsub.f32 %v686_v6, %v106_v52 }
  0x82   :  { %v796_v58 = vsub.f32 %v691_v7, %v102_v53 }
  0x83   :  { %v799_v59 = vsub.f32 %v696_v8, %v94_v55  ;;  %v138_v60 = vmul.f32 %v793_v57, %v793_v57 }
  0x84   :  { %v134_v61 = vmul.f32 %v796_v58, %v796_v58 }
  0x85   :  { %v126_v62 = vmul.f32 %v799_v59, %v799_v59  ;;  %v180_v0 = vsel %vm37_vm0, %v138_v60, 0.0 }
  0x86   :  { %v168_v1 = vsel %vm37_vm0, %v134_v61, 0.0  ;;  %v55_v5 = vpop.xlane.xlu1 %54 }
  0x87   :  { %v52_v3 = vpop.xlane.xlu0 %51  ;;  %181 = vadd.xlane.f32.xlu1 %v180_v0  ;;  %169 = vadd.xlane.f32.xlu2 %v168_v1  ;;  %v144_v4 = vsel %vm37_vm0, %v126_v62, 0.0  ;;  %v98_v8 = vmul.f32 %v774_v38, %v55_v5 }
  0x88   :  { %v97_v6 = vmul.f32 %v774_v38, %v52_v3  ;;  %145 = vadd.xlane.f32.xlu0 %v144_v4  ;;  %v70_v7 = vpop.xlane.xlu2 %69 }
  0x89   :  { %v103_v9 = vmul.f32 %v774_v38, %v70_v7  ;;  %v825_v15 = vsub.f32 %v712_v13, %v98_v8 }
  0x8a   :  { %v817_v2 = vsub.f32 %v707_v12, %v97_v6  ;;  %v141_v12 = vsel %vm37_vm0, %v125_v10, 0.0 }
  0x8b   :  { %v822_v11 = vsub.f32 %v717_v14, %v103_v9  ;;  %v130_v29 = vmul.f32 %v825_v15, %v825_v15 }
  0x8c   :  { %v129_v16 = vmul.f32 %v817_v2, %v817_v2 }
  0x8d   :  { %v135_v17 = vmul.f32 %v822_v11, %v822_v11  ;;  %v156_v36 = vsel %vm37_vm0, %v130_v29, 0.0 }
  0x8e   :  { %v153_v21 = vsel %vm37_vm0, %v129_v16, 0.0  ;;  %v82_v14 = vpop.xlane.xlu1 %81 }
  0x8f   :  { %v73_v22 = vpop.xlane.xlu0 %72  ;;  %154 = vadd.xlane.f32.xlu1 %v153_v21  ;;  %142 = vadd.xlane.f32.xlu2 %v141_v12  ;;  %v171_v23 = vsel %vm37_vm0, %v135_v17, 0.0  ;;  %v107_v28 = vmul.f32 %v774_v38, %v82_v14  ;;  %v591_v17 = vld [vmem:[%s1306_s3] sm:$0xff] }
  0x90   :  { %v104_v27 = vmul.f32 %v774_v38, %v73_v22  ;;  %172 = vadd.xlane.f32.xlu0 %v171_v23  ;;  %v85_v13 = vpop.xlane.xlu2 %84 }
  0x91   :  { %v108_v31 = vmul.f32 %v774_v38, %v85_v13  ;;  %v846_v34 = vsub.f32 %v733_v19, %v107_v28 }
  0x92   :  { %v840_v32 = vsub.f32 %v728_v18, %v104_v27 }
  0x93   :  { %v843_v33 = vsub.f32 %v738_v20, %v108_v31  ;;  %v139_v43 = vmul.f32 %v846_v34, %v846_v34 }
  0x94   :  { %v136_v35 = vmul.f32 %v840_v32, %v840_v32 }
  0x95   :  { %v140_v37 = vmul.f32 %v843_v33, %v843_v33  ;;  %v183_v51 = vsel %vm37_vm0, %v139_v43, 0.0 }
  0x96   :  { %v174_v39 = vsel %vm37_vm0, %v136_v35, 0.0  ;;  %v49_v20 = vpop.xlane.xlu1 %48 }
  0x97   :  { %175 = vadd.xlane.f32.xlu1 %v174_v39  ;;  %v46_v40 = vpop.xlane.xlu0 %45  ;;  %157 = vadd.xlane.f32.xlu2 %v156_v36  ;;  %v186_v18 = vsel %vm37_vm0, %v140_v37, 0.0  ;;  %v96_v42 = vmul.f32 %v774_v38, %v49_v20 }
  0x98   :  { %v95_v41 = vmul.f32 %v774_v38, %v46_v40  ;;  %187 = vadd.xlane.f32.xlu0 %v186_v18  ;;  %v58_v19 = vpop.xlane.xlu2 %57 }
  0x99   :  { %v99_v46 = vmul.f32 %v774_v38, %v58_v19  ;;  %v867_v49 = vsub.f32 %v754_v25, %v96_v42 }
  0x9a   :  { %v861_v47 = vsub.f32 %v749_v24, %v95_v41 }
  0x9b   :  { %v864_v48 = vsub.f32 %v759_v26, %v99_v46  ;;  %v128_v25 = vmul.f32 %v867_v49, %v867_v49 }
  0x9c   :  { %v127_v50 = vmul.f32 %v861_v47, %v861_v47 }
  0x9d   :  { %v131_v52 = vmul.f32 %v864_v48, %v864_v48  ;;  %v150_v60 = vsel %vm37_vm0, %v128_v25, 0.0 }
  0x9e   :  { %v147_v53 = vsel %vm37_vm0, %v127_v50, 0.0 }
  0x9f   :  { %148 = vadd.xlane.f32.xlu1 %v147_v53  ;;  %v61_v54 = vpop.xlane.xlu0 %60  ;;  %184 = vadd.xlane.f32.xlu2 %v183_v51  ;;  %v159_v24 = vsel %vm37_vm0, %v131_v52, 0.0 }
  0xa0   :  { %v100_v26 = vmul.f32 %v774_v38, %v61_v54  ;;  %160 = vadd.xlane.f32.xlu0 %v159_v24 }
  0xa2   :  { %v880_v55 = vsub.f32 %v770_v30, %v100_v26  ;;  %v592_v30 = vld [vmem:[%s1306_s3 + $0x8] sm:$0xff] }
  0xa3   :  { %594 = vmatpush.bf16.msra.mxu2 %v592_v30  ;;  %595 = vmatpush.bf16.msra.mxu3 %v592_v30 }
  0xa4   :  { %v132_v56 = vmul.f32 %v880_v55, %v880_v55  ;;  %495 = vmatpush.bf16.msra.mxu0 %v592_v30  ;;  %593 = vmatpush.bf16.msra.mxu1 %v592_v30 }
  0xa6   :  { %v162_v61 = vsel %vm37_vm0, %v132_v56, 0.0 }
  0xa7   :  { %163 = vadd.xlane.f32.xlu1 %v162_v61  ;;  %151 = vadd.xlane.f32.xlu2 %v150_v60 }
  0xa8   :  { %597 = vmatpush.bf16.msra.mxu2 %v591_v17  ;;  %598 = vmatpush.bf16.msra.mxu3 %v591_v17 }
  0xa9   :  { %496 = vmatpush.bf16.msra.mxu0 %v591_v17  ;;  %596 = vmatpush.bf16.msra.mxu1 %v591_v17 }
  0xf1   :  { %v179_v0 = vpop.xlane.xlu0 %178 }
  0xf2   :  { %v167_v62 = vpop.xlane.xlu1 %166  ;;  %v201_v3 = vmul.f32 %v179_v0, %v774_v38 }
  0xf3   :  { %v197_v1 = vmul.f32 %v167_v62, %v774_v38 }
  0xf4   :  { %v217_v5 = vadd.f32 1e-05, %v201_v3 }
  0xf5   :  { %v213_v4 = vadd.f32 1e-05, %v197_v1 }
  0xf6   :  { %vm347_vm6 = vweird.f32 %v217_v5 }
  0xf7   :  { %605 = vrsqrt.f32 %v213_v4  ;;  %vm307_vm4 = vweird.f32 %v213_v4 }
  0xf8   :  { %607 = vrsqrt.f32 %v217_v5 }
  0xfa   :  { %v182_v6 = vpop.xlane.xlu1 %181  ;;  %v170_v7 = vpop.xlane.xlu2 %169 }
  0xfb   :  { %v202_v8 = vmul.f32 %v182_v6, %v774_v38  ;;  %v146_v9 = vpop.xlane.xlu0 %145  ;;  %v198_v10 = vmul.f32 %v170_v7, %v774_v38 }
  0xfc   :  { %v190_v16 = vmul.f32 %v146_v9, %v774_v38 }
  0xfd   :  { %v897_v21 = vpop.eup %605  ;;  %v899_v12 = vadd.f32 1e-05, %v202_v8  ;;  %v901_v22 = vadd.f32 1e-05, %v198_v10 }
  0xfe   :  { %v903_v23 = vpop.eup %607  ;;  %v302_v14 = vmul.f32 %v897_v21, %v213_v4  ;;  %v906_v27 = vadd.f32 1e-05, %v190_v16  ;;  %vm308_vm2 = vweird.f32 %v897_v21 }
  0xff   :  { %v342_v13 = vmul.f32 %v903_v23, %v217_v5  ;;  %609 = vrsqrt.f32 %v899_v12  ;;  %vm348_vm3 = vweird.f32 %v903_v23  ;;  %vm940_vm5 = vmor %vm307_vm4, %vm308_vm2  ;;  %vm357_vm8 = vweird.f32 %v899_v12 }
 0x100   :  { %v303_v28 = vmul.f32 %v897_v21, %v302_v14  ;;  %611 = vrsqrt.f32 %v906_v27  ;;  %vm947_vm7 = vmor %vm347_vm6, %vm348_vm3  ;;  %vm237_vm9 = vweird.f32 %v906_v27  ;;  %vm317_vm11 = vweird.f32 %v901_v22 }
 0x101   :  { %v343_v29 = vmul.f32 %v903_v23, %v342_v13  ;;  %613 = vrsqrt.f32 %v901_v22 }
 0x102   :  { %v304_v31 = vmul.f32 0.5, %v303_v28  ;;  %v155_v35 = vpop.xlane.xlu1 %154  ;;  %v143_v36 = vpop.xlane.xlu2 %142 }
 0x103   :  { %v344_v37 = vmul.f32 0.5, %v343_v29  ;;  %v193_v39 = vmul.f32 %v155_v35, %v774_v38  ;;  %v173_v40 = vpop.xlane.xlu0 %172  ;;  %v189_v18 = vmul.f32 %v143_v36, %v774_v38 }
 0x104   :  { %v305_v20 = vsub.f32 1.5, %v304_v31  ;;  %v199_v41 = vmul.f32 %v173_v40, %v774_v38  ;;  %v976_v31 = vld [vmem:[%s1303_s1] ss:$0 sm:$0xff] }
 0x105   :  { %v917_v19 = vpop.eup %609  ;;  %v345_v42 = vsub.f32 1.5, %v344_v37  ;;  %v920_v43 = vadd.f32 1e-05, %v193_v39  ;;  %v929_v52 = vadd.f32 1e-05, %v189_v18 }
 0x106   :  { %v922_v46 = vpop.eup %611  ;;  %v352_v50 = vmul.f32 %v917_v19, %v899_v12  ;;  %v927_v51 = vadd.f32 1e-05, %v199_v41  ;;  %v306_v54 = vmul.f32 %v897_v21, %v305_v20  ;;  %vm358_vm12 = vweird.f32 %v917_v19 }
 0x107   :  { %v614_v53 = vpop.eup %613  ;;  %v346_v24 = vmul.f32 %v903_v23, %v345_v42  ;;  %v232_v26 = vmul.f32 %v922_v46, %v906_v27  ;;  %615 = vrsqrt.f32 %v920_v43  ;;  %vm238_vm14 = vweird.f32 %v922_v46  ;;  %vm1010_vm2 = vmor %vm357_vm8, %vm358_vm12 }
 0x108   :  { %v353_v25 = vmul.f32 %v917_v19, %v352_v50  ;;  %v312_v56 = vmul.f32 %v614_v53, %v901_v22  ;;  %617 = vrsqrt.f32 %v927_v51  ;;  %v310_v30 = vsel %vm940_vm5, %v897_v21, %v306_v54  ;;  %vm1032_vm5 = vmor %vm237_vm9, %vm238_vm14 }
 0x109   :  { %v233_v61 = vmul.f32 %v922_v46, %v232_v26  ;;  %v350_v5 = vsel %vm947_vm7, %v903_v23, %v346_v24  ;;  %619 = vrsqrt.f32 %v929_v52  ;;  %vm318_vm10 = vweird.f32 %v614_v53 }
 0x10a   :  { %v354_v0 = vmul.f32 0.5, %v353_v25  ;;  %v313_v1 = vmul.f32 %v614_v53, %v312_v56  ;;  %v176_v3 = vpop.xlane.xlu1 %175  ;;  %v158_v4 = vpop.xlane.xlu2 %157  ;;  %v389_v13 = vmul.f32 %v310_v30, %v780_v45  ;;  %v393_v28 = vmul.f32 %v350_v5, %v778_v44  ;;  %vm319_vm13 = vmor %vm317_vm11, %vm318_vm10 }
 0x10b   :  { %v188_v6 = vpop.xlane.xlu0 %187  ;;  %v234_v7 = vmul.f32 0.5, %v233_v61  ;;  %v200_v9 = vmul.f32 %v176_v3, %v774_v38  ;;  %v194_v21 = vmul.f32 %v158_v4, %v774_v38  ;;  %vm267_vm15 = vweird.f32 %v920_v43 }
 0x10c   :  { %v314_v8 = vmul.f32 0.5, %v313_v1  ;;  %v204_v10 = vmul.f32 %v188_v6, %v774_v38  ;;  %v355_v17 = vsub.f32 1.5, %v354_v0  ;;  %vm327_vm1 = vweird.f32 %v927_v51 }
 0x10d   :  { %v961_v16 = vpop.eup %615  ;;  %v971_v29 = vadd.f32 1e-05, %v200_v9  ;;  %v235_v36 = vsub.f32 1.5, %v234_v7  ;;  %v990_v18 = vadd.f32 1e-05, %v194_v21  ;;  %v409_v25 = vmul.f32 %v976_v31, %v389_v13 }
 0x10e   :  { %v315_v14 = vsub.f32 1.5, %v314_v8  ;;  %v262_v23 = vmul.f32 %v961_v16, %v920_v43  ;;  %v978_v35 = vpop.eup %617  ;;  %v981_v40 = vadd.f32 1e-05, %v204_v10  ;;  %v356_v44 = vmul.f32 %v917_v19, %v355_v17 }
 0x10f   :  { %v983_v45 = vpop.eup %619  ;;  %v322_v22 = vmul.f32 %v978_v35, %v927_v51  ;;  %621 = vrsqrt.f32 %v971_v29  ;;  %v1015_v56 = vmul.f32 %v922_v46, %v235_v36  ;;  %vm227_vm3 = vweird.f32 %v929_v52 }
 0x110   :  { %v316_v37 = vmul.f32 %v614_v53, %v315_v14  ;;  %v263_v39 = vmul.f32 %v961_v16, %v262_v23  ;;  %v222_v42 = vmul.f32 %v983_v45, %v929_v52  ;;  %623 = vrsqrt.f32 %v981_v40 }
 0x111   :  { %v323_v54 = vmul.f32 %v978_v35, %v322_v22  ;;  %v413_v62 = vmul.f32 %v976_v31, %v393_v28  ;;  %v360_v12 = vsel %vm1010_vm2, %v917_v19, %v356_v44  ;;  %625 = vrsqrt.f32 %v990_v18 }
 0x112   :  { %v320_v20 = vsel %vm319_vm13, %v614_v53, %v316_v37  ;;  %v264_v41 = vmul.f32 0.5, %v263_v39  ;;  %v149_v24 = vpop.xlane.xlu1 %148  ;;  %v1004_v53 = vld [vmem:[%s1304_s2] ss:$0 sm:$0xff]  ;;  %v223_v60 = vmul.f32 %v983_v45, %v222_v42  ;;  %v185_v61 = vpop.xlane.xlu2 %184  ;;  %vm268_vm4 = vweird.f32 %v961_v16 }
 0x113   :  { %v390_v50 = vmul.f32 %v320_v20, %v796_v58  ;;  %v161_v26 = vpop.xlane.xlu0 %160  ;;  %v324_v1 = vmul.f32 0.5, %v323_v54  ;;  %v191_v4 = vmul.f32 %v149_v24, %v774_v38  ;;  %v203_v6 = vmul.f32 %v185_v61, %v774_v38  ;;  %vm1074_vm9 = vmor %vm267_vm15, %vm268_vm4 }
 0x114   :  { %v265_v0 = vsub.f32 1.5, %v264_v41  ;;  %v224_v3 = vmul.f32 0.5, %v223_v60  ;;  %v195_v30 = vmul.f32 %v161_v26, %v774_v38  ;;  %v429_v8 = vadd.f32 %v1004_v53, %v409_v25 }
 0x115   :  { %v325_v19 = vsub.f32 1.5, %v324_v1  ;;  %v410_v7 = vmul.f32 %v976_v31, %v390_v50  ;;  %v394_v9 = vmul.f32 %v360_v12, %v793_v57  ;;  %v240_v10 = vsel %vm1032_vm5, %v922_v46, %v1015_v56  ;;  %v1046_v21 = vpop.eup %621 }
 0x116   :  { %v225_v17 = vsub.f32 1.5, %v224_v3  ;;  %v1044_v27 = vadd.f32 1e-05, %v191_v4  ;;  %v1049_v14 = vmul.f32 %v961_v16, %v265_v0  ;;  %vm328_vm6 = vweird.f32 %v978_v35  ;;  %v1055_v57 = vpop.eup %623 }
 0x117   :  { %vm228_vm7 = vweird.f32 %v983_v45  ;;  %v1053_v23 = vadd.f32 1e-05, %v195_v30  ;;  %v332_v28 = vmul.f32 %v1046_v21, %v971_v29  ;;  %v1061_v36 = vadd.f32 1e-05, %v203_v6  ;;  %v1063_v37 = vpop.eup %625  ;;  %vm1103_vm14 = vmor %vm327_vm1, %vm328_vm6 }
 0x118   :  { %v226_v13 = vmul.f32 %v983_v45, %v225_v17  ;;  %627 = vrsqrt.f32 %v1044_v27  ;;  %v326_v39 = vmul.f32 %v978_v35, %v325_v19  ;;  %vm337_vm8 = vweird.f32 %v971_v29  ;;  %vm1092_vm12 = vmor %vm227_vm3, %vm228_vm7 }
 0x119   :  { %v372_v44 = vmul.f32 %v1055_v57, %v981_v40  ;;  %v430_v22 = vadd.f32 %v1004_v53, %v410_v7  ;;  %v333_v41 = vmul.f32 %v1046_v21, %v332_v28  ;;  %vm377_vm10 = vweird.f32 %v981_v40 }
 0x11a   :  { %v272_v42 = vmul.f32 %v1063_v37, %v990_v18  ;;  %vm277_vm11 = vweird.f32 %v990_v18  ;;  %v414_v50 = vmul.f32 %v976_v31, %v394_v9  ;;  %v270_v43 = vsel %vm1074_vm9, %v961_v16, %v1049_v14  ;;  %v164_v26 = vpop.xlane.xlu1 %163  ;;  %v152_v60 = vpop.xlane.xlu2 %151 }
 0x11b   :  { %vm338_vm13 = vweird.f32 %v1046_v21  ;;  %v373_v24 = vmul.f32 %v1055_v57, %v372_v44  ;;  %629 = vrsqrt.f32 %v1053_v23  ;;  %v230_v52 = vsel %vm1092_vm12, %v983_v45, %v226_v13 }
 0x11c   :  { %v334_v25 = vmul.f32 0.5, %v333_v41  ;;  %v273_v58 = vmul.f32 %v1063_v37, %v272_v42  ;;  %631 = vrsqrt.f32 %v1061_v36  ;;  %v330_v61 = vsel %vm1103_vm14, %v978_v35, %v326_v39  ;;  %vm1133_vm1 = vmor %vm337_vm8, %vm338_vm13 }
 0x11d   :  { %v374_v12 = vmul.f32 0.5, %v373_v24  ;;  %v441_v51 = vpack.c.bf16 %v430_v22, %v429_v8  ;;  %v433_v0 = vadd.f32 %v1004_v53, %v413_v62  ;;  %v434_v45 = vadd.f32 %v1004_v53, %v414_v50 }
 0x11e   :  { %v1116_v1 = vpop.eup %627  ;;  %v335_v3 = vsub.f32 1.5, %v334_v25  ;;  %v274_v4 = vmul.f32 0.5, %v273_v58  ;;  %v196_v30 = vmul.f32 %v164_v26, %v774_v38  ;;  %v381_v19 = vmul.f32 %v230_v52, %v808_v63 }
 0x11f   :  { %v375_v6 = vsub.f32 1.5, %v374_v12  ;;  %v242_v7 = vmul.f32 %v1116_v1, %v1044_v27  ;;  %587 = vmatmul.msk.bf16.vlgmr.msra.gmra.mxu2 %vm37_vm0, %v441_v51  ;;  %v192_v35 = vmul.f32 %v152_v60, %v774_v38  ;;  %vm278_vm15 = vweird.f32 %v1063_v37 }
 0x120   :  { %v336_v62 = vmul.f32 %v1046_v21, %v335_v3  ;;  %v275_v8 = vsub.f32 1.5, %v274_v4  ;;  %v443_v9 = vpack.c.bf16 %v434_v45, %v433_v0  ;;  %vm378_vm2 = vweird.f32 %v1055_v57  ;;  %vm279_vm3 = vmor %vm277_vm11, %vm278_vm15 }
 0x121   :  { %v1127_v17 = vpop.eup %629  ;;  %v376_v14 = vmul.f32 %v1055_v57, %v375_v6  ;;  %v243_v38 = vmul.f32 %v1116_v1, %v242_v7  ;;  %v1140_v13 = vadd.f32 1e-05, %v196_v30  ;;  %v1149_v22 = vadd.f32 1e-05, %v192_v35  ;;  %vm1172_vm4 = vmor %vm377_vm10, %vm378_vm2 }
 0x122   :  { %v632_v28 = vpop.eup %631  ;;  %v340_v39 = vsel %vm1133_vm1, %v1046_v21, %v336_v62  ;;  %v276_v44 = vmul.f32 %v1063_v37, %v275_v8  ;;  %v282_v29 = vmul.f32 %v1127_v17, %v1053_v23  ;;  %589 = vmatmul.msk.bf16.vlgmr.msra.gmra.mxu3 %vm37_vm0, %v443_v9  ;;  %v382_v20 = vmul.f32 %v240_v10, %v799_v59 }
 0x123   :  { %v385_v41 = vmul.f32 %v270_v43, %v817_v2  ;;  %v362_v21 = vmul.f32 %v632_v28, %v1061_v36  ;;  %v401_v42 = vmul.f32 %v976_v31, %v381_v19  ;;  %v391_v50 = vmul.f32 %v330_v61, %v822_v11 }
 0x124   :  { %v392_v54 = vmul.f32 %v340_v39, %v840_v32  ;;  %v280_v5 = vsel %vm279_vm3, %v1063_v37, %v276_v44  ;;  %v283_v46 = vmul.f32 %v1127_v17, %v282_v29  ;;  %v244_v18 = vmul.f32 0.5, %v243_v38 }
 0x125   :  { %v386_v2 = vmul.f32 %v280_v5, %v825_v15  ;;  %v363_v56 = vmul.f32 %v632_v28, %v362_v21  ;;  %633 = vrsqrt.f32 %v1140_v13  ;;  %v380_v11 = vsel %vm1172_vm4, %v1055_v57, %v376_v14 }
 0x126   :  { %v284_v32 = vmul.f32 0.5, %v283_v46  ;;  %vm287_vm5 = vweird.f32 %v1053_v23  ;;  %635 = vrsqrt.f32 %v1149_v22  ;;  %vm368_vm6 = vweird.f32 %v632_v28 }
 0x127   :  { %v364_v40 = vmul.f32 0.5, %v363_v56  ;;  %v402_v10 = vmul.f32 %v976_v31, %v382_v20  ;;  %v421_v37 = vadd.f32 %v1004_v53, %v401_v42  ;;  %v405_v43 = vmul.f32 %v976_v31, %v385_v41 }
 0x128   :  { %v285_v15 = vsub.f32 1.5, %v284_v32  ;;  %v406_v24 = vmul.f32 %v976_v31, %v386_v2  ;;  %v411_v26 = vmul.f32 %v976_v31, %v391_v50  ;;  %v245_v16 = vsub.f32 1.5, %v244_v18 }
 0x129   :  { %v365_v57 = vsub.f32 1.5, %v364_v40  ;;  %v422_v52 = vadd.f32 %v1004_v53, %v402_v10  ;;  %v412_v25 = vmul.f32 %v976_v31, %v392_v54  ;;  %v396_v58 = vmul.f32 %v380_v11, %v843_v33 }
 0x12a   :  { %vm367_vm7 = vweird.f32 %v1061_v36  ;;  %v425_v60 = vadd.f32 %v1004_v53, %v405_v43  ;;  %v426_v61 = vadd.f32 %v1004_v53, %v406_v24  ;;  %vm288_vm8 = vweird.f32 %v1127_v17 }
 0x12b   :  { %v634_v12 = vpop.eup %633  ;;  %v366_v51 = vmul.f32 %v632_v28, %v365_v57  ;;  %v437_v0 = vpack.c.bf16 %v422_v52, %v421_v37  ;;  %v432_v3 = vadd.f32 %v1004_v53, %v412_v25  ;;  %v286_v45 = vmul.f32 %v1127_v17, %v285_v15  ;;  %vm369_vm9 = vmor %vm367_vm7, %vm368_vm6 }
 0x12c   :  { %v636_v4 = vpop.eup %635  ;;  %v292_v33 = vmul.f32 %v634_v12, %v1140_v13  ;;  %v439_v30 = vpack.c.bf16 %v426_v61, %v425_v60  ;;  %v431_v36 = vadd.f32 %v1004_v53, %v411_v26  ;;  %v246_v19 = vmul.f32 %v1116_v1, %v245_v16  ;;  %vm289_vm12 = vmor %vm287_vm5, %vm288_vm8 }
 0x12d   :  { %vm248_vm10 = vweird.f32 %v1116_v1  ;;  %v370_v6 = vsel %vm369_vm9, %v632_v28, %v366_v51  ;;  %v252_v7 = vmul.f32 %v636_v4, %v1149_v22  ;;  %583 = vmatmul.msk.bf16.vlgmr.msra.gmra.mxu0 %vm37_vm0, %v437_v0  ;;  %v416_v9 = vmul.f32 %v976_v31, %v396_v58 }
 0x12e   :  { %v395_v35 = vmul.f32 %v370_v6, %v846_v34  ;;  %v293_v62 = vmul.f32 %v634_v12, %v292_v33  ;;  %585 = vmatmul.msk.bf16.vlgmr.msra.gmra.mxu1 %vm37_vm0, %v439_v30  ;;  %v442_v8 = vpack.c.bf16 %v432_v3, %v431_v36  ;;  %vm247_vm11 = vweird.f32 %v1044_v27 }
 0x12f   :  { %v253_v63 = vmul.f32 %v636_v4, %v252_v7  ;;  %vm249_vm13 = vmor %vm247_vm11, %vm248_vm10  ;;  %v290_v14 = vsel %vm289_vm12, %v1127_v17, %v286_v45  ;;  %vm298_vm14 = vweird.f32 %v634_v12  ;;  %v436_v29 = vadd.f32 %v1004_v53, %v416_v9 }
 0x130   :  { %v294_v38 = vmul.f32 0.5, %v293_v62  ;;  %588 = vmatmul.msk.bf16.gmra.mxu2 %vm37_vm0, %v442_v8  ;;  %v415_v34 = vmul.f32 %v976_v31, %v395_v35  ;;  %v250_v28 = vsel %vm249_vm13, %v1116_v1, %v246_v19  ;;  %v387_v23 = vmul.f32 %v290_v14, %v864_v48 }
 0x131   :  { %v254_v39 = vmul.f32 0.5, %v253_v63  ;;  %vm258_vm15 = vweird.f32 %v636_v4  ;;  %v383_v17 = vmul.f32 %v250_v28, %v861_v47  ;;  %vm297_vm1 = vweird.f32 %v1140_v13 }
 0x132   :  { %v295_v44 = vsub.f32 1.5, %v294_v38  ;;  %v435_v27 = vadd.f32 %v1004_v53, %v415_v34  ;;  %vm299_vm2 = vmor %vm297_vm1, %vm298_vm14  ;;  %vm257_vm3 = vweird.f32 %v1149_v22  ;;  %v407_v48 = vmul.f32 %v976_v31, %v387_v23 }
 0x133   :  { %v255_v20 = vsub.f32 1.5, %v254_v39  ;;  %vm259_vm4 = vmor %vm257_vm3, %vm258_vm15  ;;  %v403_v47 = vmul.f32 %v976_v31, %v383_v17  ;;  %vm554_vm5 = vcmask 781312  }
 0x134   :  { %v296_v41 = vmul.f32 %v634_v12, %v295_v44  ;;  %v444_v21 = vpack.c.bf16 %v436_v29, %v435_v27  ;;  %v427_v59 = vadd.f32 %v1004_v53, %v407_v48 }
 0x135   :  { %v256_v42 = vmul.f32 %v636_v4, %v255_v20  ;;  %v423_v2 = vadd.f32 %v1004_v53, %v403_v47 }
 0x136   :  { %v300_v1 = vsel %vm299_vm2, %v634_v12, %v296_v41  ;;  %590 = vmatmul.msk.bf16.gmra.mxu3 %vm37_vm0, %v444_v21 }
 0x137   :  { %v388_v50 = vmul.f32 %v300_v1, %v880_v55  ;;  %v260_v54 = vsel %vm259_vm4, %v636_v4, %v256_v42 }
 0x138   :  { %v384_v5 = vmul.f32 %v260_v54, %v867_v49  ;;  %v602_v49 = vld [vmem:[%s1305_s4] ss:$0 sm:$0xff] }
 0x139   :  { %v408_v13 = vmul.f32 %v976_v31, %v388_v50 }
 0x13a   :  { %v404_v46 = vmul.f32 %v976_v31, %v384_v5 }
 0x13b   :  { %v428_v22 = vadd.f32 %v1004_v53, %v408_v13 }
 0x13c   :  { %v424_v18 = vadd.f32 %v1004_v53, %v404_v46 }
 0x13d   :  { %v440_v55 = vpack.c.bf16 %v428_v22, %v427_v59 }
 0x13e   :  { %v438_v56 = vpack.c.bf16 %v424_v18, %v423_v2 }
 0x13f   :  { %586 = vmatmul.msk.bf16.gmra.mxu1 %vm37_vm0, %v440_v55 }
 0x140   :  { %584 = vmatmul.msk.bf16.gmra.mxu0 %vm37_vm0, %v438_v56 }
 0x1a2   :  { %v518_v11 = vpop.f32.mrf.mxu2 }
 0x1a3   :  { %v519_v31 = vadd.f32 %v602_v49, %v518_v11 }
 0x1a5   :  { %v546_v32 = vpack.c.bf16 %v519_v31, %v519_v31  ;;  %v528_v40 = vpop.f32.mrf.mxu3 }
 0x1a6   :  { %v529_v10 = vadd.f32 %v602_v49, %v528_v40 }
 0x1a7   :  { %563 = vst.msk [vmem:[%s1307_s5 + $0x20] sm:$0xf] %vm554_vm5, %v546_v32 }
 0x1a8   :  { %v550_v53 = vpack.c.bf16 %v529_v10, %v529_v10 }
 0x1aa   :  { %567 = vst.msk [vmem:[%s1307_s5 + $0x30] sm:$0xf] %vm554_vm5, %v550_v53  ;;  %v498_v37 = vpop.f32.mrf.mxu0  ;;  %v520_v15 = vpop.f32.mrf.mxu2 }
 0x1ab   :  { %v499_v43 = vadd.f32 %v602_v49, %v498_v37  ;;  %v521_v24 = vadd.f32 %v602_v49, %v520_v15  ;;  %v508_v26 = vpop.f32.mrf.mxu1 }
 0x1ac   :  { %v509_v16 = vadd.f32 %v602_v49, %v508_v26 }
 0x1ad   :  { %v538_v57 = vpack.c.bf16 %v499_v43, %v499_v43  ;;  %v547_v52 = vpack.c.bf16 %v521_v24, %v521_v24  ;;  %v530_v25 = vpop.f32.mrf.mxu3 }
 0x1ae   :  { %v531_v58 = vadd.f32 %v602_v49, %v530_v25  ;;  %v542_v60 = vpack.c.bf16 %v509_v16, %v509_v16 }
 0x1af   :  { %555 = vst.msk [vmem:[%s1307_s5] sm:$0xf] %vm554_vm5, %v538_v57 }
 0x1b0   :  { %564 = vst.msk [vmem:[%s1307_s5 + $0x24] sm:$0xf] %vm554_vm5, %v547_v52  ;;  %v551_v61 = vpack.c.bf16 %v531_v58, %v531_v58 }
 0x1b1   :  { %559 = vst.msk [vmem:[%s1307_s5 + $0x10] sm:$0xf] %vm554_vm5, %v542_v60 }
 0x1b2   :  { %568 = vst.msk [vmem:[%s1307_s5 + $0x34] sm:$0xf] %vm554_vm5, %v551_v61  ;;  %v500_v12 = vpop.f32.mrf.mxu0 }
 0x1b3   :  { %v501_v51 = vadd.f32 %v602_v49, %v500_v12  ;;  %v523_v0 = vpop.f32.mrf.mxu2  ;;  %v510_v3 = vpop.f32.mrf.mxu1 }
 0x1b4   :  { %v524_v4 = vadd.f32 %v602_v49, %v523_v0  ;;  %v511_v45 = vadd.f32 %v602_v49, %v510_v3 }
 0x1b5   :  { %v539_v33 = vpack.c.bf16 %v501_v51, %v501_v51 }
 0x1b6   :  { %v548_v30 = vpack.c.bf16 %v524_v4, %v524_v4  ;;  %v543_v36 = vpack.c.bf16 %v511_v45, %v511_v45 }
 0x1b7   :  { %556 = vst.msk [vmem:[%s1307_s5 + $0x4] sm:$0xf] %vm554_vm5, %v539_v33 }
 0x1b8   :  { %565 = vst.msk [vmem:[%s1307_s5 + $0x28] sm:$0xf] %vm554_vm5, %v548_v30 }
 0x1b9   :  { %560 = vst.msk [vmem:[%s1307_s5 + $0x14] sm:$0xf] %vm554_vm5, %v543_v36  ;;  %v533_v19 = vpop.f32.mrf.mxu3 }
 0x1ba   :  { %v534_v6 = vadd.f32 %v602_v49, %v533_v19 }
 0x1bb   :  { %v525_v7 = vpop.f32.mrf.mxu2 }
 0x1bc   :  { %v526_v35 = vadd.f32 %v602_v49, %v525_v7  ;;  %v552_v62 = vpack.c.bf16 %v534_v6, %v534_v6  ;;  %v513_v8 = vpop.f32.mrf.mxu1 }
 0x1bd   :  { %v503_v9 = vpop.f32.mrf.mxu0  ;;  %v514_v63 = vadd.f32 %v602_v49, %v513_v8 }
 0x1be   :  { %v549_v14 = vpack.c.bf16 %v526_v35, %v526_v35  ;;  %569 = vst.msk [vmem:[%s1307_s5 + $0x38] sm:$0xf] %vm554_vm5, %v552_v62  ;;  %v504_v38 = vadd.f32 %v602_v49, %v503_v9 }
 0x1bf   :  { %v544_v34 = vpack.c.bf16 %v514_v63, %v514_v63 }
 0x1c0   :  { %566 = vst.msk [vmem:[%s1307_s5 + $0x2c] sm:$0xf] %vm554_vm5, %v549_v14  ;;  %v540_v28 = vpack.c.bf16 %v504_v38, %v504_v38 }
 0x1c1   :  { %561 = vst.msk [vmem:[%s1307_s5 + $0x18] sm:$0xf] %vm554_vm5, %v544_v34  ;;  %v535_v39 = vpop.f32.mrf.mxu3 }
 0x1c2   :  { %557 = vst.msk [vmem:[%s1307_s5 + $0x8] sm:$0xf] %vm554_vm5, %v540_v28  ;;  %v536_v44 = vadd.f32 %v602_v49, %v535_v39 }
 0x1c4   :  { %v553_v27 = vpack.c.bf16 %v536_v44, %v536_v44  ;;  %v515_v29 = vpop.f32.mrf.mxu1 }
 0x1c5   :  { %v505_v23 = vpop.f32.mrf.mxu0  ;;  %v516_v20 = vadd.f32 %v602_v49, %v515_v29 }
 0x1c6   :  { %570 = vst.msk [vmem:[%s1307_s5 + $0x3c] sm:$0xf] %vm554_vm5, %v553_v27  ;;  %v506_v17 = vadd.f32 %v602_v49, %v505_v23 }
 0x1c7   :  { %v545_v41 = vpack.c.bf16 %v516_v20, %v516_v20 }
 0x1c8   :  { %v541_v21 = vpack.c.bf16 %v506_v17, %v506_v17 }
 0x1c9   :  { %562 = vst.msk [vmem:[%s1307_s5 + $0x1c] sm:$0xf] %vm554_vm5, %v545_v41 }
 0x1ca   :  { %558 = vst.msk [vmem:[%s1307_s5 + $0xc] sm:$0xf] %vm554_vm5, %v541_v21 }

// kernel: basic_layer_up_forward.9
= control target key start
LH: loop header
LB: loop body
LE: loop exit
PB: predicated region body
PF: predicated region fallthrough
CT: control target
= control target key end

     0   :  { %vm112_vm0 = vcmask 261120   ;;  %v1798_v46 = vmov 32.0   ;;  %s2869_s2 = inlined_call_operand.vmem [shape: bf16[32,32], index: 2, kind: input, shape index: {}]   ;;  %s2870_s3 = inlined_call_operand.vmem [shape: f32[1,32], index: 3, kind: input, shape index: {}]   ;;  %s2871_s1 = inlined_call_operand.vmem [shape: bf16[128,32], index: 1, kind: input, shape index: {}]   ;;  %s2872_s0 = inlined_call_operand.vmem [shape: f32[128,32], index: 0, kind: input, shape index: {}]   ;;  %s2873_s4 = inlined_call_operand.vmem [shape: f32[1,32], index: 4, kind: input, shape index: {}]   ;;  %s2874_s5 = inlined_call_operand.vmem [shape: f32[1,32], index: 5, kind: input, shape index: {}]   ;;  %s2875_s6 = inlined_call_operand.vmem [shape: bf16[32,128], index: 6, kind: input, shape index: {}]   ;;  %s2876_s7 = inlined_call_operand.vmem [shape: f32[1,128], index: 7, kind: input, shape index: {}]   ;;  %s2877_s8 = inlined_call_operand.vmem [shape: bf16[128,32], index: 8, kind: input, shape index: {}]   ;;  %s2878_s9 = inlined_call_operand.vmem [shape: f32[1,32], index: 9, kind: input, shape index: {}]   ;;  %s2879_s10 = inlined_call_operand.vmem [shape: f32[128,32], index: 10, kind: output, shape index: {}]  }
   0x1   :  { %v1704_v0 = vld [vmem:[%s2869_s2 + $0x8] sm:$0xff]  ;;  %v1703_v1 = vld [vmem:[%s2869_s2] sm:$0xff]  ;;  %v1697_v4 = vld [vmem:[%s2871_s1 + $0x10] sm:$0xff]  ;;  %1729 = vrcp.f32 %v1798_v46 }
   0x2   :  { %143 = vmatpush.bf16.msra.mxu0 %v1704_v0  ;;  %v1695_v2 = vld [vmem:[%s2871_s1] sm:$0xff]  ;;  %v1696_v3 = vld [vmem:[%s2871_s1 + $0x8] sm:$0xff]  ;;  %v1698_v5 = vld [vmem:[%s2871_s1 + $0x18] sm:$0xff] }
   0x3   :  { %v1699_v6 = vld [vmem:[%s2871_s1 + $0x20] sm:$0xff]  ;;  %v1700_v7 = vld [vmem:[%s2871_s1 + $0x28] sm:$0xff]  ;;  %v1701_v18 = vld [vmem:[%s2871_s1 + $0x30] sm:$0xff] }
   0x4   :  { %v1886_v8 = vld [vmem:[%s2870_s3] ss:$0 sm:$0xff]  ;;  %v187_v15 = vld [vmem:[%s2872_s0 + $0x8] sm:$0xff]  ;;  %v188_v21 = vld [vmem:[%s2872_s0 + $0x10] sm:$0xff] }
   0x5   :  { %v186_v10 = vld [vmem:[%s2872_s0] sm:$0xff]  ;;  %v189_v26 = vld [vmem:[%s2872_s0 + $0x18] sm:$0xff]  ;;  %v191_v37 = vld [vmem:[%s2872_s0 + $0x28] sm:$0xff] }
   0x6   :  { %144 = vmatpush.bf16.msra.mxu0 %v1703_v1  ;;  %v1702_v28 = vld [vmem:[%s2871_s1 + $0x38] sm:$0xff]  ;;  %v190_v32 = vld [vmem:[%s2872_s0 + $0x20] sm:$0xff]  ;;  %v192_v42 = vld [vmem:[%s2872_s0 + $0x30] sm:$0xff] }
   0x7   :  { %v1730_v47 = vpop.eup %1729  ;;  %v193_v61 = vld [vmem:[%s2872_s0 + $0x38] sm:$0xff] }
   0x8   :  { %v267_v48 = vmul.f32 32.0, %v1730_v47  ;;  %vm271_vm1 = vweird.f32 %v1730_v47 }
   0x9   :  { %1623 = vmatmul.msk.bf16.vlgmr.msra.gmra.mxu0 %vm112_vm0, %v1695_v2 }
   0xa   :  { %v268_v49 = vsub.f32 1.0, %v267_v48 }
   0xc   :  { %v269_v50 = vmul.f32 %v1730_v47, %v268_v49 }
   0xe   :  { %v270_v52 = vadd.f32 %v1730_v47, %v269_v50 }
  0x10   :  { %v1953_v53 = vsel %vm271_vm1, %v1730_v47, %v270_v52 }
  0x19   :  { %1624 = vmatmul.msk.bf16.gmra.mxu0 %vm112_vm0, %v1696_v3 }
  0x29   :  { %1625 = vmatmul.msk.bf16.gmra.mxu0 %vm112_vm0, %v1697_v4 }
  0x39   :  { %1626 = vmatmul.msk.bf16.gmra.mxu0 %vm112_vm0, %v1698_v5  ;;  %v194_v5 = vld [vmem:[%s2872_s0 + $0x40] sm:$0xff] }
  0x49   :  { %1627 = vmatmul.msk.bf16.gmra.mxu0 %vm112_vm0, %v1699_v6 }
  0x59   :  { %1628 = vmatmul.msk.bf16.gmra.mxu0 %vm112_vm0, %v1700_v7 }
  0x69   :  { %1629 = vmatmul.msk.bf16.gmra.mxu0 %vm112_vm0, %v1701_v18 }
  0x79   :  { %1630 = vmatmul.msk.bf16.gmra.mxu0 %vm112_vm0, %v1702_v28 }
  0x86   :  { %v146_v9 = vpop.f32.mrf.mxu0 }
  0x87   :  { %v147_v11 = vadd.f32 %v1886_v8, %v146_v9 }
  0x89   :  { %v1893_v12 = vadd.f32 %v186_v10, %v147_v11 }
  0x8b   :  { %v218_v13 = vsel %vm112_vm0, %v1893_v12, 0.0 }
  0x8c   :  { %219 = vadd.xlane.f32.xlu0 %v218_v13 }
  0x8e   :  { %v148_v14 = vpop.f32.mrf.mxu0 }
  0x8f   :  { %v149_v16 = vadd.f32 %v1886_v8, %v148_v14 }
  0x91   :  { %v1901_v17 = vadd.f32 %v187_v15, %v149_v16 }
  0x93   :  { %v221_v19 = vsel %vm112_vm0, %v1901_v17, 0.0 }
  0x94   :  { %222 = vadd.xlane.f32.xlu0 %v221_v19 }
  0x96   :  { %v151_v20 = vpop.f32.mrf.mxu0 }
  0x97   :  { %v152_v22 = vadd.f32 %v1886_v8, %v151_v20  ;;  %v195_v20 = vld [vmem:[%s2872_s0 + $0x48] sm:$0xff] }
  0x99   :  { %v1913_v23 = vadd.f32 %v188_v21, %v152_v22 }
  0x9b   :  { %v224_v24 = vsel %vm112_vm0, %v1913_v23, 0.0 }
  0x9c   :  { %225 = vadd.xlane.f32.xlu1 %v224_v24 }
  0x9e   :  { %v153_v25 = vpop.f32.mrf.mxu0 }
  0x9f   :  { %v154_v27 = vadd.f32 %v1886_v8, %v153_v25 }
  0xa1   :  { %v1924_v29 = vadd.f32 %v189_v26, %v154_v27 }
  0xa3   :  { %v227_v30 = vsel %vm112_vm0, %v1924_v29, 0.0 }
  0xa4   :  { %228 = vadd.xlane.f32.xlu1 %v227_v30  ;;  %v196_v30 = vld [vmem:[%s2872_s0 + $0x50] sm:$0xff] }
  0xa6   :  { %v156_v31 = vpop.f32.mrf.mxu0 }
  0xa7   :  { %v157_v33 = vadd.f32 %v1886_v8, %v156_v31 }
  0xa9   :  { %v1933_v34 = vadd.f32 %v190_v32, %v157_v33 }
  0xab   :  { %v230_v35 = vsel %vm112_vm0, %v1933_v34, 0.0 }
  0xac   :  { %231 = vadd.xlane.f32.xlu2 %v230_v35 }
  0xae   :  { %v158_v36 = vpop.f32.mrf.mxu0 }
  0xaf   :  { %v159_v38 = vadd.f32 %v1886_v8, %v158_v36 }
  0xb1   :  { %v1941_v39 = vadd.f32 %v191_v37, %v159_v38 }
  0xb3   :  { %v233_v40 = vsel %vm112_vm0, %v1941_v39, 0.0 }
  0xb4   :  { %234 = vadd.xlane.f32.xlu2 %v233_v40 }
  0xb6   :  { %v161_v41 = vpop.f32.mrf.mxu0 }
  0xb7   :  { %v162_v43 = vadd.f32 %v1886_v8, %v161_v41 }
  0xb9   :  { %v1949_v44 = vadd.f32 %v192_v42, %v162_v43  ;;  %v197_v42 = vld [vmem:[%s2872_s0 + $0x58] sm:$0xff] }
  0xbb   :  { %v236_v45 = vsel %vm112_vm0, %v1949_v44, 0.0 }
  0xbc   :  { %237 = vadd.xlane.f32.xlu2 %v236_v45 }
  0xbe   :  { %v163_v51 = vpop.f32.mrf.mxu0 }
  0xbf   :  { %v164_v59 = vadd.f32 %v1886_v8, %v163_v51 }
  0xc1   :  { %v1967_v1 = vadd.f32 %v193_v61, %v164_v59 }
  0xc3   :  { %v239_v6 = vsel %vm112_vm0, %v1967_v1, 0.0 }
  0xc6   :  { %v166_v55 = vpop.f32.mrf.mxu0 }
  0xc7   :  { %v167_v3 = vadd.f32 %v1886_v8, %v166_v55 }
  0xc9   :  { %v1981_v10 = vadd.f32 %v194_v5, %v167_v3  ;;  %v199_v3 = vld [vmem:[%s2872_s0 + $0x68] sm:$0xff] }
  0xcb   :  { %v242_v15 = vsel %vm112_vm0, %v1981_v10, 0.0 }
  0xce   :  { %v168_v0 = vpop.f32.mrf.mxu0 }
  0xcf   :  { %v169_v18 = vadd.f32 %v1886_v8, %v168_v0 }
  0xd1   :  { %v1997_v24 = vadd.f32 %v195_v20, %v169_v18  ;;  %v1705_v20 = vld [vmem:[%s2875_s6] sm:$0xff] }
  0xd3   :  { %v245_v32 = vsel %vm112_vm0, %v1997_v24, 0.0 }
  0xd6   :  { %v171_v13 = vpop.f32.mrf.mxu0 }
  0xd7   :  { %v172_v28 = vadd.f32 %v1886_v8, %v171_v13 }
  0xd9   :  { %v2012_v36 = vadd.f32 %v196_v30, %v172_v28 }
  0xdb   :  { %v248_v40 = vsel %vm112_vm0, %v2012_v36, 0.0 }
  0xde   :  { %v173_v26 = vpop.f32.mrf.mxu0 }
  0xdf   :  { %v174_v41 = vadd.f32 %v1886_v8, %v173_v26 }
  0xe1   :  { %v2027_v48 = vadd.f32 %v197_v42, %v174_v41 }
  0xe3   :  { %v251_v50 = vsel %vm112_vm0, %v2027_v48, 0.0 }
  0xe6   :  { %v176_v43 = vpop.f32.mrf.mxu0 }
  0xe7   :  { %v177_v52 = vadd.f32 %v1886_v8, %v176_v43 }
  0xff   :  { %v220_v54 = vpop.xlane.xlu0 %219 }
 0x100   :  { %v273_v56 = vmul.f32 %v1953_v53, %v220_v54  ;;  %v198_v54 = vld [vmem:[%s2872_s0 + $0x60] sm:$0xff] }
 0x102   :  { %v1957_v57 = vsub.f32 %v1893_v12, %v273_v56 }
 0x104   :  { %v305_v58 = vmul.f32 %v1957_v57, %v1957_v57 }
 0x106   :  { %v321_v60 = vsel %vm112_vm0, %v305_v58, 0.0  ;;  %v178_v58 = vpop.f32.mrf.mxu0 }
 0x107   :  { %322 = vadd.xlane.f32.xlu0 %v321_v60  ;;  %v223_v62 = vpop.xlane.xlu0 %222  ;;  %v2042_v60 = vadd.f32 %v198_v54, %v177_v52  ;;  %v179_v0 = vadd.f32 %v1886_v8, %v178_v58 }
 0x108   :  { %v274_v63 = vmul.f32 %v1953_v53, %v223_v62 }
 0x109   :  { %v254_v62 = vsel %vm112_vm0, %v2042_v60, 0.0  ;;  %v2056_v5 = vadd.f32 %v199_v3, %v179_v0 }
 0x10a   :  { %v1970_v2 = vsub.f32 %v1901_v17, %v274_v63 }
 0x10c   :  { %v306_v4 = vmul.f32 %v1970_v2, %v1970_v2 }
 0x10e   :  { %v324_v7 = vsel %vm112_vm0, %v306_v4, 0.0 }
 0x10f   :  { %v226_v9 = vpop.xlane.xlu1 %225  ;;  %240 = vadd.xlane.f32.xlu0 %v239_v6  ;;  %325 = vadd.xlane.f32.xlu1 %v324_v7  ;;  %v181_v6 = vpop.f32.mrf.mxu0  ;;  %v257_v7 = vsel %vm112_vm0, %v2056_v5, 0.0 }
 0x110   :  { %v275_v11 = vmul.f32 %v1953_v53, %v226_v9  ;;  %v182_v9 = vadd.f32 %v1886_v8, %v181_v6 }
 0x112   :  { %v1985_v14 = vsub.f32 %v1913_v23, %v275_v11  ;;  %v200_v11 = vld [vmem:[%s2872_s0 + $0x70] sm:$0xff] }
 0x113   :  { %v2064_v13 = vadd.f32 %v200_v11, %v182_v9 }
 0x114   :  { %v307_v16 = vmul.f32 %v1985_v14, %v1985_v14 }
 0x116   :  { %v327_v19 = vsel %vm112_vm0, %v307_v16, 0.0  ;;  %v1706_v16 = vld [vmem:[%s2875_s6 + $0x8] sm:$0xff] }
 0x117   :  { %v229_v21 = vpop.xlane.xlu1 %228  ;;  %243 = vadd.xlane.f32.xlu0 %v242_v15  ;;  %328 = vadd.xlane.f32.xlu1 %v327_v19  ;;  %v260_v15 = vsel %vm112_vm0, %v2064_v13, 0.0 }
 0x118   :  { %v276_v22 = vmul.f32 %v1953_v53, %v229_v21  ;;  %675 = vmatpush.bf16.msra.mxu1 %v1706_v16 }
 0x11a   :  { %v2000_v25 = vsub.f32 %v1924_v29, %v276_v22 }
 0x11c   :  { %v308_v27 = vmul.f32 %v2000_v25, %v2000_v25  ;;  %676 = vmatpush.bf16.msra.mxu1 %v1705_v20 }
 0x11e   :  { %v330_v31 = vsel %vm112_vm0, %v308_v27, 0.0 }
 0x11f   :  { %v232_v33 = vpop.xlane.xlu2 %231  ;;  %331 = vadd.xlane.f32.xlu2 %v330_v31  ;;  %246 = vadd.xlane.f32.xlu1 %v245_v32 }
 0x120   :  { %v277_v35 = vmul.f32 %v1953_v53, %v232_v33 }
 0x122   :  { %v2015_v37 = vsub.f32 %v1933_v34, %v277_v35 }
 0x124   :  { %v309_v38 = vmul.f32 %v2015_v37, %v2015_v37 }
 0x126   :  { %v333_v45 = vsel %vm112_vm0, %v309_v38, 0.0 }
 0x127   :  { %v235_v46 = vpop.xlane.xlu2 %234  ;;  %334 = vadd.xlane.f32.xlu2 %v333_v45  ;;  %249 = vadd.xlane.f32.xlu1 %v248_v40 }
 0x128   :  { %v278_v47 = vmul.f32 %v1953_v53, %v235_v46 }
 0x12a   :  { %v2030_v49 = vsub.f32 %v1941_v39, %v278_v47 }
 0x12c   :  { %v310_v51 = vmul.f32 %v2030_v49, %v2030_v49 }
 0x12e   :  { %v336_v55 = vsel %vm112_vm0, %v310_v51, 0.0 }
 0x12f   :  { %v238_v56 = vpop.xlane.xlu2 %237  ;;  %252 = vadd.xlane.f32.xlu2 %v251_v50  ;;  %337 = vadd.xlane.f32.xlu0 %v336_v55 }
 0x130   :  { %v279_v59 = vmul.f32 %v1953_v53, %v238_v56  ;;  %v183_v56 = vpop.f32.mrf.mxu0 }
 0x132   :  { %v2045_v61 = vsub.f32 %v1949_v44, %v279_v59 }
 0x134   :  { %v311_v63 = vmul.f32 %v2045_v61, %v2045_v61 }
 0x136   :  { %v339_v4 = vsel %vm112_vm0, %v311_v63, 0.0 }
 0x137   :  { %255 = vadd.xlane.f32.xlu2 %v254_v62  ;;  %340 = vadd.xlane.f32.xlu0 %v339_v4  ;;  %v184_v62 = vadd.f32 %v1886_v8, %v183_v56  ;;  %v201_v4 = vld [vmem:[%s2872_s0 + $0x78] sm:$0xff] }
 0x13f   :  { %258 = vadd.xlane.f32.xlu0 %v257_v7 }
 0x147   :  { %261 = vadd.xlane.f32.xlu0 %v260_v15 }
 0x17a   :  { %v323_v18 = vpop.xlane.xlu0 %322 }
 0x17b   :  { %v369_v19 = vmul.f32 %v323_v18, %v1953_v53  ;;  %v2101_v18 = vadd.f32 %v201_v4, %v184_v62 }
 0x17d   :  { %v385_v21 = vadd.f32 1e-05, %v369_v19 }
 0x17f   :  { %1731 = vrsqrt.f32 %v385_v21  ;;  %vm407_vm3 = vweird.f32 %v385_v21 }
 0x182   :  { %v326_v22 = vpop.xlane.xlu1 %325  ;;  %v241_v26 = vpop.xlane.xlu0 %240 }
 0x183   :  { %v370_v27 = vmul.f32 %v326_v22, %v1953_v53  ;;  %v280_v28 = vmul.f32 %v1953_v53, %v241_v26 }
 0x185   :  { %v1732_v30 = vpop.eup %1731  ;;  %v386_v31 = vadd.f32 1e-05, %v370_v27  ;;  %v2078_v32 = vsub.f32 %v1967_v1, %v280_v28 }
 0x186   :  { %v402_v33 = vmul.f32 %v1732_v30, %v385_v21  ;;  %vm408_vm2 = vweird.f32 %v1732_v30  ;;  %v2109_v21 = vld [vmem:[%s2873_s4] ss:$0 sm:$0xff] }
 0x187   :  { %1733 = vrsqrt.f32 %v386_v31  ;;  %v312_v35 = vmul.f32 %v2078_v32, %v2078_v32  ;;  %vm409_vm4 = vmor %vm407_vm3, %vm408_vm2  ;;  %vm417_vm6 = vweird.f32 %v386_v31 }
 0x188   :  { %v403_v38 = vmul.f32 %v1732_v30, %v402_v33 }
 0x189   :  { %v342_v40 = vsel %vm112_vm0, %v312_v35, 0.0  ;;  %v263_v35 = vsel %vm112_vm0, %v2101_v18, 0.0 }
 0x18a   :  { %v404_v41 = vmul.f32 0.5, %v403_v38  ;;  %v329_v42 = vpop.xlane.xlu1 %328  ;;  %343 = vadd.xlane.f32.xlu1 %v342_v40  ;;  %v244_v43 = vpop.xlane.xlu0 %243 }
 0x18b   :  { %v371_v45 = vmul.f32 %v329_v42, %v1953_v53  ;;  %v281_v46 = vmul.f32 %v1953_v53, %v244_v43 }
 0x18c   :  { %v405_v47 = vsub.f32 1.5, %v404_v41 }
 0x18d   :  { %v1734_v50 = vpop.eup %1733  ;;  %v2085_v51 = vadd.f32 1e-05, %v371_v45  ;;  %v2088_v52 = vsub.f32 %v1981_v10, %v281_v46 }
 0x18e   :  { %v406_v54 = vmul.f32 %v1732_v30, %v405_v47  ;;  %v412_v55 = vmul.f32 %v1734_v50, %v386_v31  ;;  %vm418_vm5 = vweird.f32 %v1734_v50  ;;  %v2122_v31 = vld [vmem:[%s2874_s5] ss:$0 sm:$0xff] }
 0x18f   :  { %1735 = vrsqrt.f32 %v2085_v51  ;;  %v313_v58 = vmul.f32 %v2088_v52, %v2088_v52  ;;  %vm419_vm7 = vmor %vm417_vm6, %vm418_vm5  ;;  %vm427_vm9 = vweird.f32 %v2085_v51 }
 0x190   :  { %v413_v59 = vmul.f32 %v1734_v50, %v412_v55  ;;  %v410_v0 = vsel %vm409_vm4, %v1732_v30, %v406_v54 }
 0x191   :  { %v345_v63 = vsel %vm112_vm0, %v313_v58, 0.0  ;;  %v561_v8 = vmul.f32 %v410_v0, %v1957_v57 }
 0x192   :  { %v414_v3 = vmul.f32 0.5, %v413_v59  ;;  %v332_v6 = vpop.xlane.xlu2 %331  ;;  %v247_v7 = vpop.xlane.xlu1 %246  ;;  %346 = vadd.xlane.f32.xlu1 %v345_v63 }
 0x193   :  { %v372_v9 = vmul.f32 %v332_v6, %v1953_v53  ;;  %v282_v11 = vmul.f32 %v1953_v53, %v247_v7  ;;  %v581_v38 = vmul.f32 %v2109_v21, %v561_v8 }
 0x194   :  { %v415_v15 = vsub.f32 1.5, %v414_v3 }
 0x195   :  { %v1736_v16 = vpop.eup %1735  ;;  %v388_v19 = vadd.f32 1e-05, %v372_v9  ;;  %v2104_v20 = vsub.f32 %v1997_v24, %v282_v11  ;;  %v601_v55 = vadd.f32 %v2122_v31, %v581_v38 }
 0x196   :  { %v416_v22 = vmul.f32 %v1734_v50, %v415_v15  ;;  %v422_v26 = vmul.f32 %v1736_v16, %v2085_v51  ;;  %vm428_vm8 = vweird.f32 %v1736_v16 }
 0x197   :  { %1737 = vrsqrt.f32 %v388_v19  ;;  %v314_v57 = vmul.f32 %v2104_v20, %v2104_v20  ;;  %vm429_vm10 = vmor %vm427_vm9, %vm428_vm8  ;;  %vm437_vm12 = vweird.f32 %v388_v19 }
 0x198   :  { %v420_v27 = vsel %vm419_vm7, %v1734_v50, %v416_v22  ;;  %v423_v28 = vmul.f32 %v1736_v16, %v422_v26 }
 0x199   :  { %v562_v30 = vmul.f32 %v420_v27, %v1970_v2  ;;  %v348_v33 = vsel %vm112_vm0, %v314_v57, 0.0 }
 0x19a   :  { %v424_v40 = vmul.f32 0.5, %v423_v28  ;;  %v335_v41 = vpop.xlane.xlu2 %334  ;;  %349 = vadd.xlane.f32.xlu2 %v348_v33  ;;  %v250_v42 = vpop.xlane.xlu1 %249  ;;  %264 = vadd.xlane.f32.xlu1 %v263_v35 }
 0x19b   :  { %v373_v43 = vmul.f32 %v335_v41, %v1953_v53  ;;  %v283_v2 = vmul.f32 %v1953_v53, %v250_v42  ;;  %v582_v45 = vmul.f32 %v2109_v21, %v562_v30 }
 0x19c   :  { %v425_v46 = vsub.f32 1.5, %v424_v40 }
 0x19d   :  { %v1738_v47 = vpop.eup %1737  ;;  %v389_v50 = vadd.f32 1e-05, %v373_v43  ;;  %v2128_v54 = vsub.f32 %v2012_v36, %v283_v2  ;;  %v602_v56 = vadd.f32 %v2122_v31, %v582_v45 }
 0x19e   :  { %v426_v58 = vmul.f32 %v1736_v16, %v425_v46  ;;  %v432_v59 = vmul.f32 %v1738_v47, %v388_v19  ;;  %vm438_vm11 = vweird.f32 %v1738_v47 }
 0x19f   :  { %1739 = vrsqrt.f32 %v389_v50  ;;  %v617_v62 = vpack.c.bf16 %v602_v56, %v601_v55  ;;  %v315_v63 = vmul.f32 %v2128_v54, %v2128_v54  ;;  %vm439_vm13 = vmor %vm437_vm12, %vm438_vm11  ;;  %vm447_vm15 = vweird.f32 %v389_v50 }
 0x1a0   :  { %v433_v0 = vmul.f32 %v1738_v47, %v432_v59  ;;  %v430_v4 = vsel %vm429_vm10, %v1736_v16, %v426_v58 }
 0x1a1   :  { %1639 = vmatmul.msk.bf16.vlgmr.msra.gmra.mxu1 %vm112_vm0, %v617_v62  ;;  %v351_v3 = vsel %vm112_vm0, %v315_v63, 0.0  ;;  %v563_v51 = vmul.f32 %v430_v4, %v1985_v14 }
 0x1a2   :  { %v434_v6 = vmul.f32 0.5, %v433_v0  ;;  %v253_v7 = vpop.xlane.xlu2 %252  ;;  %352 = vadd.xlane.f32.xlu2 %v351_v3  ;;  %v338_v9 = vpop.xlane.xlu0 %337 }
 0x1a3   :  { %v284_v11 = vmul.f32 %v1953_v53, %v253_v7  ;;  %v374_v15 = vmul.f32 %v338_v9, %v1953_v53  ;;  %v583_v14 = vmul.f32 %v2109_v21, %v563_v51 }
 0x1a4   :  { %v435_v8 = vsub.f32 1.5, %v434_v6 }
 0x1a5   :  { %v1740_v22 = vpop.eup %1739  ;;  %v2141_v26 = vsub.f32 %v2027_v48, %v284_v11  ;;  %v390_v57 = vadd.f32 1e-05, %v374_v15 }
 0x1a6   :  { %v436_v27 = vmul.f32 %v1738_v47, %v435_v8  ;;  %v442_v16 = vmul.f32 %v1740_v22, %v389_v50  ;;  %vm448_vm14 = vweird.f32 %v1740_v22 }
 0x1a7   :  { %1741 = vrsqrt.f32 %v390_v57  ;;  %v316_v28 = vmul.f32 %v2141_v26, %v2141_v26  ;;  %vm449_vm1 = vmor %vm447_vm15, %vm448_vm14  ;;  %vm457_vm3 = vweird.f32 %v390_v57 }
 0x1a8   :  { %v440_v30 = vsel %vm439_vm13, %v1738_v47, %v436_v27  ;;  %v443_v33 = vmul.f32 %v1740_v22, %v442_v16  ;;  %v603_v47 = vadd.f32 %v2122_v31, %v583_v14 }
 0x1a9   :  { %v564_v35 = vmul.f32 %v440_v30, %v2000_v25  ;;  %v354_v38 = vsel %vm112_vm0, %v316_v28, 0.0 }
 0x1aa   :  { %v444_v40 = vmul.f32 0.5, %v443_v33  ;;  %v256_v41 = vpop.xlane.xlu2 %255  ;;  %355 = vadd.xlane.f32.xlu0 %v354_v38  ;;  %v341_v42 = vpop.xlane.xlu0 %340 }
 0x1ab   :  { %v285_v19 = vmul.f32 %v1953_v53, %v256_v41  ;;  %v584_v43 = vmul.f32 %v2109_v21, %v564_v35  ;;  %v375_v14 = vmul.f32 %v341_v42, %v1953_v53 }
 0x1ac   :  { %v445_v2 = vsub.f32 1.5, %v444_v40 }
 0x1ad   :  { %v1742_v45 = vpop.eup %1741  ;;  %v2151_v46 = vsub.f32 %v2042_v60, %v285_v19  ;;  %v604_v25 = vadd.f32 %v2122_v31, %v584_v43  ;;  %v391_v40 = vadd.f32 1e-05, %v375_v14 }
 0x1ae   :  { %v446_v55 = vmul.f32 %v1740_v22, %v445_v2  ;;  %v452_v56 = vmul.f32 %v1742_v45, %v390_v57  ;;  %vm458_vm2 = vweird.f32 %v1742_v45 }
 0x1af   :  { %v618_v58 = vpack.c.bf16 %v604_v25, %v603_v47  ;;  %v317_v59 = vmul.f32 %v2151_v46, %v2151_v46  ;;  %vm459_vm4 = vmor %vm457_vm3, %vm458_vm2  ;;  %1743 = vrsqrt.f32 %v391_v40  ;;  %vm467_vm6 = vweird.f32 %v391_v40 }
 0x1b0   :  { %v453_v62 = vmul.f32 %v1742_v45, %v452_v56  ;;  %v450_v0 = vsel %vm449_vm1, %v1740_v22, %v446_v55 }
 0x1b1   :  { %1640 = vmatmul.msk.bf16.gmra.mxu1 %vm112_vm0, %v618_v58  ;;  %v357_v63 = vsel %vm112_vm0, %v317_v59, 0.0  ;;  %v565_v9 = vmul.f32 %v450_v0, %v2015_v37 }
 0x1b2   :  { %v454_v3 = vmul.f32 0.5, %v453_v62  ;;  %358 = vadd.xlane.f32.xlu1 %v357_v63  ;;  %v259_v4 = vpop.xlane.xlu0 %258 }
 0x1b3   :  { %v286_v6 = vmul.f32 %v1953_v53, %v259_v4  ;;  %v585_v27 = vmul.f32 %v2109_v21, %v565_v9 }
 0x1b4   :  { %v455_v7 = vsub.f32 1.5, %v454_v3 }
 0x1b5   :  { %v2162_v11 = vsub.f32 %v2056_v5, %v286_v6  ;;  %v605_v57 = vadd.f32 %v2122_v31, %v585_v27  ;;  %v1744_v41 = vpop.eup %1743 }
 0x1b6   :  { %v456_v50 = vmul.f32 %v1742_v45, %v455_v7  ;;  %v462_v19 = vmul.f32 %v1744_v41, %v391_v40  ;;  %vm468_vm5 = vweird.f32 %v1744_v41 }
 0x1b7   :  { %v318_v15 = vmul.f32 %v2162_v11, %v2162_v11  ;;  %vm469_vm7 = vmor %vm467_vm6, %vm468_vm5 }
 0x1b8   :  { %v460_v8 = vsel %vm459_vm4, %v1742_v45, %v456_v50  ;;  %v463_v43 = vmul.f32 %v1744_v41, %v462_v19 }
 0x1b9   :  { %v566_v22 = vmul.f32 %v460_v8, %v2030_v49  ;;  %v360_v51 = vsel %vm112_vm0, %v318_v15, 0.0 }
 0x1ba   :  { %361 = vadd.xlane.f32.xlu2 %v360_v51  ;;  %v262_v16 = vpop.xlane.xlu0 %261  ;;  %v464_v25 = vmul.f32 0.5, %v463_v43 }
 0x1bb   :  { %v287_v37 = vmul.f32 %v1953_v53, %v262_v16  ;;  %v586_v28 = vmul.f32 %v2109_v21, %v566_v22 }
 0x1bc   :  { %v465_v55 = vsub.f32 1.5, %v464_v25 }
 0x1bd   :  { %v2172_v30 = vsub.f32 %v2064_v13, %v287_v37  ;;  %v606_v33 = vadd.f32 %v2122_v31, %v586_v28 }
 0x1be   :  { %v466_v63 = vmul.f32 %v1744_v41, %v465_v55 }
 0x1bf   :  { %v619_v35 = vpack.c.bf16 %v606_v33, %v605_v57  ;;  %v319_v49 = vmul.f32 %v2172_v30, %v2172_v30 }
 0x1c0   :  { %v470_v3 = vsel %vm469_vm7, %v1744_v41, %v466_v63 }
 0x1c1   :  { %1641 = vmatmul.msk.bf16.gmra.mxu1 %vm112_vm0, %v619_v35  ;;  %v363_v38 = vsel %vm112_vm0, %v319_v49, 0.0  ;;  %v567_v22 = vmul.f32 %v470_v3, %v2045_v61 }
 0x1c2   :  { %364 = vadd.xlane.f32.xlu0 %v363_v38 }
 0x1c3   :  { %v587_v61 = vmul.f32 %v2109_v21, %v567_v22 }
 0x1fd   :  { %v344_v2 = vpop.xlane.xlu1 %343 }
 0x1fe   :  { %v376_v45 = vmul.f32 %v344_v2, %v1953_v53 }
 0x200   :  { %v392_v47 = vadd.f32 1e-05, %v376_v45  ;;  %v607_v45 = vadd.f32 %v2122_v31, %v587_v61 }
 0x202   :  { %1745 = vrsqrt.f32 %v392_v47  ;;  %vm477_vm9 = vweird.f32 %v392_v47 }
 0x205   :  { %v347_v56 = vpop.xlane.xlu1 %346 }
 0x206   :  { %v377_v58 = vmul.f32 %v347_v56, %v1953_v53 }
 0x208   :  { %v1746_v59 = vpop.eup %1745  ;;  %v393_v62 = vadd.f32 1e-05, %v377_v58  ;;  %v2204_v58 = vld [vmem:[%s2876_s7] ss:$0 sm:$0xff] }
 0x209   :  { %v472_v42 = vmul.f32 %v1746_v59, %v392_v47  ;;  %vm478_vm8 = vweird.f32 %v1746_v59 }
 0x20a   :  { %1747 = vrsqrt.f32 %v393_v62  ;;  %vm479_vm10 = vmor %vm477_vm9, %vm478_vm8  ;;  %vm487_vm12 = vweird.f32 %v393_v62 }
 0x20b   :  { %v473_v0 = vmul.f32 %v1746_v59, %v472_v42 }
 0x20d   :  { %v474_v4 = vmul.f32 0.5, %v473_v0  ;;  %v350_v6 = vpop.xlane.xlu2 %349  ;;  %v265_v7 = vpop.xlane.xlu1 %264 }
 0x20e   :  { %v378_v9 = vmul.f32 %v350_v6, %v1953_v53  ;;  %v288_v50 = vmul.f32 %v1953_v53, %v265_v7 }
 0x20f   :  { %v475_v15 = vsub.f32 1.5, %v474_v4 }
 0x210   :  { %v1748_v8 = vpop.eup %1747  ;;  %v394_v51 = vadd.f32 1e-05, %v378_v9  ;;  %v2187_v27 = vsub.f32 %v2101_v18, %v288_v50 }
 0x211   :  { %v476_v16 = vmul.f32 %v1746_v59, %v475_v15  ;;  %v482_v37 = vmul.f32 %v1748_v8, %v393_v62  ;;  %vm488_vm11 = vweird.f32 %v1748_v8  ;;  %v1714_v62 = vld [vmem:[%s2877_s8 + $0x38] sm:$0xff] }
 0x212   :  { %1749 = vrsqrt.f32 %v394_v51  ;;  %v320_v28 = vmul.f32 %v2187_v27, %v2187_v27  ;;  %vm489_vm13 = vmor %vm487_vm12, %vm488_vm11  ;;  %vm497_vm15 = vweird.f32 %v394_v51  ;;  %1498 = vmatpush.bf16.msra.mxu2 %v1714_v62  ;;  %1715 = vmatpush.bf16.msra.mxu3 %v1714_v62  ;;  %v1708_v62 = vld [vmem:[%s2877_s8 + $0x8] sm:$0xff] }
 0x213   :  { %v480_v57 = vsel %vm479_vm10, %v1746_v59, %v476_v16  ;;  %v483_v33 = vmul.f32 %v1748_v8, %v482_v37 }
 0x214   :  { %v568_v35 = vmul.f32 %v480_v57, %v2078_v32  ;;  %v366_v49 = vsel %vm112_vm0, %v320_v28, 0.0 }
 0x215   :  { %v484_v38 = vmul.f32 0.5, %v483_v33  ;;  %v353_v14 = vpop.xlane.xlu2 %352  ;;  %367 = vadd.xlane.f32.xlu1 %v366_v49 }
 0x216   :  { %v379_v40 = vmul.f32 %v353_v14, %v1953_v53  ;;  %v588_v41 = vmul.f32 %v2109_v21, %v568_v35 }
 0x217   :  { %v485_v19 = vsub.f32 1.5, %v484_v38 }
 0x218   :  { %v1750_v43 = vpop.eup %1749  ;;  %v2196_v2 = vadd.f32 1e-05, %v379_v40  ;;  %v608_v47 = vadd.f32 %v2122_v31, %v588_v41 }
 0x219   :  { %v492_v32 = vmul.f32 %v1750_v43, %v394_v51  ;;  %v486_v25 = vmul.f32 %v1748_v8, %v485_v19  ;;  %vm498_vm14 = vweird.f32 %v1750_v43  ;;  %v1713_v51 = vld [vmem:[%s2877_s8 + $0x30] sm:$0xff] }
 0x21a   :  { %1751 = vrsqrt.f32 %v2196_v2  ;;  %v620_v55 = vpack.c.bf16 %v608_v47, %v607_v45  ;;  %vm499_vm1 = vmor %vm497_vm15, %vm498_vm14  ;;  %1499 = vmatpush.bf16.msra.mxu2 %v1713_v51  ;;  %1716 = vmatpush.bf16.msra.mxu3 %v1713_v51  ;;  %v1712_v45 = vld [vmem:[%s2877_s8 + $0x28] sm:$0xff]  ;;  %vm507_vm3 = vweird.f32 %v2196_v2 }
 0x21b   :  { %v493_v56 = vmul.f32 %v1750_v43, %v492_v32  ;;  %v490_v42 = vsel %vm489_vm13, %v1748_v8, %v486_v25 }
 0x21c   :  { %1642 = vmatmul.msk.bf16.gmra.mxu1 %vm112_vm0, %v620_v55  ;;  %v569_v50 = vmul.f32 %v490_v42, %v2088_v52  ;;  %v1711_v42 = vld [vmem:[%s2877_s8 + $0x20] sm:$0xff] }
 0x21d   :  { %v494_v59 = vmul.f32 0.5, %v493_v56  ;;  %v356_v63 = vpop.xlane.xlu0 %355 }
 0x21e   :  { %v380_v0 = vmul.f32 %v356_v63, %v1953_v53  ;;  %v678_v3 = vpop.f32.mrf.mxu1  ;;  %v589_v35 = vmul.f32 %v2109_v21, %v569_v50  ;;  %1500 = vmatpush.bf16.msra.mxu2 %v1712_v45  ;;  %1717 = vmatpush.bf16.msra.mxu3 %v1712_v45 }
 0x21f   :  { %v495_v4 = vsub.f32 1.5, %v494_v59  ;;  %v2209_v6 = vadd.f32 %v2204_v58, %v678_v3 }
 0x220   :  { %v2211_v7 = vpop.eup %1751  ;;  %v2213_v9 = vadd.f32 1e-05, %v380_v0  ;;  %v609_v32 = vadd.f32 %v2122_v31, %v589_v35 }
 0x221   :  { %v496_v15 = vmul.f32 %v1750_v43, %v495_v4  ;;  %v502_v8 = vmul.f32 %v2211_v7, %v2196_v2  ;;  %v2223_v22 = vmul.f32 0.70710677, %v2209_v6  ;;  %vm508_vm2 = vweird.f32 %v2211_v7 }
 0x222   :  { %1753 = vrsqrt.f32 %v2213_v9  ;;  %vm2262_vm4 = vmor %vm507_vm3, %vm508_vm2  ;;  %1501 = vmatpush.bf16.msra.mxu2 %v1711_v42  ;;  %1718 = vmatpush.bf16.msra.mxu3 %v1711_v42  ;;  %vm517_vm6 = vweird.f32 %v2213_v9 }
 0x223   :  { %v500_v16 = vsel %vm499_vm1, %v1750_v43, %v496_v15  ;;  %v503_v37 = vmul.f32 %v2211_v7, %v502_v8  ;;  %v750_v52 = vmul.f32 %v2223_v22, %v2223_v22 }
 0x224   :  { %v570_v28 = vmul.f32 %v500_v16, %v2104_v20 }
 0x225   :  { %v504_v57 = vmul.f32 0.5, %v503_v37  ;;  %v359_v33 = vpop.xlane.xlu1 %358  ;;  %v2235_v20 = vmin.f32 %v750_v52, 16.0 }
 0x226   :  { %v381_v49 = vmul.f32 %v359_v33, %v1953_v53  ;;  %v680_v61 = vpop.f32.mrf.mxu1  ;;  %v590_v38 = vmul.f32 %v2109_v21, %v570_v28  ;;  %v1710_v33 = vld [vmem:[%s2877_s8 + $0x18] sm:$0xff] }
 0x227   :  { %v505_v14 = vsub.f32 1.5, %v504_v57  ;;  %v2238_v40 = vadd.f32 %v2204_v58, %v680_v61  ;;  %v763_v63 = vmul.f32 3.8918573e-05, %v2235_v20  ;;  %v752_v50 = vmul.f32 2.1237322e-06, %v2235_v20  ;;  %1502 = vmatpush.bf16.msra.mxu2 %v1710_v33  ;;  %1719 = vmatpush.bf16.msra.mxu3 %v1710_v33 }
 0x228   :  { %v1754_v41 = vpop.eup %1753  ;;  %v2240_v19 = vadd.f32 1e-05, %v381_v49  ;;  %v610_v43 = vadd.f32 %v2122_v31, %v590_v38 }
 0x229   :  { %v512_v47 = vmul.f32 %v1754_v41, %v2213_v9  ;;  %v2251_v25 = vmul.f32 0.70710677, %v2238_v40  ;;  %v506_v55 = vmul.f32 %v2211_v7, %v505_v14  ;;  %v764_v4 = vadd.f32 0.001143296, %v763_v63 }
 0x22a   :  { %1755 = vrsqrt.f32 %v2240_v19  ;;  %v621_v59 = vpack.c.bf16 %v610_v43, %v609_v32  ;;  %vm518_vm5 = vweird.f32 %v1754_v41  ;;  %v753_v61 = vadd.f32 0.00028619796, %v752_v50 }
 0x22b   :  { %v513_v56 = vmul.f32 %v1754_v41, %v512_v47  ;;  %v790_v15 = vmul.f32 %v2251_v25, %v2251_v25  ;;  %v510_v16 = vsel %vm2262_vm4, %v2211_v7, %v506_v55  ;;  %v765_v52 = vmul.f32 %v764_v4, %v2235_v20  ;;  %vm519_vm7 = vmor %vm517_vm6, %vm518_vm5 }
 0x22c   :  { %1643 = vmatmul.msk.bf16.gmra.mxu1 %vm112_vm0, %v621_v59  ;;  %v571_v49 = vmul.f32 %v510_v16, %v2128_v54  ;;  %v1709_v54 = vld [vmem:[%s2877_s8 + $0x10] sm:$0xff]  ;;  %vm527_vm9 = vweird.f32 %v2240_v19 }
 0x22d   :  { %v514_v0 = vmul.f32 0.5, %v513_v56  ;;  %v362_v3 = vpop.xlane.xlu2 %361  ;;  %v2289_v38 = vmin.f32 %v790_v15, 16.0  ;;  %v766_v9 = vadd.f32 0.014752088, %v765_v52  ;;  %v754_v56 = vmul.f32 %v753_v61, %v2235_v20  ;;  %1503 = vmatpush.bf16.msra.mxu2 %v1709_v54  ;;  %1720 = vmatpush.bf16.msra.mxu3 %v1709_v54 }
 0x22e   :  { %v382_v8 = vmul.f32 %v362_v3, %v1953_v53  ;;  %v683_v2 = vpop.f32.mrf.mxu1 }
 0x22f   :  { %v515_v37 = vsub.f32 1.5, %v514_v0  ;;  %v2274_v28 = vadd.f32 %v2204_v58, %v683_v2  ;;  %v767_v55 = vmul.f32 %v766_v9, %v2235_v20  ;;  %v591_v0 = vmul.f32 %v2109_v21, %v571_v49  ;;  %v1707_v49 = vld [vmem:[%s2877_s8] sm:$0xff] }
 0x230   :  { %v2277_v51 = vpop.eup %1755  ;;  %v2279_v57 = vadd.f32 1e-05, %v382_v8  ;;  %v755_v2 = vadd.f32 0.0036580483, %v754_v56  ;;  %v803_v61 = vmul.f32 3.8918573e-05, %v2289_v38 }
 0x231   :  { %v516_v35 = vmul.f32 %v1754_v41, %v515_v37  ;;  %v522_v7 = vmul.f32 %v2277_v51, %v2240_v19  ;;  %v2294_v45 = vmul.f32 0.70710677, %v2274_v28  ;;  %v768_v8 = vadd.f32 0.112945676, %v767_v55  ;;  %1504 = vmatpush.bf16.msra.mxu2 %v1708_v62  ;;  %1721 = vmatpush.bf16.msra.mxu3 %v1708_v62 }
 0x232   :  { %1757 = vrsqrt.f32 %v2279_v57  ;;  %vm528_vm8 = vweird.f32 %v2277_v51  ;;  %v756_v54 = vmul.f32 %v755_v2, %v2235_v20  ;;  %vm537_vm12 = vweird.f32 %v2279_v57 }
 0x233   :  { %v520_v14 = vsel %vm519_vm7, %v1754_v41, %v516_v35  ;;  %v523_v43 = vmul.f32 %v2277_v51, %v522_v7  ;;  %v830_v41 = vmul.f32 %v2294_v45, %v2294_v45  ;;  %v611_v35 = vadd.f32 %v2122_v31, %v591_v0  ;;  %vm2328_vm10 = vmor %vm527_vm9, %vm528_vm8 }
 0x234   :  { %v572_v47 = vmul.f32 %v520_v14, %v2141_v26  ;;  %v792_v26 = vmul.f32 2.1237322e-06, %v2289_v38  ;;  %v757_v2 = vadd.f32 0.05243302, %v756_v54 }
 0x235   :  { %v524_v32 = vmul.f32 0.5, %v523_v43  ;;  %v2317_v37 = vmin.f32 %v830_v41, 16.0  ;;  %1505 = vmatpush.bf16.msra.mxu2 %v1707_v49  ;;  %1722 = vmatpush.bf16.msra.mxu3 %v1707_v49 }
 0x236   :  { %v685_v59 = vpop.f32.mrf.mxu1  ;;  %v592_v63 = vmul.f32 %v2109_v21, %v572_v47  ;;  %v793_v52 = vadd.f32 0.00028619796, %v792_v26  ;;  %v769_v47 = vmul.f32 %v768_v8, %v2235_v20 }
 0x237   :  { %v525_v42 = vsub.f32 1.5, %v524_v32  ;;  %v2308_v4 = vadd.f32 %v2204_v58, %v685_v59  ;;  %v832_v32 = vmul.f32 2.1237322e-06, %v2317_v37 }
 0x238   :  { %v1758_v3 = vpop.eup %1757  ;;  %v612_v15 = vadd.f32 %v2122_v31, %v592_v63  ;;  %v770_v63 = vadd.f32 0.4994258, %v769_v47 }
 0x239   :  { %v532_v50 = vmul.f32 %v1758_v3, %v2279_v57  ;;  %v526_v16 = vmul.f32 %v2277_v51, %v525_v42  ;;  %v2322_v7 = vmul.f32 0.70710677, %v2308_v4  ;;  %vm538_vm11 = vweird.f32 %v1758_v3 }
 0x23a   :  { %v622_v9 = vpack.c.bf16 %v612_v15, %v611_v35  ;;  %v794_v42 = vmul.f32 %v793_v52, %v2289_v38  ;;  %vm539_vm13 = vmor %vm537_vm12, %vm538_vm11  ;;  %v771_v8 = vmul.f32 %v770_v63, %v2235_v20 }
 0x23b   :  { %v533_v33 = vmul.f32 %v1758_v3, %v532_v50  ;;  %v530_v19 = vsel %vm2328_vm10, %v2277_v51, %v526_v16  ;;  %v870_v55 = vmul.f32 %v2322_v7, %v2322_v7  ;;  %v804_v51 = vadd.f32 0.001143296, %v803_v61 }
 0x23c   :  { %1644 = vmatmul.msk.bf16.gmra.mxu1 %vm112_vm0, %v622_v9  ;;  %v573_v0 = vmul.f32 %v530_v19, %v2151_v46  ;;  %v833_v50 = vadd.f32 0.00028619796, %v832_v32  ;;  %v795_v52 = vadd.f32 0.0036580483, %v794_v42  ;;  %v2355_v49 = vadd.f32 1.0, %v771_v8 }
 0x23d   :  { %v534_v43 = vmul.f32 0.5, %v533_v33  ;;  %v2345_v26 = vmin.f32 %v870_v55, 16.0  ;;  %v805_v46 = vmul.f32 %v804_v51, %v2289_v38 }
 0x23e   :  { %v688_v56 = vpop.f32.mrf.mxu1  ;;  %v593_v57 = vmul.f32 %v2109_v21, %v573_v0  ;;  %v834_v14 = vmul.f32 %v833_v50, %v2317_v37  ;;  %1759 = vrcp.f32 %v2355_v49  ;;  %v796_v54 = vmul.f32 %v795_v52, %v2289_v38 }
 0x23f   :  { %v535_v41 = vsub.f32 1.5, %v534_v43  ;;  %v2342_v59 = vadd.f32 %v2204_v58, %v688_v56  ;;  %v872_v15 = vmul.f32 2.1237322e-06, %v2345_v26  ;;  %v806_v32 = vadd.f32 0.014752088, %v805_v46 }
 0x240   :  { %v613_v56 = vadd.f32 %v2122_v31, %v593_v57  ;;  %v843_v52 = vmul.f32 3.8918573e-05, %v2317_v37  ;;  %v883_v57 = vmul.f32 3.8918573e-05, %v2345_v26  ;;  %vm778_vm15 = vweird.f32 %v2355_v49 }
 0x241   :  { %v536_v62 = vmul.f32 %v1758_v3, %v535_v41  ;;  %v2352_v33 = vmul.f32 0.70710677, %v2342_v59  ;;  %v873_v61 = vadd.f32 0.00028619796, %v872_v15  ;;  %v807_v50 = vmul.f32 %v806_v32, %v2289_v38 }
 0x243   :  { %v540_v16 = vsel %vm539_vm13, %v1758_v3, %v536_v62  ;;  %v758_v3 = vmul.f32 %v757_v2, %v2235_v20  ;;  %v910_v47 = vmul.f32 %v2352_v33, %v2352_v33  ;;  %v874_v55 = vmul.f32 %v873_v61, %v2345_v26 }
 0x244   :  { %v574_v35 = vmul.f32 %v540_v16, %v2162_v11  ;;  %v2377_v0 = vpop.eup %1759  ;;  %v797_v62 = vadd.f32 0.05243302, %v796_v54  ;;  %v808_v16 = vadd.f32 0.112945676, %v807_v50  ;;  %v884_v54 = vadd.f32 0.001143296, %v883_v57 }
 0x245   :  { %v759_v63 = vadd.f32 0.18741608, %v758_v3  ;;  %v2375_v42 = vmin.f32 %v910_v47, 16.0  ;;  %v875_v15 = vadd.f32 0.0036580483, %v874_v55  ;;  %vm779_vm14 = vweird.f32 %v2377_v0 }
 0x246   :  { %v690_v43 = vpop.f32.mrf.mxu1  ;;  %v594_v9 = vmul.f32 %v2109_v21, %v574_v35  ;;  %v835_v21 = vadd.f32 0.0036580483, %v834_v14  ;;  %v798_v14 = vmul.f32 %v797_v62, %v2289_v38  ;;  %vm2415_vm1 = vmor %vm778_vm15, %vm779_vm14 }
 0x247   :  { %v2366_v11 = vadd.f32 %v2204_v58, %v690_v43  ;;  %v760_v35 = vmul.f32 %v759_v63, %v2235_v20  ;;  %v912_v46 = vmul.f32 2.1237322e-06, %v2375_v42  ;;  %v809_v43 = vmul.f32 %v808_v16, %v2289_v38 }
 0x248   :  { %v614_v19 = vadd.f32 %v2122_v31, %v594_v9  ;;  %v774_v31 = vmul.f32 %v2377_v0, %v2355_v49  ;;  %v836_v2 = vmul.f32 %v835_v21, %v2317_v37  ;;  %v844_v9 = vadd.f32 0.001143296, %v843_v52 }
 0x249   :  { %v2373_v41 = vmul.f32 0.70710677, %v2366_v11  ;;  %v876_v3 = vmul.f32 %v875_v15, %v2345_v26  ;;  %v810_v55 = vadd.f32 0.4994258, %v809_v43  ;;  %v761_v21 = vadd.f32 1.1283791, %v760_v35 }
 0x24a   :  { %v623_v51 = vpack.c.bf16 %v614_v19, %v613_v56  ;;  %v775_v61 = vsub.f32 1.0, %v774_v31  ;;  %v923_v19 = vmul.f32 3.8918573e-05, %v2375_v42  ;;  %v837_v20 = vadd.f32 0.05243302, %v836_v2 }
 0x24b   :  { %v950_v8 = vmul.f32 %v2373_v41, %v2373_v41  ;;  %v845_v56 = vmul.f32 %v844_v9, %v2317_v37  ;;  %v913_v63 = vadd.f32 0.00028619796, %v912_v46  ;;  %v799_v62 = vadd.f32 0.18741608, %v798_v14 }
 0x24c   :  { %1645 = vmatmul.msk.bf16.gmra.mxu1 %vm112_vm0, %v623_v51  ;;  %v776_v32 = vmul.f32 %v2377_v0, %v775_v61  ;;  %v885_v51 = vmul.f32 %v884_v54, %v2345_v26  ;;  %v811_v50 = vmul.f32 %v810_v55, %v2289_v38  ;;  %v924_v15 = vadd.f32 0.001143296, %v923_v19 }
 0x24d   :  { %v2393_v47 = vmin.f32 %v950_v8, 16.0  ;;  %v846_v31 = vadd.f32 0.014752088, %v845_v56  ;;  %v877_v8 = vadd.f32 0.05243302, %v876_v3  ;;  %v838_v2 = vmul.f32 %v837_v20, %v2317_v37 }
 0x24e   :  { %v886_v52 = vadd.f32 0.014752088, %v885_v51  ;;  %v777_v61 = vadd.f32 %v2377_v0, %v776_v32  ;;  %v2404_v57 = vadd.f32 1.0, %v811_v50  ;;  %v914_v35 = vmul.f32 %v913_v63, %v2375_v42 }
 0x24f   :  { %v952_v16 = vmul.f32 2.1237322e-06, %v2393_v47  ;;  %v784_v46 = vand.u32 2147483648, %v2355_v49  ;;  %v847_v14 = vmul.f32 %v846_v31, %v2317_v37  ;;  %v782_v9 = vand.u32 2147483647, %v2355_v49 }
 0x250   :  { %v887_v43 = vmul.f32 %v886_v52, %v2345_v26  ;;  %1761 = vrcp.f32 %v2404_v57  ;;  %v925_v3 = vmul.f32 %v924_v15, %v2375_v42  ;;  %v878_v54 = vmul.f32 %v877_v8, %v2345_v26 }
 0x251   :  { %v953_v19 = vadd.f32 0.00028619796, %v952_v16  ;;  %v848_v32 = vadd.f32 0.112945676, %v847_v14  ;;  %v762_v55 = vmul.f32 %v761_v21, %v2223_v22  ;;  %v800_v56 = vmul.f32 %v799_v62, %v2289_v38 }
 0x252   :  { %v781_v49 = vsel %vm2415_vm1, %v2377_v0, %v777_v61  ;;  %v888_v63 = vadd.f32 0.112945676, %v887_v43  ;;  %v839_v51 = vadd.f32 0.18741608, %v838_v2  ;;  %v915_v50 = vadd.f32 0.0036580483, %v914_v35 }
 0x253   :  { %v785_v31 = vor.u32 1.1754944e-38, %v784_v46  ;;  %v849_v15 = vmul.f32 %v848_v32, %v2317_v37  ;;  %vm783_vm2 = vcmp.eq.f32.partialorder %v782_v9, 8.507059e+37  ;;  %v926_v16 = vadd.f32 0.014752088, %v925_v3 }
 0x254   :  { %v889_v8 = vmul.f32 %v888_v63, %v2345_v26  ;;  %v963_v52 = vmul.f32 3.8918573e-05, %v2393_v47  ;;  %v879_v14 = vadd.f32 0.18741608, %v878_v54  ;;  %v954_v22 = vmul.f32 %v953_v19, %v2393_v47 }
 0x255   :  { %v786_v38 = vsel %vm783_vm2, %v785_v31, %v781_v49  ;;  %v850_v21 = vadd.f32 0.4994258, %v849_v15  ;;  %v801_v20 = vadd.f32 1.1283791, %v800_v56  ;;  %v927_v2 = vmul.f32 %v926_v16, %v2375_v42 }
 0x256   :  { %v1762_v62 = vpop.eup %1761  ;;  %v890_v0 = vadd.f32 0.4994258, %v889_v8  ;;  %v964_v61 = vadd.f32 0.001143296, %v963_v52  ;;  %v840_v35 = vmul.f32 %v839_v51, %v2317_v37  ;;  %v916_v46 = vmul.f32 %v915_v50, %v2375_v42 }
 0x257   :  { %v814_v43 = vmul.f32 %v1762_v62, %v2404_v57  ;;  %v851_v9 = vmul.f32 %v850_v21, %v2317_v37  ;;  %v787_v3 = vmul.f32 %v786_v38, %v762_v55  ;;  %v928_v19 = vadd.f32 0.112945676, %v927_v2  ;;  %v365_v38 = vpop.xlane.xlu0 %364 }
 0x258   :  { %v891_v54 = vmul.f32 %v890_v0, %v2345_v26  ;;  %v965_v32 = vmul.f32 %v964_v61, %v2393_v47  ;;  %v880_v56 = vmul.f32 %v879_v14, %v2345_v26  ;;  %v955_v49 = vadd.f32 0.0036580483, %v954_v22 }
 0x259   :  { %v815_v63 = vsub.f32 1.0, %v814_v43  ;;  %v2436_v31 = vadd.f32 1.0, %v851_v9  ;;  %v824_v51 = vand.u32 2147483648, %v2404_v57  ;;  %v929_v50 = vmul.f32 %v928_v19, %v2375_v42 }
 0x25a   :  { %v2439_v15 = vadd.f32 1.0, %v891_v54  ;;  %v966_v8 = vadd.f32 0.014752088, %v965_v32  ;;  %vm819_vm3 = vweird.f32 %v1762_v62  ;;  %v822_v55 = vand.u32 2147483647, %v2404_v57 }
 0x25b   :  { %v816_v37 = vmul.f32 %v1762_v62, %v815_v63  ;;  %1763 = vrcp.f32 %v2436_v31  ;;  %v718_v16 = vmul.f32 0.5, %v2209_v6  ;;  %v1647_v26 = vclamps-f32 %v787_v3, 1.0 }
 0x25c   :  { %1765 = vrcp.f32 %v2439_v15  ;;  %v802_v52 = vmul.f32 %v801_v20, %v2251_v25  ;;  %v841_v14 = vadd.f32 1.1283791, %v840_v35  ;;  %vm818_vm4 = vweird.f32 %v2404_v57 }
 0x25d   :  { %v817_v22 = vadd.f32 %v1762_v62, %v816_v37  ;;  %v917_v21 = vadd.f32 0.05243302, %v916_v46  ;;  %vm820_vm5 = vmor %vm818_vm4, %vm819_vm3  ;;  %v825_v0 = vor.u32 1.1754944e-38, %v824_v51  ;;  %v930_v2 = vadd.f32 0.4994258, %v929_v50 }
 0x25e   :  { %v967_v61 = vmul.f32 %v966_v8, %v2393_v47  ;;  %v881_v43 = vadd.f32 1.1283791, %v880_v56  ;;  %v956_v9 = vmul.f32 %v955_v49, %v2393_v47  ;;  %vm823_vm6 = vcmp.eq.f32.partialorder %v822_v55, 8.507059e+37 }
 0x25f   :  { %v821_v6 = vsel %vm820_vm5, %v1762_v62, %v817_v22  ;;  %v1390_v54 = vadd.f32 1.0, %v1647_v26  ;;  %v931_v25 = vmul.f32 %v930_v2, %v2375_v42  ;;  %v719_v57 = vmul.f32 0.5, %v2238_v40 }
 0x260   :  { %v826_v3 = vsel %vm823_vm6, %v825_v0, %v821_v6  ;;  %v968_v20 = vadd.f32 0.112945676, %v967_v61  ;;  %v842_v46 = vmul.f32 %v841_v14, %v2294_v45  ;;  %v383_v19 = vmul.f32 %v365_v38, %v1953_v53 }
 0x261   :  { %v1764_v35 = vpop.eup %1763  ;;  %v827_v32 = vmul.f32 %v826_v3, %v802_v52  ;;  %v918_v56 = vmul.f32 %v917_v21, %v2375_v42  ;;  %v2456_v62 = vadd.f32 1.0, %v931_v25  ;;  %v882_v50 = vmul.f32 %v881_v43, %v2322_v7 }
 0x262   :  { %v1766_v63 = vpop.eup %1765  ;;  %v854_v49 = vmul.f32 %v1764_v35, %v2436_v31  ;;  %v969_v51 = vmul.f32 %v968_v20, %v2393_v47  ;;  %v957_v8 = vadd.f32 0.05243302, %v956_v9  ;;  %v1406_v55 = vmul.f32 %v1390_v54, %v718_v16 }
 0x263   :  { %v1648_v37 = vclamps-f32 %v827_v32, 1.0  ;;  %v894_v40 = vmul.f32 %v1766_v63, %v2439_v15  ;;  %v862_v26 = vand.u32 2147483647, %v2436_v31  ;;  %1767 = vrcp.f32 %v2456_v62 }
 0x264   :  { %v855_v45 = vsub.f32 1.0, %v854_v49  ;;  %v864_v14 = vand.u32 2147483648, %v2436_v31  ;;  %v970_v38 = vadd.f32 0.4994258, %v969_v51  ;;  %vm859_vm7 = vweird.f32 %v1764_v35 }
 0x265   :  { %v1391_v52 = vadd.f32 1.0, %v1648_v37  ;;  %v895_v22 = vsub.f32 1.0, %v894_v40  ;;  %v902_v0 = vand.u32 2147483647, %v2439_v15  ;;  %v904_v7 = vand.u32 2147483648, %v2439_v15 }
 0x266   :  { %v856_v21 = vmul.f32 %v1764_v35, %v855_v45  ;;  %vm899_vm8 = vweird.f32 %v1766_v63  ;;  %v971_v16 = vmul.f32 %v970_v38, %v2393_v47  ;;  %v919_v43 = vadd.f32 0.18741608, %v918_v56 }
 0x267   :  { %v1407_v2 = vmul.f32 %v1391_v52, %v719_v57  ;;  %v896_v61 = vmul.f32 %v1766_v63, %v895_v22  ;;  %vm858_vm9 = vweird.f32 %v2436_v31  ;;  %vm898_vm10 = vweird.f32 %v2439_v15 }
 0x268   :  { %v857_v9 = vadd.f32 %v1764_v35, %v856_v21  ;;  %vm860_vm11 = vmor %vm858_vm9, %vm859_vm7  ;;  %v865_v3 = vor.u32 1.1754944e-38, %v864_v14  ;;  %v2469_v25 = vadd.f32 1.0, %v971_v16  ;;  %v958_v32 = vmul.f32 %v957_v8, %v2393_v47 }
 0x269   :  { %v1422_v6 = vpack.c.bf16 %v1407_v2, %v1406_v55  ;;  %v897_v54 = vadd.f32 %v1766_v63, %v896_v61  ;;  %v1768_v20 = vpop.eup %1767  ;;  %vm863_vm12 = vcmp.eq.f32.partialorder %v862_v26, 8.507059e+37  ;;  %vm900_vm13 = vmor %vm898_vm10, %vm899_vm8  ;;  %v905_v49 = vor.u32 1.1754944e-38, %v904_v7 }
 0x26a   :  { %v861_v57 = vsel %vm860_vm11, %v1764_v35, %v857_v9  ;;  %vm903_vm14 = vcmp.eq.f32.partialorder %v902_v0, 8.507059e+37  ;;  %v934_v31 = vmul.f32 %v1768_v20, %v2456_v62  ;;  %1769 = vrcp.f32 %v2469_v25 }
 0x26b   :  { %1506 = vmatmul.bf16.vlgmr.msra.gmra.mxu2 %v1422_v6  ;;  %v866_v56 = vsel %vm863_vm12, %v865_v3, %v861_v57  ;;  %v901_v51 = vsel %vm900_vm13, %v1766_v63, %v897_v54  ;;  %v920_v45 = vmul.f32 %v919_v43, %v2375_v42  ;;  %v959_v8 = vadd.f32 0.18741608, %v958_v32 }
 0x26c   :  { %v867_v15 = vmul.f32 %v866_v56, %v842_v46  ;;  %v906_v37 = vsel %vm903_vm14, %v905_v49, %v901_v51  ;;  %v935_v55 = vsub.f32 1.0, %v934_v31  ;;  %v2476_v26 = vadd.f32 1e-05, %v383_v19 }
 0x26d   :  { %v907_v40 = vmul.f32 %v906_v37, %v882_v50  ;;  %vm939_vm15 = vweird.f32 %v1768_v20  ;;  %v721_v63 = vmul.f32 0.5, %v2308_v4  ;;  %vm938_vm1 = vweird.f32 %v2456_v62 }
 0x26e   :  { %v1649_v35 = vclamps-f32 %v867_v15, 1.0  ;;  %v936_v14 = vmul.f32 %v1768_v20, %v935_v55  ;;  %v944_v46 = vand.u32 2147483648, %v2456_v62  ;;  %v942_v50 = vand.u32 2147483647, %v2456_v62  ;;  %vm940_vm2 = vmor %vm938_vm1, %vm939_vm15 }
 0x26f   :  { %v1650_v52 = vclamps-f32 %v907_v40, 1.0  ;;  %v720_v42 = vmul.f32 0.5, %v2274_v28  ;;  %v921_v7 = vadd.f32 1.1283791, %v920_v45  ;;  %v960_v19 = vmul.f32 %v959_v8, %v2393_v47 }
 0x270   :  { %v1392_v22 = vadd.f32 1.0, %v1649_v35  ;;  %v937_v21 = vadd.f32 %v1768_v20, %v936_v14  ;;  %v1770_v0 = vpop.eup %1769  ;;  %1771 = vrsqrt.f32 %v2476_v26  ;;  %v945_v16 = vor.u32 1.1754944e-38, %v944_v46 }
 0x271   :  { %v1393_v38 = vadd.f32 1.0, %v1650_v52  ;;  %v974_v61 = vmul.f32 %v1770_v0, %v2469_v25  ;;  %vm943_vm3 = vcmp.eq.f32.partialorder %v942_v50, 8.507059e+37  ;;  %v922_v6 = vmul.f32 %v921_v7, %v2352_v33 }
 0x272   :  { %v941_v4 = vsel %vm940_vm2, %v1768_v20, %v937_v21  ;;  %v1408_v43 = vmul.f32 %v1392_v22, %v720_v42  ;;  %v961_v62 = vadd.f32 1.1283791, %v960_v19  ;;  %v984_v28 = vand.u32 2147483648, %v2469_v25 }
 0x273   :  { %v1409_v2 = vmul.f32 %v1393_v38, %v721_v63  ;;  %v975_v9 = vsub.f32 1.0, %v974_v61  ;;  %v946_v3 = vsel %vm943_vm3, %v945_v16, %v941_v4  ;;  %vm979_vm4 = vweird.f32 %v1770_v0 }
 0x274   :  { %v982_v47 = vand.u32 2147483647, %v2469_v25  ;;  %v947_v49 = vmul.f32 %v946_v3, %v922_v6  ;;  %vm978_vm5 = vweird.f32 %v2469_v25  ;;  %v985_v56 = vor.u32 1.1754944e-38, %v984_v28 }
 0x275   :  { %v1423_v54 = vpack.c.bf16 %v1409_v2, %v1408_v43  ;;  %v976_v32 = vmul.f32 %v1770_v0, %v975_v9  ;;  %vm980_vm6 = vmor %vm978_vm5, %vm979_vm4  ;;  %v962_v51 = vmul.f32 %v961_v62, %v2373_v41  ;;  %v723_v35 = vmul.f32 0.5, %v2366_v11  ;;  %v1795_v62 = vld [vmem:[%s2873_s4] ss:$0 sm:$0xff] }
 0x276   :  { %v1772_v57 = vpop.eup %1771  ;;  %vm983_vm7 = vcmp.eq.f32.partialorder %v982_v47, 8.507059e+37  ;;  %v1651_v37 = vclamps-f32 %v947_v49, 1.0  ;;  %v722_v63 = vmul.f32 0.5, %v2342_v59  ;;  %vm547_vm9 = vweird.f32 %v2476_v26 }
 0x277   :  { %v977_v20 = vadd.f32 %v1770_v0, %v976_v32  ;;  %v542_v31 = vmul.f32 %v1772_v57, %v2476_v26  ;;  %vm548_vm8 = vweird.f32 %v1772_v57 }
 0x278   :  { %v1394_v52 = vadd.f32 1.0, %v1651_v37  ;;  %vm549_vm10 = vmor %vm547_vm9, %vm548_vm8 }
 0x279   :  { %v981_v33 = vsel %vm980_vm6, %v1770_v0, %v977_v20  ;;  %v543_v45 = vmul.f32 %v1772_v57, %v542_v31 }
 0x27a   :  { %v986_v15 = vsel %vm983_vm7, %v985_v56, %v981_v33  ;;  %v1410_v38 = vmul.f32 %v1394_v52, %v722_v63 }
 0x27b   :  { %1511 = vmatmul.bf16.gmra.mxu2 %v1423_v54  ;;  %v987_v40 = vmul.f32 %v986_v15, %v962_v51  ;;  %v544_v22 = vmul.f32 0.5, %v543_v45 }
 0x27d   :  { %v1652_v55 = vclamps-f32 %v987_v40, 1.0  ;;  %v545_v50 = vsub.f32 1.5, %v544_v22 }
 0x27f   :  { %v1395_v14 = vadd.f32 1.0, %v1652_v55  ;;  %v546_v42 = vmul.f32 %v1772_v57, %v545_v50 }
 0x281   :  { %v1411_v41 = vmul.f32 %v1395_v14, %v723_v35  ;;  %v550_v19 = vsel %vm549_vm10, %v1772_v57, %v546_v42 }
 0x282   :  { %v575_v61 = vmul.f32 %v550_v19, %v2172_v30 }
 0x283   :  { %v1424_v21 = vpack.c.bf16 %v1411_v41, %v1410_v38 }
 0x284   :  { %v595_v3 = vmul.f32 %v1795_v62, %v575_v61 }
 0x288   :  { %v368_v8 = vpop.xlane.xlu1 %367 }
 0x289   :  { %v384_v25 = vmul.f32 %v368_v8, %v1953_v53 }
 0x28b   :  { %v400_v46 = vadd.f32 1e-05, %v384_v25  ;;  %1516 = vmatmul.bf16.gmra.mxu2 %v1424_v21 }
 0x28d   :  { %1773 = vrsqrt.f32 %v400_v46  ;;  %vm557_vm12 = vweird.f32 %v400_v46 }
 0x293   :  { %v1774_v0 = vpop.eup %1773 }
 0x294   :  { %v552_v7 = vmul.f32 %v1774_v0, %v400_v46  ;;  %vm558_vm11 = vweird.f32 %v1774_v0 }
 0x295   :  { %vm559_vm13 = vmor %vm557_vm12, %vm558_vm11 }
 0x296   :  { %v553_v11 = vmul.f32 %v1774_v0, %v552_v7 }
 0x298   :  { %v554_v53 = vmul.f32 0.5, %v553_v11 }
 0x299   :  { %v693_v2 = vpop.f32.mrf.mxu1 }
 0x29a   :  { %v555_v59 = vsub.f32 1.5, %v554_v53  ;;  %v2497_v4 = vadd.f32 %v2204_v58, %v693_v2 }
 0x29c   :  { %v556_v16 = vmul.f32 %v1774_v0, %v555_v59  ;;  %v2501_v43 = vmul.f32 0.70710677, %v2497_v4 }
 0x29e   :  { %v560_v9 = vsel %vm559_vm13, %v1774_v0, %v556_v16  ;;  %v990_v26 = vmul.f32 %v2501_v43, %v2501_v43 }
 0x29f   :  { %v576_v6 = vmul.f32 %v560_v9, %v2187_v27  ;;  %v1796_v27 = vld [vmem:[%s2874_s5] ss:$0 sm:$0xff] }
 0x2a0   :  { %v2509_v28 = vmin.f32 %v990_v26, 16.0  ;;  %v615_v49 = vadd.f32 %v1796_v27, %v595_v3 }
 0x2a1   :  { %v695_v30 = vpop.f32.mrf.mxu1  ;;  %v596_v54 = vmul.f32 %v1795_v62, %v576_v6 }
 0x2a2   :  { %v992_v32 = vmul.f32 2.1237322e-06, %v2509_v28  ;;  %v2513_v47 = vadd.f32 %v2204_v58, %v695_v30  ;;  %v1003_v57 = vmul.f32 3.8918573e-05, %v2509_v28 }
 0x2a3   :  { %v616_v20 = vadd.f32 %v1796_v27, %v596_v54 }
 0x2a4   :  { %v993_v56 = vadd.f32 0.00028619796, %v992_v32  ;;  %v2520_v51 = vmul.f32 0.70710677, %v2513_v47  ;;  %v1004_v31 = vadd.f32 0.001143296, %v1003_v57 }
 0x2a5   :  { %v624_v33 = vpack.c.bf16 %v616_v20, %v615_v49 }
 0x2a6   :  { %v1030_v15 = vmul.f32 %v2520_v51, %v2520_v51  ;;  %v994_v37 = vmul.f32 %v993_v56, %v2509_v28  ;;  %v1005_v40 = vmul.f32 %v1004_v31, %v2509_v28 }
 0x2a7   :  { %1646 = vmatmul.msk.bf16.gmra.mxu1 %vm112_vm0, %v624_v33 }
 0x2a8   :  { %v2527_v55 = vmin.f32 %v1030_v15, 16.0  ;;  %v1006_v45 = vadd.f32 0.014752088, %v1005_v40  ;;  %v995_v14 = vadd.f32 0.0036580483, %v994_v37 }
 0x2a9   :  { %v698_v35 = vpop.f32.mrf.mxu1 }
 0x2aa   :  { %v1032_v8 = vmul.f32 2.1237322e-06, %v2527_v55  ;;  %v1043_v52 = vmul.f32 3.8918573e-05, %v2527_v55  ;;  %v2532_v25 = vadd.f32 %v2204_v58, %v698_v35  ;;  %v1007_v63 = vmul.f32 %v1006_v45, %v2509_v28 }
 0x2ab   :  { %v996_v0 = vmul.f32 %v995_v14, %v2509_v28 }
 0x2ac   :  { %v1033_v41 = vadd.f32 0.00028619796, %v1032_v8  ;;  %v1044_v46 = vadd.f32 0.001143296, %v1043_v52  ;;  %v2536_v22 = vmul.f32 0.70710677, %v2532_v25 }
 0x2ad   :  { %v1008_v38 = vadd.f32 0.112945676, %v1007_v63  ;;  %v997_v16 = vadd.f32 0.05243302, %v996_v0 }
 0x2ae   :  { %v1034_v21 = vmul.f32 %v1033_v41, %v2527_v55  ;;  %v1045_v50 = vmul.f32 %v1044_v46, %v2527_v55  ;;  %v1070_v42 = vmul.f32 %v2536_v22, %v2536_v22 }
 0x2af   :  { %v1009_v7 = vmul.f32 %v1008_v38, %v2509_v28  ;;  %v998_v49 = vmul.f32 %v997_v16, %v2509_v28 }
 0x2b0   :  { %v1035_v11 = vadd.f32 0.0036580483, %v1034_v21  ;;  %v1046_v19 = vadd.f32 0.014752088, %v1045_v50  ;;  %v2544_v53 = vmin.f32 %v1070_v42, 16.0 }
 0x2b1   :  { %v1010_v2 = vadd.f32 0.4994258, %v1009_v7  ;;  %v700_v59 = vpop.f32.mrf.mxu1  ;;  %v999_v45 = vadd.f32 0.18741608, %v998_v49 }
 0x2b2   :  { %v1047_v61 = vmul.f32 %v1046_v19, %v2527_v55  ;;  %v2548_v9 = vadd.f32 %v2204_v58, %v700_v59  ;;  %v1083_v6 = vmul.f32 3.8918573e-05, %v2544_v53  ;;  %v1036_v62 = vmul.f32 %v1035_v11, %v2527_v55 }
 0x2b3   :  { %v1011_v26 = vmul.f32 %v1010_v2, %v2509_v28  ;;  %v1072_v30 = vmul.f32 2.1237322e-06, %v2544_v53  ;;  %v1000_v11 = vmul.f32 %v999_v45, %v2509_v28 }
 0x2b4   :  { %v1048_v3 = vadd.f32 0.112945676, %v1047_v61  ;;  %v2555_v54 = vmul.f32 0.70710677, %v2548_v9  ;;  %v1084_v27 = vadd.f32 0.001143296, %v1083_v6 }
 0x2b5   :  { %v1012_v32 = vadd.f32 1.0, %v1011_v26  ;;  %v1037_v56 = vadd.f32 0.05243302, %v1036_v62  ;;  %v1073_v31 = vadd.f32 0.00028619796, %v1072_v30 }
 0x2b6   :  { %v1049_v57 = vmul.f32 %v1048_v3, %v2527_v55  ;;  %v1110_v20 = vmul.f32 %v2555_v54, %v2555_v54  ;;  %v1085_v33 = vmul.f32 %v1084_v27, %v2544_v53  ;;  %v1001_v3 = vadd.f32 1.1283791, %v1000_v11 }
 0x2b7   :  { %1775 = vrcp.f32 %v1012_v32  ;;  %v1038_v41 = vmul.f32 %v1037_v56, %v2527_v55  ;;  %v1074_v46 = vmul.f32 %v1073_v31, %v2544_v53  ;;  %vm1018_vm15 = vweird.f32 %v1012_v32 }
 0x2b8   :  { %v2562_v15 = vmin.f32 %v1110_v20, 16.0  ;;  %v1050_v37 = vadd.f32 0.4994258, %v1049_v57  ;;  %v1086_v40 = vadd.f32 0.014752088, %v1085_v33  ;;  %v1024_v28 = vand.u32 2147483648, %v1012_v32 }
 0x2b9   :  { %v703_v52 = vpop.f32.mrf.mxu1  ;;  %v1039_v59 = vadd.f32 0.18741608, %v1038_v41  ;;  %v1075_v61 = vadd.f32 0.0036580483, %v1074_v46  ;;  %v1022_v49 = vand.u32 2147483647, %v1012_v32 }
 0x2ba   :  { %v1112_v8 = vmul.f32 2.1237322e-06, %v2562_v15  ;;  %v1051_v35 = vmul.f32 %v1050_v37, %v2527_v55  ;;  %v1087_v14 = vmul.f32 %v1086_v40, %v2544_v53  ;;  %v2570_v38 = vadd.f32 %v2204_v58, %v703_v52 }
 0x2bb   :  { %v1123_v7 = vmul.f32 3.8918573e-05, %v2562_v15  ;;  %v1040_v56 = vmul.f32 %v1039_v59, %v2527_v55  ;;  %v1076_v40 = vmul.f32 %v1075_v61, %v2544_v53  ;;  %v1025_v52 = vor.u32 1.1754944e-38, %v1024_v28 }
 0x2bc   :  { %v2572_v21 = vadd.f32 1.0, %v1051_v35  ;;  %v1113_v50 = vadd.f32 0.00028619796, %v1112_v8  ;;  %v1088_v42 = vadd.f32 0.112945676, %v1087_v14  ;;  %v1002_v14 = vmul.f32 %v1001_v3, %v2501_v43 }
 0x2bd   :  { %v1776_v63 = vpop.eup %1775  ;;  %v2577_v19 = vmul.f32 0.70710677, %v2570_v38  ;;  %v1124_v62 = vadd.f32 0.001143296, %v1123_v7  ;;  %vm1023_vm2 = vcmp.eq.f32.partialorder %v1022_v49, 8.507059e+37 }
 0x2be   :  { %v1014_v0 = vmul.f32 %v1776_v63, %v1012_v32  ;;  %1777 = vrcp.f32 %v2572_v21  ;;  %vm1019_vm14 = vweird.f32 %v1776_v63  ;;  %v1114_v16 = vmul.f32 %v1113_v50, %v2562_v15  ;;  %v2599_v32 = vld [vmem:[%s2876_s7] ss:$0 sm:$0xff] }
 0x2bf   :  { %v1150_v58 = vmul.f32 %v2577_v19, %v2577_v19  ;;  %v1089_v6 = vmul.f32 %v1088_v42, %v2544_v53  ;;  %vm2587_vm1 = vmor %vm1018_vm15, %vm1019_vm14  ;;  %v1125_v31 = vmul.f32 %v1124_v62, %v2562_v15  ;;  %v1041_v50 = vadd.f32 1.1283791, %v1040_v56 }
 0x2c0   :  { %v1015_v2 = vsub.f32 1.0, %v1014_v0  ;;  %v1115_v45 = vadd.f32 0.0036580483, %v1114_v16  ;;  %v1077_v7 = vadd.f32 0.05243302, %v1076_v40  ;;  %v1064_v43 = vand.u32 2147483648, %v2572_v21 }
 0x2c1   :  { %v2584_v30 = vmin.f32 %v1150_v58, 16.0  ;;  %v705_v57 = vpop.f32.mrf.mxu1  ;;  %v1090_v20 = vadd.f32 0.4994258, %v1089_v6  ;;  %v1126_v42 = vadd.f32 0.014752088, %v1125_v31  ;;  %v1042_v3 = vmul.f32 %v1041_v50, %v2520_v51 }
 0x2c2   :  { %v1016_v26 = vmul.f32 %v1776_v63, %v1015_v2  ;;  %v2602_v55 = vadd.f32 %v2599_v32, %v705_v57  ;;  %v1116_v11 = vmul.f32 %v1115_v45, %v2562_v15  ;;  %v1062_v59 = vand.u32 2147483647, %v2572_v21 }
 0x2c3   :  { %v1091_v35 = vmul.f32 %v1090_v20, %v2544_v53  ;;  %v1152_v41 = vmul.f32 2.1237322e-06, %v2584_v30  ;;  %v1163_v58 = vmul.f32 3.8918573e-05, %v2584_v30  ;;  %v1127_v57 = vmul.f32 %v1126_v42, %v2562_v15 }
 0x2c4   :  { %v1017_v27 = vadd.f32 %v1776_v63, %v1016_v26  ;;  %v1778_v37 = vpop.eup %1777  ;;  %v2612_v61 = vmul.f32 0.70710677, %v2602_v55  ;;  %v1117_v49 = vadd.f32 0.05243302, %v1116_v11  ;;  %vm1058_vm4 = vweird.f32 %v2572_v21 }
 0x2c5   :  { %v1054_v46 = vmul.f32 %v1778_v37, %v2572_v21  ;;  %v2607_v0 = vadd.f32 1.0, %v1091_v35  ;;  %v1153_v16 = vadd.f32 0.00028619796, %v1152_v41  ;;  %vm1059_vm3 = vweird.f32 %v1778_v37 }
 0x2c6   :  { %v1021_v8 = vsel %vm2587_vm1, %v1776_v63, %v1017_v27  ;;  %v1078_v27 = vmul.f32 %v1077_v7, %v2544_v53  ;;  %v1190_v56 = vmul.f32 %v2612_v61, %v2612_v61  ;;  %vm1060_vm5 = vmor %vm1058_vm4, %vm1059_vm3  ;;  %v1065_v31 = vor.u32 1.1754944e-38, %v1064_v43 }
 0x2c7   :  { %v1026_v63 = vsel %vm1023_vm2, %v1025_v52, %v1021_v8  ;;  %v1055_v2 = vsub.f32 1.0, %v1054_v46  ;;  %1779 = vrcp.f32 %v2607_v0  ;;  %v1164_v51 = vadd.f32 0.001143296, %v1163_v58 }
 0x2c8   :  { %v1027_v6 = vmul.f32 %v1026_v63, %v1002_v14  ;;  %v1154_v40 = vmul.f32 %v1153_v16, %v2584_v30  ;;  %vm1063_vm6 = vcmp.eq.f32.partialorder %v1062_v59, 8.507059e+37  ;;  %v1128_v14 = vadd.f32 0.112945676, %v1127_v57 }
 0x2c9   :  { %v708_v26 = vpop.f32.mrf.mxu1  ;;  %v1056_v62 = vmul.f32 %v1778_v37, %v1055_v2  ;;  %v1079_v41 = vadd.f32 0.18741608, %v1078_v27  ;;  %v1118_v21 = vmul.f32 %v1117_v49, %v2562_v15  ;;  %v2635_v63 = vmin.f32 %v1190_v56, 16.0 }
 0x2ca   :  { %v2619_v28 = vadd.f32 %v2599_v32, %v708_v26  ;;  %v1653_v45 = vclamps-f32 %v1027_v6, 1.0  ;;  %v1129_v7 = vmul.f32 %v1128_v14, %v2562_v15  ;;  %v1155_v11 = vadd.f32 0.0036580483, %v1154_v40 }
 0x2cb   :  { %v1057_v20 = vadd.f32 %v1778_v37, %v1056_v62  ;;  %v724_v16 = vmul.f32 0.5, %v2497_v4  ;;  %v725_v26 = vmul.f32 0.5, %v2513_v47  ;;  %v1192_v56 = vmul.f32 2.1237322e-06, %v2635_v63 }
 0x2cc   :  { %v2627_v33 = vmul.f32 0.70710677, %v2619_v28  ;;  %v1396_v43 = vadd.f32 1.0, %v1653_v45  ;;  %v1130_v62 = vadd.f32 0.4994258, %v1129_v7  ;;  %v1156_v4 = vmul.f32 %v1155_v11, %v2584_v30 }
 0x2cd   :  { %v1061_v8 = vsel %vm1060_vm5, %v1778_v37, %v1057_v20  ;;  %v2630_v35 = vpop.eup %1779  ;;  %v1165_v37 = vmul.f32 %v1164_v51, %v2584_v30  ;;  %v1119_v20 = vadd.f32 0.18741608, %v1118_v21  ;;  %v1203_v14 = vmul.f32 3.8918573e-05, %v2635_v63 }
 0x2ce   :  { %v1066_v52 = vsel %vm1063_vm6, %v1065_v31, %v1061_v8  ;;  %v1094_v50 = vmul.f32 %v2630_v35, %v2607_v0  ;;  %v1230_v42 = vmul.f32 %v2627_v33, %v2627_v33  ;;  %v1131_v51 = vmul.f32 %v1130_v62, %v2562_v15 }
 0x2cf   :  { %v1067_v46 = vmul.f32 %v1066_v52, %v1042_v3  ;;  %v1080_v3 = vmul.f32 %v1079_v41, %v2544_v53  ;;  %v1166_v49 = vadd.f32 0.014752088, %v1165_v37  ;;  %v1412_v40 = vmul.f32 %v1396_v43, %v724_v16 }
 0x2d0   :  { %v1095_v58 = vsub.f32 1.0, %v1094_v50  ;;  %v2649_v31 = vmin.f32 %v1230_v42, 16.0  ;;  %v1104_v53 = vand.u32 2147483648, %v2607_v0  ;;  %v2657_v8 = vadd.f32 1.0, %v1131_v51 }
 0x2d1   :  { %v710_v2 = vpop.f32.mrf.mxu1  ;;  %v1654_v59 = vclamps-f32 %v1067_v46, 1.0  ;;  %v1167_v52 = vmul.f32 %v1166_v49, %v2584_v30  ;;  %vm1099_vm7 = vweird.f32 %v2630_v35  ;;  %v1193_v50 = vadd.f32 0.00028619796, %v1192_v56 }
 0x2d2   :  { %v2644_v6 = vadd.f32 %v2599_v32, %v710_v2  ;;  %v1096_v27 = vmul.f32 %v2630_v35, %v1095_v58  ;;  %v1232_v42 = vmul.f32 2.1237322e-06, %v2649_v31  ;;  %1781 = vrcp.f32 %v2657_v8 }
 0x2d3   :  { %v1397_v57 = vadd.f32 1.0, %v1654_v59  ;;  %vm1098_vm8 = vweird.f32 %v2607_v0  ;;  %v1102_v37 = vand.u32 2147483647, %v2607_v0  ;;  %v1081_v11 = vadd.f32 1.1283791, %v1080_v3 }
 0x2d4   :  { %v2654_v47 = vmul.f32 0.70710677, %v2644_v6  ;;  %v1097_v46 = vadd.f32 %v2630_v35, %v1096_v27  ;;  %vm1100_vm9 = vmor %vm1098_vm8, %vm1099_vm7  ;;  %v1168_v2 = vadd.f32 0.112945676, %v1167_v52  ;;  %v1204_v59 = vadd.f32 0.001143296, %v1203_v14 }
 0x2d5   :  { %v1413_v45 = vmul.f32 %v1397_v57, %v725_v26  ;;  %v1120_v43 = vmul.f32 %v1119_v20, %v2562_v15  ;;  %v1157_v58 = vadd.f32 0.05243302, %v1156_v4  ;;  %v1105_v26 = vor.u32 1.1754944e-38, %v1104_v53 }
 0x2d6   :  { %v1270_v41 = vmul.f32 %v2654_v47, %v2654_v47  ;;  %v1101_v16 = vsel %vm1100_vm9, %v2630_v35, %v1097_v46  ;;  %v1194_v62 = vmul.f32 %v1193_v50, %v2635_v63  ;;  %v1233_v57 = vadd.f32 0.00028619796, %v1232_v42 }
 0x2d7   :  { %v1425_v21 = vpack.c.bf16 %v1413_v45, %v1412_v40  ;;  %v1169_v27 = vmul.f32 %v1168_v2, %v2584_v30  ;;  %v1205_v49 = vmul.f32 %v1204_v59, %v2635_v63  ;;  %vm1103_vm10 = vcmp.eq.f32.partialorder %v1102_v37, 8.507059e+37 }
 0x2d8   :  { %v2667_v7 = vmin.f32 %v1270_v41, 16.0  ;;  %v1782_v0 = vpop.eup %1781  ;;  %v1106_v3 = vsel %vm1103_vm10, %v1105_v26, %v1101_v16  ;;  %v1243_v15 = vmul.f32 3.8918573e-05, %v2649_v31  ;;  %v1082_v20 = vmul.f32 %v1081_v11, %v2536_v22 }
 0x2d9   :  { %1521 = vmatmul.bf16.gmra.mxu2 %v1425_v21  ;;  %v1170_v51 = vadd.f32 0.4994258, %v1169_v27  ;;  %v1206_v40 = vadd.f32 0.014752088, %v1205_v49  ;;  %v1121_v35 = vadd.f32 1.1283791, %v1120_v43  ;;  %v1158_v4 = vmul.f32 %v1157_v58, %v2584_v30 }
 0x2da   :  { %v1272_v56 = vmul.f32 2.1237322e-06, %v2667_v7  ;;  %v1134_v45 = vmul.f32 %v1782_v0, %v2657_v8  ;;  %v1195_v53 = vadd.f32 0.0036580483, %v1194_v62  ;;  %v1234_v52 = vmul.f32 %v1233_v57, %v2649_v31 }
 0x2db   :  { %v1171_v14 = vmul.f32 %v1170_v51, %v2584_v30  ;;  %v1207_v41 = vmul.f32 %v1206_v40, %v2635_v63  ;;  %v1107_v46 = vmul.f32 %v1106_v3, %v1082_v20  ;;  %v1244_v42 = vadd.f32 0.001143296, %v1243_v15 }
 0x2dc   :  { %v1273_v21 = vadd.f32 0.00028619796, %v1272_v56  ;;  %v1135_v50 = vsub.f32 1.0, %v1134_v45  ;;  %v1144_v37 = vand.u32 2147483648, %v2657_v8  ;;  %v1283_v11 = vmul.f32 3.8918573e-05, %v2667_v7 }
 0x2dd   :  { %v2685_v2 = vadd.f32 1.0, %v1171_v14  ;;  %v1208_v22 = vadd.f32 0.112945676, %v1207_v41  ;;  %vm1139_vm11 = vweird.f32 %v1782_v0  ;;  %v1142_v43 = vand.u32 2147483647, %v2657_v8 }
 0x2de   :  { %v1136_v59 = vmul.f32 %v1782_v0, %v1135_v50  ;;  %v1245_v58 = vmul.f32 %v1244_v42, %v2649_v31  ;;  %v1122_v16 = vmul.f32 %v1121_v35, %v2555_v54  ;;  %v1196_v26 = vmul.f32 %v1195_v53, %v2635_v63 }
 0x2df   :  { %v1235_v62 = vadd.f32 0.0036580483, %v1234_v52  ;;  %1783 = vrcp.f32 %v2685_v2  ;;  %v1655_v57 = vclamps-f32 %v1107_v46, 1.0  ;;  %vm1138_vm12 = vweird.f32 %v2657_v8 }
 0x2e0   :  { %v1137_v27 = vadd.f32 %v1782_v0, %v1136_v59  ;;  %v1209_v49 = vmul.f32 %v1208_v22, %v2635_v63  ;;  %v1274_v56 = vmul.f32 %v1273_v21, %v2667_v7  ;;  %vm1140_vm13 = vmor %vm1138_vm12, %vm1139_vm11  ;;  %v1145_v3 = vor.u32 1.1754944e-38, %v1144_v37 }
 0x2e1   :  { %v1246_v51 = vadd.f32 0.014752088, %v1245_v58  ;;  %v1284_v40 = vadd.f32 0.001143296, %v1283_v11  ;;  %v1159_v15 = vadd.f32 0.18741608, %v1158_v4  ;;  %v1236_v8 = vmul.f32 %v1235_v62, %v2649_v31 }
 0x2e2   :  { %v1141_v20 = vsel %vm1140_vm13, %v1782_v0, %v1137_v27  ;;  %vm1143_vm14 = vcmp.eq.f32.partialorder %v1142_v43, 8.507059e+37  ;;  %v1210_v54 = vadd.f32 0.4994258, %v1209_v49  ;;  %v1197_v35 = vadd.f32 0.05243302, %v1196_v26 }
 0x2e3   :  { %v1146_v45 = vsel %vm1143_vm14, %v1145_v3, %v1141_v20  ;;  %v1247_v53 = vmul.f32 %v1246_v51, %v2649_v31  ;;  %v1285_v52 = vmul.f32 %v1284_v40, %v2667_v7  ;;  %v1398_v41 = vadd.f32 1.0, %v1655_v57 }
 0x2e4   :  { %v1147_v14 = vmul.f32 %v1146_v45, %v1122_v16  ;;  %v1211_v21 = vmul.f32 %v1210_v54, %v2635_v63  ;;  %v1275_v50 = vadd.f32 0.0036580483, %v1274_v56  ;;  %v726_v0 = vmul.f32 0.5, %v2532_v25  ;;  %v2715_v56 = vld [vmem:[%s2878_s9] ss:$0 sm:$0xff] }
 0x2e5   :  { %v1784_v46 = vpop.eup %1783  ;;  %v1248_v42 = vadd.f32 0.112945676, %v1247_v53  ;;  %v1286_v37 = vadd.f32 0.014752088, %v1285_v52  ;;  %v727_v4 = vmul.f32 0.5, %v2548_v9  ;;  %v1198_v59 = vmul.f32 %v1197_v35, %v2635_v63 }
 0x2e6   :  { %v1656_v22 = vclamps-f32 %v1147_v14, 1.0  ;;  %v1174_v11 = vmul.f32 %v1784_v46, %v2685_v2  ;;  %v2704_v43 = vadd.f32 1.0, %v1211_v21  ;;  %v1160_v26 = vmul.f32 %v1159_v15, %v2584_v30 }
 0x2e7   :  { %v1249_v58 = vmul.f32 %v1248_v42, %v2649_v31  ;;  %v1287_v16 = vmul.f32 %v1286_v37, %v2667_v7  ;;  %v1237_v62 = vadd.f32 0.05243302, %v1236_v8  ;;  %v1276_v25 = vmul.f32 %v1275_v50, %v2667_v7 }
 0x2e8   :  { %v1399_v57 = vadd.f32 1.0, %v1656_v22  ;;  %v1175_v27 = vsub.f32 1.0, %v1174_v11  ;;  %v1414_v49 = vmul.f32 %v1398_v41, %v726_v0  ;;  %v1184_v9 = vand.u32 2147483648, %v2685_v2 }
 0x2e9   :  { %1785 = vrcp.f32 %v2704_v43  ;;  %vm1179_vm15 = vweird.f32 %v1784_v46  ;;  %v1250_v40 = vadd.f32 0.4994258, %v1249_v58  ;;  %v1199_v30 = vadd.f32 0.18741608, %v1198_v59 }
 0x2ea   :  { %v1415_v3 = vmul.f32 %v1399_v57, %v727_v4  ;;  %v1176_v51 = vmul.f32 %v1784_v46, %v1175_v27  ;;  %v1182_v15 = vand.u32 2147483647, %v2685_v2  ;;  %v1288_v20 = vadd.f32 0.112945676, %v1287_v16 }
 0x2eb   :  { %vm1178_vm1 = vweird.f32 %v2685_v2  ;;  %v1251_v45 = vmul.f32 %v1250_v40, %v2649_v31  ;;  %v1161_v53 = vadd.f32 1.1283791, %v1160_v26  ;;  %v1238_v52 = vmul.f32 %v1237_v62, %v2649_v31 }
 0x2ec   :  { %v1426_v54 = vpack.c.bf16 %v1415_v3, %v1414_v49  ;;  %v1177_v35 = vadd.f32 %v1784_v46, %v1176_v51  ;;  %vm1180_vm2 = vmor %vm1178_vm1, %vm1179_vm15  ;;  %v1289_v8 = vmul.f32 %v1288_v20, %v2667_v7  ;;  %v1277_v14 = vadd.f32 0.05243302, %v1276_v25 }
 0x2ed   :  { %v1185_v50 = vor.u32 1.1754944e-38, %v1184_v9  ;;  %v2722_v42 = vadd.f32 1.0, %v1251_v45  ;;  %v1200_v0 = vmul.f32 %v1199_v30, %v2635_v63  ;;  %vm1183_vm3 = vcmp.eq.f32.partialorder %v1182_v15, 8.507059e+37 }
 0x2ee   :  { %v1507_v41 = vpop.f32.mrf.mxu2  ;;  %1526 = vmatmul.bf16.gmra.mxu2 %v1426_v54  ;;  %v1181_v21 = vsel %vm1180_vm2, %v1784_v46, %v1177_v35  ;;  %v1290_v4 = vadd.f32 0.4994258, %v1289_v8  ;;  %v1162_v59 = vmul.f32 %v1161_v53, %v2577_v19  ;;  %v1239_v58 = vadd.f32 0.18741608, %v1238_v52 }
 0x2ef   :  { %v1786_v37 = vpop.eup %1785  ;;  %v1508_v2 = vadd.f32 %v2715_v56, %v1507_v41  ;;  %v1186_v22 = vsel %vm1183_vm3, %v1185_v50, %v1181_v21  ;;  %1787 = vrcp.f32 %v2722_v42  ;;  %v1278_v16 = vmul.f32 %v1277_v14, %v2667_v7 }
 0x2f0   :  { %v1214_v11 = vmul.f32 %v1786_v37, %v2704_v43  ;;  %v1291_v62 = vmul.f32 %v1290_v4, %v2667_v7  ;;  %v1201_v63 = vadd.f32 1.1283791, %v1200_v0  ;;  %v1187_v57 = vmul.f32 %v1186_v22, %v1162_v59 }
 0x2f1   :  { %v1547_v46 = vadd.f32 %v1508_v2, %v1893_v12  ;;  %v1224_v27 = vand.u32 2147483648, %v2704_v43  ;;  %vm1219_vm4 = vweird.f32 %v1786_v37  ;;  %v1222_v19 = vand.u32 2147483647, %v2704_v43 }
 0x2f2   :  { %v1215_v26 = vsub.f32 1.0, %v1214_v11  ;;  %v2738_v49 = vadd.f32 1.0, %v1291_v62  ;;  %v1240_v12 = vmul.f32 %v1239_v58, %v2649_v31  ;;  %v1279_v3 = vadd.f32 0.18741608, %v1278_v16 }
 0x2f3   :  { %1563 = vst.msk [vmem:[%s2879_s10] sm:$0xff] %vm112_vm0, %v1547_v46  ;;  %vm1218_vm5 = vweird.f32 %v2704_v43  ;;  %v1657_v15 = vclamps-f32 %v1187_v57, 1.0  ;;  %v1225_v20 = vor.u32 1.1754944e-38, %v1224_v27  ;;  %v1202_v35 = vmul.f32 %v1201_v63, %v2612_v61 }
 0x2f4   :  { %v1216_v25 = vmul.f32 %v1786_v37, %v1215_v26  ;;  %1789 = vrcp.f32 %v2738_v49  ;;  %vm1220_vm6 = vmor %vm1218_vm5, %vm1219_vm4  ;;  %vm1223_vm7 = vcmp.eq.f32.partialorder %v1222_v19, 8.507059e+37  ;;  %v1241_v31 = vadd.f32 1.1283791, %v1240_v12 }
 0x2f5   :  { %v1788_v9 = vpop.eup %1787  ;;  %v1280_v43 = vmul.f32 %v1279_v3, %v2667_v7  ;;  %v1262_v41 = vand.u32 2147483647, %v2722_v42  ;;  %v1264_v21 = vand.u32 2147483648, %v2722_v42  ;;  %v1400_v61 = vadd.f32 1.0, %v1657_v15 }
 0x2f6   :  { %v1509_v51 = vpop.f32.mrf.mxu2  ;;  %v1217_v40 = vadd.f32 %v1786_v37, %v1216_v25  ;;  %v1254_v54 = vmul.f32 %v1788_v9, %v2722_v42  ;;  %vm1259_vm8 = vweird.f32 %v1788_v9  ;;  %v729_v0 = vmul.f32 0.5, %v2602_v55 }
 0x2f7   :  { %v1510_v30 = vadd.f32 %v2715_v56, %v1509_v51  ;;  %v1242_v7 = vmul.f32 %v1241_v31, %v2627_v33  ;;  %vm1258_vm9 = vweird.f32 %v2722_v42  ;;  %v1281_v11 = vadd.f32 1.1283791, %v1280_v43 }
 0x2f8   :  { %v1221_v45 = vsel %vm1220_vm6, %v1786_v37, %v1217_v40  ;;  %v1255_v8 = vsub.f32 1.0, %v1254_v54  ;;  %vm1260_vm10 = vmor %vm1258_vm9, %vm1259_vm8  ;;  %vm1263_vm11 = vcmp.eq.f32.partialorder %v1262_v41, 8.507059e+37  ;;  %v1265_v46 = vor.u32 1.1754944e-38, %v1264_v21 }
 0x2f9   :  { %v1548_v53 = vadd.f32 %v1510_v30, %v1901_v17  ;;  %v1226_v52 = vsel %vm1223_vm7, %v1225_v20, %v1221_v45  ;;  %v728_v17 = vmul.f32 0.5, %v2570_v38  ;;  %v1302_v33 = vand.u32 2147483647, %v2738_v49 }
 0x2fa   :  { %v1227_v14 = vmul.f32 %v1226_v52, %v1202_v35  ;;  %v1256_v50 = vmul.f32 %v1788_v9, %v1255_v8  ;;  %v1790_v37 = vpop.eup %1789  ;;  %v1304_v57 = vand.u32 2147483648, %v2738_v49  ;;  %vm1298_vm13 = vweird.f32 %v2738_v49 }
 0x2fb   :  { %1564 = vst.msk [vmem:[%s2879_s10 + $0x8] sm:$0xff] %vm112_vm0, %v1548_v53  ;;  %v1294_v22 = vmul.f32 %v1790_v37, %v2738_v49  ;;  %v1416_v26 = vmul.f32 %v1400_v61, %v728_v17  ;;  %vm1299_vm12 = vweird.f32 %v1790_v37  ;;  %v1282_v3 = vmul.f32 %v1281_v11, %v2654_v47 }
 0x2fc   :  { %v1658_v2 = vclamps-f32 %v1227_v14, 1.0  ;;  %v1257_v4 = vadd.f32 %v1788_v9, %v1256_v50  ;;  %vm1300_vm14 = vmor %vm1298_vm13, %vm1299_vm12  ;;  %vm1303_vm15 = vcmp.eq.f32.partialorder %v1302_v33, 8.507059e+37  ;;  %v730_v31 = vmul.f32 0.5, %v2619_v28 }
 0x2fd   :  { %v1295_v62 = vsub.f32 1.0, %v1294_v22  ;;  %v731_v49 = vmul.f32 0.5, %v2644_v6 }
 0x2fe   :  { %v1512_v59 = vpop.f32.mrf.mxu2  ;;  %v1401_v58 = vadd.f32 1.0, %v1658_v2  ;;  %v1261_v38 = vsel %vm1260_vm10, %v1788_v9, %v1257_v4  ;;  %v1305_v9 = vor.u32 1.1754944e-38, %v1304_v57 }
 0x2ff   :  { %v1513_v16 = vadd.f32 %v2715_v56, %v1512_v59  ;;  %v1266_v63 = vsel %vm1263_vm11, %v1265_v46, %v1261_v38  ;;  %v1296_v25 = vmul.f32 %v1790_v37, %v1295_v62 }
 0x300   :  { %v1417_v55 = vmul.f32 %v1401_v58, %v729_v0  ;;  %v1267_v27 = vmul.f32 %v1266_v63, %v1242_v7 }
 0x301   :  { %v1549_v42 = vadd.f32 %v1513_v16, %v1913_v23  ;;  %v1297_v12 = vadd.f32 %v1790_v37, %v1296_v25 }
 0x302   :  { %v1427_v19 = vpack.c.bf16 %v1417_v55, %v1416_v26  ;;  %v1659_v51 = vclamps-f32 %v1267_v27, 1.0 }
 0x303   :  { %1565 = vst.msk [vmem:[%s2879_s10 + $0x10] sm:$0xff] %vm112_vm0, %v1549_v42  ;;  %v1301_v40 = vsel %vm1300_vm14, %v1790_v37, %v1297_v12 }
 0x304   :  { %1531 = vmatmul.bf16.gmra.mxu2 %v1427_v19  ;;  %v1306_v30 = vsel %vm1303_vm15, %v1305_v9, %v1301_v40  ;;  %v1402_v45 = vadd.f32 1.0, %v1659_v51 }
 0x305   :  { %v1307_v20 = vmul.f32 %v1306_v30, %v1282_v3 }
 0x306   :  { %v1514_v23 = vpop.f32.mrf.mxu2  ;;  %v1418_v53 = vmul.f32 %v1402_v45, %v730_v31 }
 0x307   :  { %v1515_v15 = vadd.f32 %v2715_v56, %v1514_v23  ;;  %v1660_v35 = vclamps-f32 %v1307_v20, 1.0 }
 0x309   :  { %v1550_v54 = vadd.f32 %v1515_v15, %v1924_v29  ;;  %v1403_v47 = vadd.f32 1.0, %v1660_v35 }
 0x30b   :  { %1566 = vst.msk [vmem:[%s2879_s10 + $0x18] sm:$0xff] %vm112_vm0, %v1550_v54  ;;  %v1419_v52 = vmul.f32 %v1403_v47, %v731_v49 }
 0x30d   :  { %v1428_v14 = vpack.c.bf16 %v1419_v52, %v1418_v53 }
 0x30e   :  { %v1517_v8 = vpop.f32.mrf.mxu2 }
 0x30f   :  { %v1518_v43 = vadd.f32 %v2715_v56, %v1517_v8  ;;  %1536 = vmatmul.bf16.vlgmr.msra.gmra.mxu3 %v1428_v14 }
 0x311   :  { %v1551_v29 = vadd.f32 %v1518_v43, %v1933_v34 }
 0x313   :  { %1567 = vst.msk [vmem:[%s2879_s10 + $0x20] sm:$0xff] %vm112_vm0, %v1551_v29 }
 0x316   :  { %v1519_v28 = vpop.f32.mrf.mxu2 }
 0x317   :  { %v1520_v6 = vadd.f32 %v2715_v56, %v1519_v28 }
 0x319   :  { %v1552_v41 = vadd.f32 %v1520_v6, %v1941_v39 }
 0x31b   :  { %1568 = vst.msk [vmem:[%s2879_s10 + $0x28] sm:$0xff] %vm112_vm0, %v1552_v41 }
 0x324   :  { %v713_v21 = vpop.f32.mrf.mxu1 }
 0x325   :  { %v2790_v61 = vadd.f32 %v2599_v32, %v713_v21 }
 0x327   :  { %v2793_v34 = vmul.f32 0.70710677, %v2790_v61 }
 0x329   :  { %v1310_v50 = vmul.f32 %v2793_v34, %v2793_v34 }
 0x32b   :  { %v1311_v37 = vmin.f32 %v1310_v50, 16.0 }
 0x32c   :  { %v715_v17 = vpop.f32.mrf.mxu1 }
 0x32d   :  { %v1312_v0 = vmul.f32 2.1237322e-06, %v1311_v37  ;;  %v2798_v39 = vadd.f32 %v2599_v32, %v715_v17  ;;  %v1323_v2 = vmul.f32 3.8918573e-05, %v1311_v37 }
 0x32f   :  { %v1313_v7 = vadd.f32 0.00028619796, %v1312_v0  ;;  %v2801_v4 = vmul.f32 0.70710677, %v2798_v39  ;;  %v1324_v22 = vadd.f32 0.001143296, %v1323_v2 }
 0x331   :  { %v1350_v11 = vmul.f32 %v2801_v4, %v2801_v4  ;;  %v1314_v59 = vmul.f32 %v1313_v7, %v1311_v37  ;;  %v1325_v58 = vmul.f32 %v1324_v22, %v1311_v37 }
 0x333   :  { %v1351_v46 = vmin.f32 %v1350_v11, 16.0  ;;  %v1326_v16 = vadd.f32 0.014752088, %v1325_v58  ;;  %v1315_v62 = vadd.f32 0.0036580483, %v1314_v59 }
 0x335   :  { %v1352_v26 = vmul.f32 2.1237322e-06, %v1351_v46  ;;  %v1363_v38 = vmul.f32 3.8918573e-05, %v1351_v46  ;;  %v1327_v55 = vmul.f32 %v1326_v16, %v1311_v37  ;;  %v1316_v27 = vmul.f32 %v1315_v62, %v1311_v37 }
 0x337   :  { %v1353_v63 = vadd.f32 0.00028619796, %v1352_v26  ;;  %v1364_v32 = vadd.f32 0.001143296, %v1363_v38  ;;  %v1328_v33 = vadd.f32 0.112945676, %v1327_v55 }
 0x338   :  { %v1317_v51 = vadd.f32 0.05243302, %v1316_v27 }
 0x339   :  { %v1354_v57 = vmul.f32 %v1353_v63, %v1351_v46  ;;  %v1365_v42 = vmul.f32 %v1364_v32, %v1351_v46  ;;  %v1329_v25 = vmul.f32 %v1328_v33, %v1311_v37 }
 0x33a   :  { %v1318_v54 = vmul.f32 %v1317_v51, %v1311_v37 }
 0x33b   :  { %v1355_v19 = vadd.f32 0.0036580483, %v1354_v57  ;;  %v1366_v12 = vadd.f32 0.014752088, %v1365_v42  ;;  %v1330_v9 = vadd.f32 0.4994258, %v1329_v25 }
 0x33c   :  { %v1319_v49 = vadd.f32 0.18741608, %v1318_v54  ;;  %v732_v25 = vmul.f32 0.5, %v2790_v61 }
 0x33d   :  { %v1367_v3 = vmul.f32 %v1366_v12, %v1351_v46  ;;  %v1331_v40 = vmul.f32 %v1330_v9, %v1311_v37  ;;  %v1356_v23 = vmul.f32 %v1355_v19, %v1351_v46  ;;  %v733_v19 = vmul.f32 0.5, %v2798_v39 }
 0x33e   :  { %v1320_v43 = vmul.f32 %v1319_v49, %v1311_v37 }
 0x33f   :  { %v1368_v30 = vadd.f32 0.112945676, %v1367_v3  ;;  %v1332_v15 = vadd.f32 1.0, %v1331_v40  ;;  %v1357_v35 = vadd.f32 0.05243302, %v1356_v23 }
 0x340   :  { %v1321_v21 = vadd.f32 1.1283791, %v1320_v43 }
 0x341   :  { %v1369_v20 = vmul.f32 %v1368_v30, %v1351_v46  ;;  %1791 = vrcp.f32 %v1332_v15  ;;  %v1358_v47 = vmul.f32 %v1357_v35, %v1351_v46  ;;  %v1344_v28 = vand.u32 2147483648, %v1332_v15 }
 0x342   :  { %v1342_v41 = vand.u32 2147483647, %v1332_v15  ;;  %vm1338_vm2 = vweird.f32 %v1332_v15  ;;  %v1322_v11 = vmul.f32 %v1321_v21, %v2793_v34 }
 0x343   :  { %v1370_v45 = vadd.f32 0.4994258, %v1369_v20  ;;  %v1359_v14 = vadd.f32 0.18741608, %v1358_v47  ;;  %v1345_v2 = vor.u32 1.1754944e-38, %v1344_v28 }
 0x344   :  { %vm1343_vm4 = vcmp.eq.f32.partialorder %v1342_v41, 8.507059e+37 }
 0x345   :  { %v1371_v31 = vmul.f32 %v1370_v45, %v1351_v46  ;;  %v1360_v17 = vmul.f32 %v1359_v14, %v1351_v46 }
 0x347   :  { %v1372_v53 = vadd.f32 1.0, %v1371_v31  ;;  %v1792_v52 = vpop.eup %1791  ;;  %v1361_v58 = vadd.f32 1.1283791, %v1360_v17 }
 0x348   :  { %v1334_v8 = vmul.f32 %v1792_v52, %v1332_v15  ;;  %vm1339_vm1 = vweird.f32 %v1792_v52 }
 0x349   :  { %1793 = vrcp.f32 %v1372_v53  ;;  %vm1340_vm3 = vmor %vm1338_vm2, %vm1339_vm1  ;;  %v1384_v16 = vand.u32 2147483648, %v1372_v53  ;;  %v1382_v62 = vand.u32 2147483647, %v1372_v53  ;;  %vm1378_vm6 = vweird.f32 %v1372_v53 }
 0x34a   :  { %v1335_v29 = vsub.f32 1.0, %v1334_v8  ;;  %v1362_v63 = vmul.f32 %v1361_v58, %v2801_v4 }
 0x34b   :  { %v1385_v46 = vor.u32 1.1754944e-38, %v1384_v16  ;;  %vm1383_vm8 = vcmp.eq.f32.partialorder %v1382_v62, 8.507059e+37 }
 0x34c   :  { %v1336_v6 = vmul.f32 %v1792_v52, %v1335_v29 }
 0x34e   :  { %v1337_v0 = vadd.f32 %v1792_v52, %v1336_v6 }
 0x34f   :  { %v1794_v50 = vpop.eup %1793 }
 0x350   :  { %v1374_v7 = vmul.f32 %v1794_v50, %v1372_v53  ;;  %v1341_v22 = vsel %vm1340_vm3, %v1792_v52, %v1337_v0  ;;  %vm1379_vm5 = vweird.f32 %v1794_v50 }
 0x351   :  { %v1346_v59 = vsel %vm1343_vm4, %v1345_v2, %v1341_v22  ;;  %vm1380_vm7 = vmor %vm1378_vm6, %vm1379_vm5 }
 0x352   :  { %v1375_v37 = vsub.f32 1.0, %v1374_v7  ;;  %v1347_v26 = vmul.f32 %v1346_v59, %v1322_v11 }
 0x354   :  { %v1376_v38 = vmul.f32 %v1794_v50, %v1375_v37  ;;  %v1661_v32 = vclamps-f32 %v1347_v26, 1.0 }
 0x356   :  { %v1377_v55 = vadd.f32 %v1794_v50, %v1376_v38  ;;  %v1404_v27 = vadd.f32 1.0, %v1661_v32 }
 0x358   :  { %v1381_v33 = vsel %vm1380_vm7, %v1794_v50, %v1377_v55  ;;  %v1420_v51 = vmul.f32 %v1404_v27, %v732_v25 }
 0x359   :  { %v1386_v57 = vsel %vm1383_vm8, %v1385_v46, %v1381_v33 }
 0x35a   :  { %v1387_v42 = vmul.f32 %v1386_v57, %v1362_v63 }
 0x35c   :  { %v1662_v34 = vclamps-f32 %v1387_v42, 1.0  ;;  %v1522_v9 = vpop.f32.mrf.mxu2 }
 0x35d   :  { %v1523_v3 = vadd.f32 %v2715_v56, %v1522_v9 }
 0x35e   :  { %v1405_v12 = vadd.f32 1.0, %v1662_v34 }
 0x35f   :  { %v1553_v23 = vadd.f32 %v1523_v3, %v1949_v44 }
 0x360   :  { %v1421_v40 = vmul.f32 %v1405_v12, %v733_v19 }
 0x361   :  { %1569 = vst.msk [vmem:[%s2879_s10 + $0x30] sm:$0xff] %vm112_vm0, %v1553_v23 }
 0x362   :  { %v1429_v4 = vpack.c.bf16 %v1421_v40, %v1420_v51 }
 0x364   :  { %1541 = vmatmul.bf16.gmra.mxu3 %v1429_v4  ;;  %v1524_v30 = vpop.f32.mrf.mxu2 }
 0x365   :  { %v1525_v61 = vadd.f32 %v2715_v56, %v1524_v30 }
 0x367   :  { %v1554_v39 = vadd.f32 %v1525_v61, %v1967_v1 }
 0x369   :  { %1570 = vst.msk [vmem:[%s2879_s10 + $0x38] sm:$0xff] %vm112_vm0, %v1554_v39 }
 0x371   :  { %v1527_v15 = vpop.f32.mrf.mxu2 }
 0x372   :  { %v1528_v44 = vadd.f32 %v2715_v56, %v1527_v15 }
 0x374   :  { %v1555_v20 = vadd.f32 %v1528_v44, %v1981_v10 }
 0x376   :  { %1571 = vst.msk [vmem:[%s2879_s10 + $0x40] sm:$0xff] %vm112_vm0, %v1555_v20 }
 0x379   :  { %v1529_v54 = vpop.f32.mrf.mxu2 }
 0x37a   :  { %v1530_v35 = vadd.f32 %v2715_v56, %v1529_v54 }
 0x37c   :  { %v1556_v1 = vadd.f32 %v1530_v35, %v1997_v24 }
 0x37e   :  { %1572 = vst.msk [vmem:[%s2879_s10 + $0x48] sm:$0xff] %vm112_vm0, %v1556_v1 }
 0x387   :  { %v1532_v45 = vpop.f32.mrf.mxu2 }
 0x388   :  { %v1533_v31 = vadd.f32 %v2715_v56, %v1532_v45 }
 0x38a   :  { %v1557_v10 = vadd.f32 %v1533_v31, %v2012_v36 }
 0x38c   :  { %1573 = vst.msk [vmem:[%s2879_s10 + $0x50] sm:$0xff] %vm112_vm0, %v1557_v10 }
 0x38f   :  { %v1534_v49 = vpop.f32.mrf.mxu2 }
 0x390   :  { %v1535_v47 = vadd.f32 %v2715_v56, %v1534_v49 }
 0x392   :  { %v1558_v24 = vadd.f32 %v1535_v47, %v2027_v48  ;;  %v1537_v53 = vpop.f32.mrf.mxu3 }
 0x393   :  { %v1538_v52 = vadd.f32 %v2715_v56, %v1537_v53 }
 0x394   :  { %1574 = vst.msk [vmem:[%s2879_s10 + $0x58] sm:$0xff] %vm112_vm0, %v1558_v24 }
 0x395   :  { %v1559_v36 = vadd.f32 %v1538_v52, %v2042_v60 }
 0x397   :  { %1575 = vst.msk [vmem:[%s2879_s10 + $0x60] sm:$0xff] %vm112_vm0, %v1559_v36 }
 0x39a   :  { %v1539_v8 = vpop.f32.mrf.mxu3 }
 0x39b   :  { %v1540_v43 = vadd.f32 %v2715_v56, %v1539_v8 }
 0x39d   :  { %v1560_v48 = vadd.f32 %v1540_v43, %v2056_v5 }
 0x39f   :  { %1576 = vst.msk [vmem:[%s2879_s10 + $0x68] sm:$0xff] %vm112_vm0, %v1560_v48 }
 0x3e7   :  { %v1542_v14 = vpop.f32.mrf.mxu3 }
 0x3e8   :  { %v1543_v29 = vadd.f32 %v2715_v56, %v1542_v14 }
 0x3ea   :  { %v1561_v60 = vadd.f32 %v1543_v29, %v2064_v13 }
 0x3ec   :  { %1577 = vst.msk [vmem:[%s2879_s10 + $0x70] sm:$0xff] %vm112_vm0, %v1561_v60 }
 0x3ef   :  { %v1544_v28 = vpop.f32.mrf.mxu3 }
 0x3f0   :  { %v1545_v6 = vadd.f32 %v2715_v56, %v1544_v28 }
 0x3f2   :  { %v1562_v5 = vadd.f32 %v1545_v6, %v2101_v18 }
 0x3f4   :  { %1578 = vst.msk [vmem:[%s2879_s10 + $0x78] sm:$0xff] %vm112_vm0, %v1562_v5 }

// kernel: basic_layer_up_forward.11
= control target key start
LH: loop header
LB: loop body
LE: loop exit
PB: predicated region body
PF: predicated region fallthrough
CT: control target
= control target key end

     0   :  { %s886_s9 = smov 0   ;;  %s888_s10 = smov 0   ;;  %s1048_s0 = inlined_call_operand.vmem [shape: bf16[2,8,8,96], index: 0, kind: input, shape index: {}]   ;;  %s1049_s1 = inlined_call_operand.vmem [shape: f32[2,2,2,16,16], index: 1, kind: input, shape index: {}]   ;;  %s1050_s2 = inlined_call_operand.vmem [shape: bf16[2,8,8,32], index: 2, kind: output, shape index: {}]  }
   0x1   :  { %s890_s11 = smov 0   ;;  %s892_s12 = smov 0  }
   0x2   :  { %s894_s13 = smov 0  }
   0x3 LB: > { %s21_s14 = sadd.s32 1, %s855_s11  ;;  %s24_s15 = sadd.s32 1, %s859_s12  ;;  %s863_s13 = sphi %s894_s13, %s12_s13   ;;  %s859_s12 = sphi %s892_s12, %s1054_s12   ;;  %s855_s11 = sphi %s890_s11, %s1053_s11   ;;  %s851_s10 = sphi %s888_s10, %s1052_s10   ;;  %s847_s9 = sphi %s886_s9, %s1051_s9  }
   0x4   : > { %p22_p0 = scmp.ge.s32.totalorder %s21_s14, 2  ;;  %p695_p1 = scmp.ge.s32.totalorder %s863_s13, 1 }
   0x5   : > { %p143_p2 = scmp.lt.s32.totalorder %s863_s13, 5 }
   0x6   : > { %s1056_s14 = smov (%p22_p0, %s21_s14), 0  ;;  %s1058_s15 = smov (!%p22_p0, %s24_s15), %s859_s12 }
   0x7   : > { %p144_p3 = pnand %p695_p1, %p143_p2  ;;  %p26_p4 = scmp.ge.s32.totalorder %s1058_s15, 2 }
   0x8   : > { %s696_s16 = sshll.u32 (!%p144_p3), %s847_s9, 2  ;;  %p179_p5 = scmp.lt.s32.totalorder (!%p144_p3), %s851_s10, 1 }
   0x9   : > { %s1060_s15 = smov (%p26_p4, %s1058_s15), 0  ;;  %147 = sbr.rel (%p144_p3) target bundleno = 1132 (0x46c), region = 28 }
   0xa   : > { %p181_p6 = scmp.lt.s32.totalorder (!%p144_p3), %s696_s16, 7  ;;  %s865_s23 = smov (!%p144_p3), 96  }
   0xb   : > { %s866_s24 = smov (!%p144_p3), 112   ;;  %s867_s25 = smov (!%p144_p3), 80  }
   0xc   : > { %p188_p7 = scmp.lt.s32.totalorder (!%p144_p3), %s847_s9, 1  ;;  %s868_s30 = smov (!%p144_p3), 64  }
   0xd   : > { %s869_s3 = smov (!%p144_p3), 48   ;;  %s870_s4 = smov (!%p144_p3), 16  }
   0xe   : > { %s1062_s10 = smov (!%p179_p5, %s851_s10), 1  ;;  %s1064_s16 = smov (!%p181_p6, %s696_s16), 7  ;;  %vm205_vm0 = vcmask 779264   ;;  %vm212_vm1 = vcmask 781314   ;;  %vm234_vm2 = vcmask 130048   ;;  %vm378_vm3 = vcmask 261248  }
   0xf   : > { %s697_s17 = sshll.u32 %s1062_s10, 3  ;;  %s1066_s9 = smov (!%p188_p7, %s847_s9), 1  ;;  %vm384_vm4 = vcmask 254976   ;;  %vm580_vm5 = vcmask 257026  }
  0x10   : > { %s919_s18 = sadd.s32 %s697_s17, %s1064_s16  ;;  %s744_s26 = sshll.u32 %s1066_s9, 6 }
  0x11   : > { %s698_s19 = sshll.u32 %s919_s18, 2  ;;  %s953_s29 = scalar_lea.vmem %s1049_s1, %s744_s26 }
  0x12   : > { %s186_s22 = scalar_lea.vmem %s1048_s0, %s698_s19  ;;  %v225_v16 = vld [vmem:[%s953_s29] sm:$0xff]  ;;  %v226_v21 = vld [vmem:[%s953_s29 + $0x8] sm:$0xff]  ;;  %v736_v41 = vld [vmem:[%s953_s29 + $0x38] sm:$0xff]  ;;  %s1018_s7 = scalar_lea.vmem %s1050_s2, %s698_s19 }
  0x13   : > { %v204_v0 = vld [vmem:[%s186_s22] sm:$0x3]  ;;  %v704_v1 = vld [vmem:[%s186_s22 + $0x4] sm:$0x3]  ;;  %v705_v2 = vld [vmem:[%s186_s22 + $0x8] sm:$0x3] }
  0x14   : > { %206 = vst.msk [vmem:[#allocation2] sm:$0x3] %vm205_vm0, %v204_v0  ;;  %v210_v3 = vrot.slane %v704_v1, 6  ;;  %v706_v4 = vld [vmem:[%s186_s22 + $0xc] sm:$0x3]  ;;  %v713_v55 = vld [vmem:[%s953_s29 + $0x10] sm:$0xff] }
  0x15   : > { %216 = vst.msk [vmem:[#allocation2 + $0x4] sm:$0x3] %vm205_vm0, %v705_v2  ;;  %v220_v5 = vrot.slane %v706_v4, 6  ;;  %v401_v6 = vld [vmem:[%s186_s22] sm:$0xc]  ;;  %v714_v59 = vld [vmem:[%s953_s29 + $0x18] sm:$0xff] }
  0x16   : > { %213 = vst.msk [vmem:[#allocation2] sm:$0xc] %vm212_vm1, %v210_v3  ;;  %v722_v7 = vrot.slane %v401_v6, 10  ;;  %v723_v8 = vld [vmem:[%s186_s22 + $0x4] sm:$0xc]  ;;  %v735_v62 = vld [vmem:[%s953_s29 + $0x30] sm:$0xff] }
  0x17   : > { %222 = vst.msk [vmem:[#allocation2 + $0x4] sm:$0xc] %vm212_vm1, %v220_v5  ;;  %v724_v9 = vld [vmem:[%s186_s22 + $0x8] sm:$0xc]  ;;  %v726_v11 = vld [vmem:[%s186_s22 + $0xc] sm:$0xc] }
  0x18   : > { %406 = vst.msk [vmem:[#allocation2] sm:$0x3] %vm205_vm0, %v722_v7  ;;  %v725_v10 = vrot.slane %v724_v9, 10 }
  0x19   : > { %408 = vst.msk [vmem:[#allocation2] sm:$0xc] %vm212_vm1, %v723_v8 }
  0x20   : > { %v933_v12 = vld [vmem:[#allocation2] sm:$0xff] }
  0x21   : > { %414 = vst.msk [vmem:[#allocation2 + $0x4] sm:$0x3] %vm205_vm0, %v725_v10  ;;  %232 = vrot.lane.b32.xlu0 %v933_v12, %s865_s23  ;;  %303 = vrot.lane.b32.xlu2 %v933_v12, %s866_s24 }
  0x22   : > { %416 = vst.msk [vmem:[#allocation2 + $0x4] sm:$0xc] %vm212_vm1, %v726_v11  ;;  %v727_v11 = vld [vmem:[%s953_s29 + $0x20] sm:$0xff] }
  0x29   : > { %v940_v13 = vld [vmem:[#allocation2] sm:$0xff] }
  0x2a   : > { %499 = vrot.lane.b32.xlu2 %v940_v13, %s867_s25 }
  0x32   : > { %497 = vrot.lane.b32.xlu2 %v940_v13, %s866_s24 }
  0x7b   : > { %v304_v20 = vpop.permute.xlu2 %303 }
  0x84   : > { %v500_v25 = vpop.permute.xlu2 %499 }
  0x85   : > { %v505_v26 = vsel %vm234_vm2, %v500_v25, 0  ;;  %v728_v25 = vld [vmem:[%s953_s29 + $0x28] sm:$0xff] }
  0x8c   : > { %v498_v27 = vpop.permute.xlu2 %497 }
  0x93   : > { %v233_v14 = vpop.permute.xlu0 %232 }
  0x94   : > { %v239_v15 = vsel %vm234_vm2, %v233_v14, 0 }
  0x95   : > { %248 = vmatpush.bf16.xpose.msra.mxu0 %v239_v15 }
  0x9c   : > { %711 = vmatmul.msk.bf16.vlgmr.msra.gmra.mxu0 %vm234_vm2, %v933_v12 }
  0x9d   : > { %514 = vmatpush.bf16.xpose.msrb.mxu0 %v505_v26 }
  0xac   : > { %737 = vmatmul.msk.bf16.vlgmr.msrb.gmra.mxu0 %vm234_vm2, %v498_v27 }
 0x119   : > { %v250_v17 = vpop.f32.mrf.mxu0 }
 0x11a   : > { %v251_v18 = vadd.f32 %v250_v17, %v225_v16 }
 0x11c   : > { %v255_v19 = vsel %vm234_vm2, %v251_v18, -inf }
 0x11d   : > { %256 = vmax.xlane.f32.xlu0 %v255_v19 }
 0x121   : > { %v252_v22 = vpop.f32.mrf.mxu0 }
 0x122   : > { %v253_v23 = vadd.f32 %v252_v22, %v226_v21 }
 0x124   : > { %v258_v24 = vsel %vm234_vm2, %v253_v23, -inf }
 0x125   : > { %259 = vmax.xlane.f32.xlu1 %v258_v24 }
 0x129   : > { %v516_v40 = vpop.f32.mrf.mxu0 }
 0x12a   : > { %v517_v0 = vadd.f32 %v735_v62, %v516_v40 }
 0x12c   : > { %v521_v1 = vsel %vm234_vm2, %v517_v0, -inf }
 0x131   : > { %278 = vrot.lane.b32.xlu0 %v933_v12, %s868_s30  ;;  %v518_v42 = vpop.f32.mrf.mxu0 }
 0x132   : > { %v972_v43 = vadd.f32 %v736_v41, %v518_v42 }
 0x134   : > { %v524_v44 = vsel %vm234_vm2, %v972_v43, -inf }
 0x13e   : > { %305 = vrot.lane.b32.xlu1 %v933_v12, %s867_s25 }
 0x190   : > { %v257_v28 = vpop.xlane.xlu0 %256 }
 0x191   : > { %v261_v29 = vsub.f32 %v251_v18, %v257_v28 }
 0x193   : > { %v263_v30 = vmul.f32 1.442695, %v261_v29 }
 0x195   : > { %793 = vpow2.f32 %v263_v30 }
 0x198   : > { %v260_v31 = vpop.xlane.xlu1 %259 }
 0x199   : > { %v262_v32 = vsub.f32 %v253_v23, %v260_v31 }
 0x19b   : > { %v794_v33 = vpop.eup %793  ;;  %v265_v34 = vmul.f32 1.442695, %v262_v32 }
 0x19c   : > { %v267_v35 = vsel %vm234_vm2, %v794_v33, 0.0 }
 0x19d   : > { %795 = vpow2.f32 %v265_v34  ;;  %268 = vadd.xlane.f32.xlu2 %v267_v35 }
 0x1a3   : > { %v796_v36 = vpop.eup %795  ;;  %v279_v45 = vpop.permute.xlu0 %278 }
 0x1a4   : > { %v270_v37 = vsel %vm234_vm2, %v796_v36, 0.0  ;;  %291 = vmatpush.bf16.msra.mxu1 %v279_v45 }
 0x1a5   : > { %271 = vadd.xlane.f32.xlu1 %v270_v37 }
 0x1b0   : > { %v306_v38 = vpop.permute.xlu1 %305 }
 0x1b1   : > { %v311_v39 = vsel %vm234_vm2, %v306_v38, 0 }
 0x1b2   : > { %320 = vmatpush.bf16.xpose.msra.mxu2 %v311_v39 }
 0x1b5   : > { %427 = vrot.lane.b32.xlu2 %v940_v13, %s865_s23 }
 0x1b9   : > { %715 = vmatmul.msk.bf16.vlgmr.msra.gmra.mxu2 %vm234_vm2, %v304_v20 }
 0x1de   : > { %525 = vmax.xlane.f32.xlu2 %v524_v44 }
 0x1f6   : > { %544 = vrot.lane.b32.xlu2 %v940_v13, %s869_s3 }
 0x210   : > { %v269_v46 = vpop.xlane.xlu2 %268 }
 0x211   : > { %797 = vrcp.f32 %v269_v46 }
 0x217   : > { %v798_v50 = vpop.eup %797 }
 0x218   : > { %v272_v47 = vpop.xlane.xlu1 %271  ;;  %v428_v48 = vpop.permute.xlu2 %427  ;;  %v275_v52 = vmul.f32 %v798_v50, %v794_v33 }
 0x219   : > { %799 = vrcp.f32 %v272_v47  ;;  %v433_v49 = vsel %vm234_vm2, %v428_v48, 0 }
 0x21a   : > { %442 = vmatpush.bf16.xpose.msrb.mxu1 %v433_v49 }
 0x21f   : > { %v800_v51 = vpop.eup %799 }
 0x220   : > { %v276_v53 = vmul.f32 %v800_v51, %v796_v36 }
 0x222   : > { %v277_v54 = vpack.c.bf16 %v276_v53, %v275_v52 }
 0x224   : > { %712 = vmatmul.msk.bf16.vlgmr.msra.gmra.mxu1 %vm234_vm2, %v277_v54 }
 0x234   : > { %733 = vmatmul.msk.bf16.vlgmr.msrb.gmra.mxu1 %vm234_vm2, %v940_v13 }
 0x23c   : > { %v322_v56 = vpop.f32.mrf.mxu2 }
 0x23d   : > { %v323_v57 = vadd.f32 %v713_v55, %v322_v56 }
 0x23f   : > { %v327_v58 = vsel %vm234_vm2, %v323_v57, -inf }
 0x240   : > { %328 = vmax.xlane.f32.xlu0 %v327_v58 }
 0x244   : > { %v324_v60 = vpop.f32.mrf.mxu2 }
 0x245   : > { %v325_v61 = vadd.f32 %v714_v59, %v324_v60 }
 0x247   : > { %v330_v63 = vsel %vm234_vm2, %v325_v61, -inf }
 0x248   : > { %331 = vmax.xlane.f32.xlu1 %v330_v63 }
 0x250   : > { %522 = vmax.xlane.f32.xlu1 %v521_v1 }
 0x251   : > { %v526_v17 = vpop.xlane.xlu2 %525 }
 0x252   : > { %v528_v22 = vsub.f32 %v972_v43, %v526_v17 }
 0x254   : > { %v531_v27 = vmul.f32 1.442695, %v528_v22 }
 0x259   : > { %v545_v35 = vpop.permute.xlu2 %544 }
 0x25a   : > { %557 = vmatpush.bf16.msrb.mxu2 %v545_v35 }
 0x2a1   : > { %v293_v2 = vpop.f32.mrf.mxu1 }
 0x2a2   : > { %298 = vst.msk [vmem:[#allocation3] sm:$0xff] %vm234_vm2, %v293_v2 }
 0x2a9   : > { %v295_v3 = vpop.f32.mrf.mxu1 }
 0x2aa   : > { %299 = vst.msk [vmem:[#allocation3 + $0x8] sm:$0xff] %vm234_vm2, %v295_v3 }
 0x2b1   : > { %v444_v14 = vpop.f32.mrf.mxu1 }
 0x2b2   : > { %v445_v16 = vadd.f32 %v727_v11, %v444_v14 }
 0x2b3   : > { %v329_v4 = vpop.xlane.xlu0 %328 }
 0x2b4   : > { %v333_v5 = vsub.f32 %v323_v57, %v329_v4  ;;  %v449_v20 = vsel %vm234_vm2, %v445_v16, -inf }
 0x2b6   : > { %v335_v6 = vmul.f32 1.442695, %v333_v5 }
 0x2b8   : > { %801 = vpow2.f32 %v335_v6 }
 0x2b9   : > { %v446_v26 = vpop.f32.mrf.mxu1 }
 0x2ba   : > { %v447_v28 = vadd.f32 %v728_v25, %v446_v26 }
 0x2bb   : > { %v332_v7 = vpop.xlane.xlu1 %331 }
 0x2bc   : > { %v334_v8 = vsub.f32 %v325_v61, %v332_v7  ;;  %v452_v31 = vsel %vm234_vm2, %v447_v28, -inf }
 0x2be   : > { %v990_v9 = vpop.eup %801  ;;  %v337_v10 = vmul.f32 1.442695, %v334_v8 }
 0x2bf   : > { %v339_v15 = vsel %vm234_vm2, %v990_v9, 0.0 }
 0x2c0   : > { %803 = vpow2.f32 %v337_v10  ;;  %340 = vadd.xlane.f32.xlu1 %v339_v15 }
 0x2c3   : > { %v523_v18 = vpop.xlane.xlu1 %522 }
 0x2c4   : > { %v527_v19 = vsub.f32 %v517_v0, %v523_v18 }
 0x2c6   : > { %v804_v21 = vpop.eup %803  ;;  %v529_v23 = vmul.f32 1.442695, %v527_v19 }
 0x2c7   : > { %v342_v24 = vsel %vm234_vm2, %v804_v21, 0.0 }
 0x2c8   : > { %805 = vpow2.f32 %v529_v23  ;;  %343 = vadd.xlane.f32.xlu0 %v342_v24  ;;  %450 = vmax.xlane.f32.xlu1 %v449_v20 }
 0x2c9   : > { %807 = vpow2.f32 %v531_v27 }
 0x2ce   : > { %v806_v29 = vpop.eup %805 }
 0x2cf   : > { %v533_v30 = vsel %vm234_vm2, %v806_v29, 0.0  ;;  %v808_v32 = vpop.eup %807 }
 0x2d0   : > { %534 = vadd.xlane.f32.xlu0 %v533_v30  ;;  %453 = vmax.xlane.f32.xlu1 %v452_v31  ;;  %v536_v33 = vsel %vm234_vm2, %v808_v32, 0.0 }
 0x2d8   : > { %537 = vadd.xlane.f32.xlu0 %v536_v33 }
 0x2e9   : > { %350 = vrot.lane.b32.xlu1 %v933_v12, %s869_s3 }
 0x333   : > { %v341_v34 = vpop.xlane.xlu1 %340 }
 0x33b   : > { %v451_v36 = vpop.xlane.xlu1 %450  ;;  %v344_v37 = vpop.xlane.xlu0 %343 }
 0x33c   : > { %v455_v38 = vsub.f32 %v445_v16, %v451_v36 }
 0x33e   : > { %v457_v39 = vmul.f32 1.442695, %v455_v38 }
 0x340   : > { %809 = vpow2.f32 %v457_v39 }
 0x343   : > { %v454_v40 = vpop.xlane.xlu1 %453  ;;  %v535_v41 = vpop.xlane.xlu0 %534 }
 0x344   : > { %v456_v42 = vsub.f32 %v447_v28, %v454_v40 }
 0x346   : > { %v810_v43 = vpop.eup %809  ;;  %v459_v44 = vmul.f32 1.442695, %v456_v42 }
 0x347   : > { %v461_v45 = vsel %vm234_vm2, %v810_v43, 0.0 }
 0x348   : > { %811 = vpow2.f32 %v459_v44  ;;  %462 = vadd.xlane.f32.xlu0 %v461_v45 }
 0x349   : > { %813 = vrcp.f32 %v535_v41 }
 0x34b   : > { %v538_v46 = vpop.xlane.xlu0 %537 }
 0x34c   : > { %815 = vrcp.f32 %v538_v46 }
 0x34d   : > { %817 = vrcp.f32 %v344_v37 }
 0x34e   : > { %v812_v12 = vpop.eup %811  ;;  %819 = vrcp.f32 %v341_v34 }
 0x34f   : > { %v464_v47 = vsel %vm234_vm2, %v812_v12, 0.0  ;;  %v814_v48 = vpop.eup %813 }
 0x350   : > { %465 = vadd.xlane.f32.xlu1 %v464_v47  ;;  %v541_v50 = vmul.f32 %v814_v48, %v806_v29 }
 0x352   : > { %v816_v49 = vpop.eup %815 }
 0x353   : > { %v542_v51 = vmul.f32 %v816_v49, %v808_v32  ;;  %v818_v53 = vpop.eup %817 }
 0x354   : > { %v820_v54 = vpop.eup %819  ;;  %v348_v55 = vmul.f32 %v818_v53, %v804_v21 }
 0x355   : > { %v543_v52 = vpack.c.bf16 %v542_v51, %v541_v50  ;;  %v347_v57 = vmul.f32 %v820_v54, %v990_v9 }
 0x357   : > { %738 = vmatmul.msk.bf16.vlgmr.msrb.gmra.mxu2 %vm234_vm2, %v543_v52  ;;  %v349_v58 = vpack.c.bf16 %v348_v55, %v347_v57 }
 0x35b   : > { %v351_v56 = vpop.permute.xlu1 %350 }
 0x35c   : > { %472 = vrot.lane.b32.xlu0 %v940_v13, %s868_s30  ;;  %363 = vmatpush.bf16.msra.mxu3 %v351_v56 }
 0x35f   : > { %716 = vmatmul.msk.bf16.vlgmr.msra.gmra.mxu3 %vm234_vm2, %v349_v58 }
 0x3bb   : > { %v463_v59 = vpop.xlane.xlu0 %462 }
 0x3c3   : > { %v466_v60 = vpop.xlane.xlu1 %465 }
 0x3c4   : > { %821 = vrcp.f32 %v466_v60 }
 0x3c5   : > { %823 = vrcp.f32 %v463_v59 }
 0x3ca   : > { %v822_v61 = vpop.eup %821 }
 0x3cb   : > { %v824_v62 = vpop.eup %823  ;;  %v470_v63 = vmul.f32 %v822_v61, %v812_v12 }
 0x3cc   : > { %v469_v0 = vmul.f32 %v824_v62, %v810_v43 }
 0x3ce   : > { %v473_v1 = vpop.permute.xlu0 %472  ;;  %v471_v2 = vpack.c.bf16 %v470_v63, %v469_v0 }
 0x3cf   : > { %485 = vmatpush.bf16.msrb.mxu3 %v473_v1 }
 0x3d2   : > { %734 = vmatmul.msk.bf16.vlgmr.msrb.gmra.mxu3 %vm234_vm2, %v471_v2 }
 0x3da   : > { %v559_v3 = vpop.f32.mrf.mxu2 }
 0x3db   : > { %566 = vrot.lane.b32.xlu0 %v559_v3, %s870_s4 }
 0x3e2   : > { %v365_v13 = vpop.f32.mrf.mxu3  ;;  %v561_v5 = vpop.f32.mrf.mxu2 }
 0x3e3   : > { %372 = vrot.lane.b32.xlu2 %v365_v13, %s870_s4 }
 0x3ea   : > { %v367_v4 = vpop.f32.mrf.mxu3 }
 0x3eb   : > { %374 = vrot.lane.b32.xlu2 %v367_v4, %s870_s4 }
 0x3f3   : > { %568 = vrot.lane.b32.xlu2 %v561_v5, %s870_s4 }
 0x43d   : > { %v373_v6 = vpop.permute.xlu2 %372 }
 0x43e   : > { %379 = vst.msk [vmem:[#allocation3] sm:$0xff] %vm378_vm3, %v373_v6 }
 0x445   : > { %v375_v7 = vpop.permute.xlu2 %374  ;;  %v381_v8 = vld [vmem:[#allocation3] sm:$0xff] }
 0x446   : > { %380 = vst.msk [vmem:[#allocation3 + $0x8] sm:$0xff] %vm378_vm3, %v375_v7  ;;  %v383_v9 = vpack.c.bf16 %v381_v8, %v381_v8 }
 0x448   : > { %385 = vst.msk [vmem:[%s1018_s7] sm:$0x3] %vm384_vm4, %v383_v9  ;;  %v717_v10 = vrot.slane %v383_v9, 10 }
 0x44a   : > { %718 = vst.msk [vmem:[%s1018_s7 + $0x4] sm:$0x3] %vm384_vm4, %v717_v10 }
 0x44d   : > { %v382_v11 = vld [vmem:[#allocation3 + $0x8] sm:$0xff]  ;;  %v567_v17 = vpop.permute.xlu0 %566  ;;  %v569_v19 = vpop.permute.xlu2 %568 }
 0x44e   : > { %v392_v14 = vpack.c.bf16 %v382_v11, %v382_v11 }
 0x450   : > { %719 = vst.msk [vmem:[%s1018_s7 + $0x8] sm:$0x3] %vm384_vm4, %v392_v14  ;;  %v720_v15 = vrot.slane %v392_v14, 10 }
 0x452   : > { %721 = vst.msk [vmem:[%s1018_s7 + $0xc] sm:$0x3] %vm384_vm4, %v720_v15 }
 0x455   : > { %v487_v16 = vpop.f32.mrf.mxu3 }
 0x456   : > { %492 = vst.msk [vmem:[#allocation3] sm:$0xff] %vm234_vm2, %v487_v16 }
 0x457   : > { %572 = vst.msk [vmem:[#allocation3] sm:$0xff] %vm378_vm3, %v567_v17 }
 0x45d   : > { %v489_v18 = vpop.f32.mrf.mxu3 }
 0x45e   : > { %v574_v20 = vld [vmem:[#allocation3] sm:$0xff]  ;;  %493 = vst.msk [vmem:[#allocation3 + $0x8] sm:$0xff] %vm234_vm2, %v489_v18 }
 0x45f   : > { %v576_v21 = vpack.c.bf16 %v574_v20, %v574_v20  ;;  %573 = vst.msk [vmem:[#allocation3 + $0x8] sm:$0xff] %vm378_vm3, %v569_v19 }
 0x461   : > { %v578_v22 = vrot.slane %v576_v21, 6  ;;  %739 = vst.msk [vmem:[%s1018_s7 + $0x4] sm:$0xc] %vm580_vm5, %v576_v21 }
 0x463   : > { %581 = vst.msk [vmem:[%s1018_s7] sm:$0xc] %vm580_vm5, %v578_v22 }
 0x466   : > { %v575_v23 = vld [vmem:[#allocation3 + $0x8] sm:$0xff] }
 0x467   : > { %v583_v24 = vpack.c.bf16 %v575_v23, %v575_v23 }
 0x469   : > { %v585_v25 = vrot.slane %v583_v24, 6  ;;  %741 = vst.msk [vmem:[%s1018_s7 + $0xc] sm:$0xc] %vm580_vm5, %v583_v24 }
 0x46b   : > { %740 = vst.msk [vmem:[%s1018_s7 + $0x8] sm:$0xc] %vm580_vm5, %v585_v25 }
 0x46c PF: > { %s12_s13 = sadd.s32 1, %s863_s13   ;;  %s1051_s9 = smov %s855_s11 }
 0x46d   : > { %p9_p8 = scmp.ge.s32.totalorder %s12_s13, 6   ;;  %s1052_s10 = smov %s859_s12 }
 0x46e   : > { %s1053_s11 = smov %s1056_s14  ;;  %s1054_s12 = smov %s1060_s15 }
 0x46f   :  { %11 = sbr.rel (!%p9_p8) target bundleno = 3 (0x3), region = 70 }

// kernel: basic_layer_up_forward.13
= control target key start
LH: loop header
LB: loop body
LE: loop exit
PB: predicated region body
PF: predicated region fallthrough
CT: control target
= control target key end

     0   :  { %vm61_vm0 = vcmask 261120   ;;  %vm143_vm1 = vcmask 523264   ;;  %s1082_s1 = inlined_call_operand.vmem [shape: bf16[32,64], index: 1, kind: input, shape index: {}]   ;;  %s1083_s0 = inlined_call_operand.vmem [shape: f32[128,32], index: 0, kind: input, shape index: {}]   ;;  %s1084_s2 = inlined_call_operand.vmem [shape: f32[64,64], index: 2, kind: input, shape index: {}]   ;;  %s1085_s3 = inlined_call_operand.vmem [shape: f32[1,64], index: 3, kind: input, shape index: {}]   ;;  %s1086_s4 = inlined_call_operand.vmem [shape: f32[1,64], index: 4, kind: input, shape index: {}]   ;;  %s1087_s5 = inlined_call_operand.vmem [shape: f32[128,64], index: 5, kind: output, shape index: {}]  }
   0x1   :  { %v687_v0 = vld [vmem:[%s1082_s1 + $0x8] sm:$0xff]  ;;  %v686_v1 = vld [vmem:[%s1082_s1] sm:$0xff]  ;;  %v23_v5 = vld [vmem:[%s1083_s0 + $0x10] sm:$0xff] }
   0x2   :  { %92 = vmatpush.bf16.msra.mxu0 %v687_v0  ;;  %v21_v2 = vld [vmem:[%s1083_s0] sm:$0xff]  ;;  %v22_v3 = vld [vmem:[%s1083_s0 + $0x8] sm:$0xff]  ;;  %688 = vmatpush.bf16.msra.mxu3 %v687_v0  ;;  %v24_v6 = vld [vmem:[%s1083_s0 + $0x18] sm:$0xff] }
   0x3   :  { %v37_v4 = vpack.c.bf16 %v22_v3, %v21_v2  ;;  %v38_v7 = vpack.c.bf16 %v24_v6, %v23_v5  ;;  %v25_v8 = vld [vmem:[%s1083_s0 + $0x20] sm:$0xff]  ;;  %v26_v9 = vld [vmem:[%s1083_s0 + $0x28] sm:$0xff]  ;;  %v27_v11 = vld [vmem:[%s1083_s0 + $0x30] sm:$0xff] }
   0x4   :  { %v39_v10 = vpack.c.bf16 %v26_v9, %v25_v8  ;;  %v28_v12 = vld [vmem:[%s1083_s0 + $0x38] sm:$0xff]  ;;  %v29_v14 = vld [vmem:[%s1083_s0 + $0x40] sm:$0xff]  ;;  %v30_v15 = vld [vmem:[%s1083_s0 + $0x48] sm:$0xff] }
   0x5   :  { %v40_v13 = vpack.c.bf16 %v28_v12, %v27_v11  ;;  %v41_v16 = vpack.c.bf16 %v30_v15, %v29_v14  ;;  %v35_v17 = vld [vmem:[%s1083_s0 + $0x70] sm:$0xff]  ;;  %v36_v18 = vld [vmem:[%s1083_s0 + $0x78] sm:$0xff]  ;;  %v140_v22 = vld [vmem:[%s1084_s2 + $0x28] sm:$0xff] }
   0x6   :  { %93 = vmatpush.bf16.msra.mxu0 %v686_v1  ;;  %689 = vmatpush.bf16.msra.mxu3 %v686_v1  ;;  %v44_v19 = vpack.c.bf16 %v36_v18, %v35_v17  ;;  %v142_v20 = vld [vmem:[%s1084_s2 + $0x38] sm:$0xff]  ;;  %v141_v21 = vld [vmem:[%s1084_s2 + $0x30] sm:$0xff]  ;;  %v139_v23 = vld [vmem:[%s1084_s2 + $0x20] sm:$0xff] }
   0x7   :  { %200 = vmatpush.msra.mxu1 %v142_v20  ;;  %345 = vmatpush.msra.mxu2 %v142_v20  ;;  %v138_v24 = vld [vmem:[%s1084_s2 + $0x18] sm:$0xff]  ;;  %v137_v25 = vld [vmem:[%s1084_s2 + $0x10] sm:$0xff]  ;;  %v136_v28 = vld [vmem:[%s1084_s2 + $0x8] sm:$0xff] }
   0x8   :  { %v31_v26 = vld [vmem:[%s1083_s0 + $0x50] sm:$0xff]  ;;  %v32_v27 = vld [vmem:[%s1083_s0 + $0x58] sm:$0xff]  ;;  %v33_v30 = vld [vmem:[%s1083_s0 + $0x60] sm:$0xff] }
   0x9   :  { %646 = vmatmul.msk.bf16.vlgmr.msra.gmra.mxu0 %vm61_vm0, %v37_v4  ;;  %653 = vmatmul.msk.bf16.vlgmr.msra.gmra.mxu3 %vm61_vm0, %v44_v19  ;;  %v42_v29 = vpack.c.bf16 %v32_v27, %v31_v26  ;;  %v34_v31 = vld [vmem:[%s1083_s0 + $0x68] sm:$0xff]  ;;  %v135_v33 = vld [vmem:[%s1084_s2] sm:$0xff] }
   0xa   :  { %690 = vmatpush.msrb.mxu3 %v142_v20  ;;  %201 = vmatpush.msra.mxu1 %v141_v21  ;;  %v43_v32 = vpack.c.bf16 %v34_v31, %v33_v30 }
   0xb   :  { %346 = vmatpush.msra.mxu2 %v141_v21 }
   0xc   :  { %691 = vmatpush.msrb.mxu3 %v141_v21  ;;  %202 = vmatpush.msra.mxu1 %v140_v22 }
   0xd   :  { %347 = vmatpush.msra.mxu2 %v140_v22 }
   0xe   :  { %692 = vmatpush.msrb.mxu3 %v140_v22  ;;  %203 = vmatpush.msra.mxu1 %v139_v23 }
   0xf   :  { %348 = vmatpush.msra.mxu2 %v139_v23 }
  0x10   :  { %693 = vmatpush.msrb.mxu3 %v139_v23  ;;  %204 = vmatpush.msra.mxu1 %v138_v24 }
  0x11   :  { %349 = vmatpush.msra.mxu2 %v138_v24 }
  0x12   :  { %694 = vmatpush.msrb.mxu3 %v138_v24  ;;  %205 = vmatpush.msra.mxu1 %v137_v25 }
  0x13   :  { %350 = vmatpush.msra.mxu2 %v137_v25 }
  0x14   :  { %695 = vmatpush.msrb.mxu3 %v137_v25  ;;  %206 = vmatpush.msra.mxu1 %v136_v28 }
  0x15   :  { %351 = vmatpush.msra.mxu2 %v136_v28 }
  0x16   :  { %696 = vmatpush.msrb.mxu3 %v136_v28  ;;  %207 = vmatpush.msra.mxu1 %v135_v33 }
  0x17   :  { %352 = vmatpush.msra.mxu2 %v135_v33 }
  0x18   :  { %697 = vmatpush.msrb.mxu3 %v135_v33 }
  0x19   :  { %647 = vmatmul.msk.bf16.gmra.mxu0 %vm61_vm0, %v38_v7 }
  0x1a   :  { %698 = vmatpush.msra.mxu3 %v142_v20 }
  0x1c   :  { %699 = vmatpush.msra.mxu3 %v141_v21 }
  0x1e   :  { %700 = vmatpush.msra.mxu3 %v140_v22 }
  0x20   :  { %701 = vmatpush.msra.mxu3 %v139_v23 }
  0x22   :  { %702 = vmatpush.msra.mxu3 %v138_v24 }
  0x24   :  { %703 = vmatpush.msra.mxu3 %v137_v25 }
  0x26   :  { %704 = vmatpush.msra.mxu3 %v136_v28 }
  0x28   :  { %705 = vmatpush.msra.mxu3 %v135_v33 }
  0x29   :  { %648 = vmatmul.msk.bf16.gmra.mxu0 %vm61_vm0, %v39_v10 }
  0x39   :  { %649 = vmatmul.msk.bf16.gmra.mxu0 %vm61_vm0, %v40_v13 }
  0x49   :  { %650 = vmatmul.msk.bf16.gmra.mxu0 %vm61_vm0, %v41_v16 }
  0x59   :  { %651 = vmatmul.msk.bf16.gmra.mxu0 %vm61_vm0, %v42_v29 }
  0x69   :  { %652 = vmatmul.msk.bf16.gmra.mxu0 %vm61_vm0, %v43_v32 }
  0x86   :  { %v95_v34 = vpop.f32.mrf.mxu0 }
  0x87   :  { %654 = vmatmul.msk.f32.vlgmr.msra.gmra.mxu1 %vm143_vm1, %v95_v34 }
  0x8c   :  { %v870_v48 = vpop.f32.mrf.mxu3 }
  0x8e   :  { %v97_v35 = vpop.f32.mrf.mxu0 }
  0x8f   :  { %655 = vmatmul.msk.f32.gmra.mxu1 %vm143_vm1, %v97_v35 }
  0x94   :  { %v874_v49 = vpop.f32.mrf.mxu3 }
  0x96   :  { %v100_v36 = vpop.f32.mrf.mxu0 }
  0x97   :  { %656 = vmatmul.msk.f32.gmra.mxu1 %vm143_vm1, %v100_v36 }
  0x9e   :  { %v102_v37 = vpop.f32.mrf.mxu0 }
  0x9f   :  { %657 = vmatmul.msk.f32.gmra.mxu1 %vm143_vm1, %v102_v37 }
  0xa6   :  { %v105_v38 = vpop.f32.mrf.mxu0 }
  0xa7   :  { %658 = vmatmul.msk.f32.gmra.mxu1 %vm143_vm1, %v105_v38 }
  0xae   :  { %v107_v39 = vpop.f32.mrf.mxu0 }
  0xaf   :  { %659 = vmatmul.msk.f32.gmra.mxu1 %vm143_vm1, %v107_v39 }
  0xb6   :  { %v110_v40 = vpop.f32.mrf.mxu0 }
  0xb7   :  { %660 = vmatmul.msk.f32.gmra.mxu1 %vm143_vm1, %v110_v40 }
  0xbe   :  { %v112_v41 = vpop.f32.mrf.mxu0 }
  0xbf   :  { %661 = vmatmul.msk.f32.gmra.mxu1 %vm143_vm1, %v112_v41 }
  0xc6   :  { %v115_v42 = vpop.f32.mrf.mxu0 }
  0xc7   :  { %662 = vmatmul.msk.f32.gmra.mxu1 %vm143_vm1, %v115_v42 }
  0xce   :  { %v117_v43 = vpop.f32.mrf.mxu0 }
  0xcf   :  { %663 = vmatmul.msk.f32.gmra.mxu1 %vm143_vm1, %v117_v43 }
  0xd6   :  { %v120_v44 = vpop.f32.mrf.mxu0 }
  0xd7   :  { %664 = vmatmul.msk.f32.gmra.mxu1 %vm143_vm1, %v120_v44 }
  0xde   :  { %v122_v45 = vpop.f32.mrf.mxu0 }
  0xdf   :  { %665 = vmatmul.msk.f32.gmra.mxu1 %vm143_vm1, %v122_v45 }
  0xe6   :  { %v125_v46 = vpop.f32.mrf.mxu0 }
  0xe7   :  { %666 = vmatmul.msk.f32.vlgmr.msrb.gmra.mxu3 %vm143_vm1, %v125_v46 }
  0xee   :  { %v127_v47 = vpop.f32.mrf.mxu0 }
  0xef   :  { %667 = vmatmul.msk.f32.gmra.mxu3 %vm143_vm1, %v127_v47 }
  0xf7   :  { %668 = vmatmul.msk.f32.gmra.mxu3 %vm143_vm1, %v870_v48 }
  0xff   :  { %669 = vmatmul.msk.f32.gmra.mxu3 %vm143_vm1, %v874_v49 }
 0x104   :  { %v209_v50 = vpop.f32.mrf.mxu1 }
 0x105   :  { %v878_v51 = vsub.f32 %v95_v34, %v209_v50 }
 0x107   :  { %v273_v52 = vmul.f32 %v878_v51, %v878_v51 }
 0x109   :  { %670 = vmatmul.msk.f32.vlgmr.msra.gmra.mxu2 %vm143_vm1, %v273_v52 }
 0x10c   :  { %v212_v53 = vpop.f32.mrf.mxu1 }
 0x10d   :  { %v883_v54 = vsub.f32 %v97_v35, %v212_v53  ;;  %v969_v53 = vld [vmem:[%s1086_s4] ss:$0 sm:$0xff] }
 0x10f   :  { %v274_v55 = vmul.f32 %v883_v54, %v883_v54 }
 0x111   :  { %671 = vmatmul.msk.f32.gmra.mxu2 %vm143_vm1, %v274_v55 }
 0x114   :  { %v215_v56 = vpop.f32.mrf.mxu1 }
 0x115   :  { %v888_v57 = vsub.f32 %v100_v36, %v215_v56 }
 0x117   :  { %v275_v58 = vmul.f32 %v888_v57, %v888_v57 }
 0x119   :  { %672 = vmatmul.msk.f32.gmra.mxu2 %vm143_vm1, %v275_v58 }
 0x11c   :  { %v218_v59 = vpop.f32.mrf.mxu1 }
 0x11d   :  { %v893_v60 = vsub.f32 %v102_v37, %v218_v59 }
 0x11f   :  { %v276_v61 = vmul.f32 %v893_v60, %v893_v60 }
 0x121   :  { %673 = vmatmul.msk.f32.gmra.mxu2 %vm143_vm1, %v276_v61 }
 0x124   :  { %v221_v62 = vpop.f32.mrf.mxu1 }
 0x125   :  { %v898_v63 = vsub.f32 %v105_v38, %v221_v62 }
 0x127   :  { %v277_v0 = vmul.f32 %v898_v63, %v898_v63 }
 0x129   :  { %674 = vmatmul.msk.f32.gmra.mxu2 %vm143_vm1, %v277_v0 }
 0x12c   :  { %v224_v1 = vpop.f32.mrf.mxu1 }
 0x12d   :  { %v903_v2 = vsub.f32 %v107_v39, %v224_v1 }
 0x12f   :  { %v278_v3 = vmul.f32 %v903_v2, %v903_v2 }
 0x131   :  { %675 = vmatmul.msk.f32.gmra.mxu2 %vm143_vm1, %v278_v3 }
 0x134   :  { %v227_v4 = vpop.f32.mrf.mxu1 }
 0x135   :  { %v908_v5 = vsub.f32 %v110_v40, %v227_v4 }
 0x137   :  { %v279_v6 = vmul.f32 %v908_v5, %v908_v5 }
 0x139   :  { %676 = vmatmul.msk.f32.gmra.mxu2 %vm143_vm1, %v279_v6 }
 0x13c   :  { %v230_v7 = vpop.f32.mrf.mxu1 }
 0x13d   :  { %v913_v8 = vsub.f32 %v112_v41, %v230_v7 }
 0x13f   :  { %v280_v9 = vmul.f32 %v913_v8, %v913_v8 }
 0x141   :  { %677 = vmatmul.msk.f32.gmra.mxu2 %vm143_vm1, %v280_v9 }
 0x144   :  { %v233_v10 = vpop.f32.mrf.mxu1 }
 0x145   :  { %v918_v11 = vsub.f32 %v115_v42, %v233_v10 }
 0x147   :  { %v281_v12 = vmul.f32 %v918_v11, %v918_v11 }
 0x149   :  { %678 = vmatmul.msk.f32.gmra.mxu2 %vm143_vm1, %v281_v12 }
 0x14c   :  { %v236_v13 = vpop.f32.mrf.mxu1 }
 0x14d   :  { %v923_v14 = vsub.f32 %v117_v43, %v236_v13 }
 0x14f   :  { %v282_v15 = vmul.f32 %v923_v14, %v923_v14 }
 0x151   :  { %679 = vmatmul.msk.f32.gmra.mxu2 %vm143_vm1, %v282_v15 }
 0x154   :  { %v239_v16 = vpop.f32.mrf.mxu1 }
 0x155   :  { %v928_v17 = vsub.f32 %v120_v44, %v239_v16 }
 0x157   :  { %v283_v18 = vmul.f32 %v928_v17, %v928_v17 }
 0x159   :  { %680 = vmatmul.msk.f32.gmra.mxu2 %vm143_vm1, %v283_v18 }
 0x15c   :  { %v242_v19 = vpop.f32.mrf.mxu1 }
 0x15d   :  { %v933_v20 = vsub.f32 %v122_v45, %v242_v19 }
 0x15f   :  { %v284_v21 = vmul.f32 %v933_v20, %v933_v20 }
 0x161   :  { %681 = vmatmul.msk.f32.gmra.mxu2 %vm143_vm1, %v284_v21 }
 0x16a   :  { %v245_v22 = vpop.f32.mrf.mxu3 }
 0x16b   :  { %v938_v23 = vsub.f32 %v125_v46, %v245_v22 }
 0x16d   :  { %v285_v24 = vmul.f32 %v938_v23, %v938_v23 }
 0x16f   :  { %682 = vmatmul.msk.f32.vlgmr.msra.gmra.mxu3 %vm143_vm1, %v285_v24 }
 0x172   :  { %v248_v25 = vpop.f32.mrf.mxu3 }
 0x173   :  { %v943_v26 = vsub.f32 %v127_v47, %v248_v25 }
 0x175   :  { %v286_v27 = vmul.f32 %v943_v26, %v943_v26 }
 0x177   :  { %683 = vmatmul.msk.f32.gmra.mxu3 %vm143_vm1, %v286_v27 }
 0x17a   :  { %v251_v28 = vpop.f32.mrf.mxu3 }
 0x17b   :  { %v949_v29 = vsub.f32 %v870_v48, %v251_v28  ;;  %v963_v48 = vld [vmem:[%s1085_s3] ss:$0 sm:$0xff] }
 0x17d   :  { %v287_v30 = vmul.f32 %v949_v29, %v949_v29 }
 0x17f   :  { %684 = vmatmul.msk.f32.gmra.mxu3 %vm143_vm1, %v287_v30 }
 0x182   :  { %v254_v31 = vpop.f32.mrf.mxu3 }
 0x183   :  { %v955_v32 = vsub.f32 %v874_v49, %v254_v31 }
 0x185   :  { %v288_v33 = vmul.f32 %v955_v32, %v955_v32 }
 0x187   :  { %685 = vmatmul.msk.f32.gmra.mxu3 %vm143_vm1, %v288_v33 }
 0x18c   :  { %v354_v34 = vpop.f32.mrf.mxu2 }
 0x18d   :  { %v355_v35 = vadd.f32 1e-05, %v354_v34 }
 0x18f   :  { %708 = vrsqrt.f32 %v355_v35  ;;  %vm408_vm3 = vweird.f32 %v355_v35 }
 0x194   :  { %v357_v36 = vpop.f32.mrf.mxu2 }
 0x195   :  { %v709_v37 = vpop.eup %708  ;;  %v358_v38 = vadd.f32 1e-05, %v357_v36 }
 0x196   :  { %v403_v39 = vmul.f32 %v709_v37, %v355_v35  ;;  %vm409_vm2 = vweird.f32 %v709_v37 }
 0x197   :  { %710 = vrsqrt.f32 %v358_v38  ;;  %vm410_vm4 = vmor %vm408_vm3, %vm409_vm2  ;;  %vm418_vm6 = vweird.f32 %v358_v38 }
 0x198   :  { %v404_v40 = vmul.f32 %v709_v37, %v403_v39 }
 0x19a   :  { %v405_v41 = vmul.f32 0.5, %v404_v40 }
 0x19c   :  { %v406_v42 = vsub.f32 1.5, %v405_v41  ;;  %v360_v43 = vpop.f32.mrf.mxu2 }
 0x19d   :  { %v711_v44 = vpop.eup %710  ;;  %v361_v45 = vadd.f32 1e-05, %v360_v43 }
 0x19e   :  { %v407_v46 = vmul.f32 %v709_v37, %v406_v42  ;;  %v413_v47 = vmul.f32 %v711_v44, %v358_v38  ;;  %vm419_vm5 = vweird.f32 %v711_v44 }
 0x19f   :  { %712 = vrsqrt.f32 %v361_v45  ;;  %vm420_vm7 = vmor %vm418_vm6, %vm419_vm5  ;;  %vm428_vm9 = vweird.f32 %v361_v45 }
 0x1a0   :  { %v411_v49 = vsel %vm410_vm4, %v709_v37, %v407_v46  ;;  %v414_v50 = vmul.f32 %v711_v44, %v413_v47 }
 0x1a1   :  { %v562_v52 = vmul.f32 %v411_v49, %v878_v51 }
 0x1a2   :  { %v415_v55 = vmul.f32 0.5, %v414_v50 }
 0x1a3   :  { %v582_v56 = vmul.f32 %v963_v48, %v562_v52 }
 0x1a4   :  { %v416_v58 = vsub.f32 1.5, %v415_v55  ;;  %v363_v59 = vpop.f32.mrf.mxu2 }
 0x1a5   :  { %v713_v61 = vpop.eup %712  ;;  %v602_v62 = vadd.f32 %v969_v53, %v582_v56  ;;  %v364_v0 = vadd.f32 1e-05, %v363_v59 }
 0x1a6   :  { %v417_v1 = vmul.f32 %v711_v44, %v416_v58  ;;  %v423_v3 = vmul.f32 %v713_v61, %v361_v45  ;;  %vm429_vm8 = vweird.f32 %v713_v61 }
 0x1a7   :  { %618 = vst.msk [vmem:[%s1087_s5] sm:$0xff] %vm143_vm1, %v602_v62  ;;  %714 = vrsqrt.f32 %v364_v0  ;;  %vm430_vm10 = vmor %vm428_vm9, %vm429_vm8  ;;  %vm438_vm12 = vweird.f32 %v364_v0 }
 0x1a8   :  { %v421_v51 = vsel %vm420_vm7, %v711_v44, %v417_v1  ;;  %v424_v4 = vmul.f32 %v713_v61, %v423_v3 }
 0x1a9   :  { %v563_v6 = vmul.f32 %v421_v51, %v883_v54 }
 0x1aa   :  { %v425_v7 = vmul.f32 0.5, %v424_v4 }
 0x1ab   :  { %v583_v9 = vmul.f32 %v963_v48, %v563_v6 }
 0x1ac   :  { %v426_v10 = vsub.f32 1.5, %v425_v7  ;;  %v366_v12 = vpop.f32.mrf.mxu2 }
 0x1ad   :  { %v715_v13 = vpop.eup %714  ;;  %v603_v15 = vadd.f32 %v969_v53, %v583_v9  ;;  %v367_v16 = vadd.f32 1e-05, %v366_v12 }
 0x1ae   :  { %v427_v18 = vmul.f32 %v713_v61, %v426_v10  ;;  %v433_v19 = vmul.f32 %v715_v13, %v364_v0  ;;  %vm439_vm11 = vweird.f32 %v715_v13 }
 0x1af   :  { %619 = vst.msk [vmem:[%s1087_s5 + $0x8] sm:$0xff] %vm143_vm1, %v603_v15  ;;  %716 = vrsqrt.f32 %v367_v16  ;;  %vm440_vm13 = vmor %vm438_vm12, %vm439_vm11  ;;  %vm448_vm15 = vweird.f32 %v367_v16 }
 0x1b0   :  { %v431_v54 = vsel %vm430_vm10, %v713_v61, %v427_v18  ;;  %v434_v21 = vmul.f32 %v715_v13, %v433_v19 }
 0x1b1   :  { %v564_v22 = vmul.f32 %v431_v54, %v888_v57 }
 0x1b2   :  { %v435_v24 = vmul.f32 0.5, %v434_v21 }
 0x1b3   :  { %v584_v25 = vmul.f32 %v963_v48, %v564_v22 }
 0x1b4   :  { %v436_v27 = vsub.f32 1.5, %v435_v24  ;;  %v369_v28 = vpop.f32.mrf.mxu2 }
 0x1b5   :  { %v717_v30 = vpop.eup %716  ;;  %v604_v31 = vadd.f32 %v969_v53, %v584_v25  ;;  %v370_v33 = vadd.f32 1e-05, %v369_v28 }
 0x1b6   :  { %v437_v34 = vmul.f32 %v715_v13, %v436_v27  ;;  %v443_v35 = vmul.f32 %v717_v30, %v367_v16  ;;  %vm449_vm14 = vweird.f32 %v717_v30 }
 0x1b7   :  { %620 = vst.msk [vmem:[%s1087_s5 + $0x10] sm:$0xff] %vm143_vm1, %v604_v31  ;;  %718 = vrsqrt.f32 %v370_v33  ;;  %vm450_vm0 = vmor %vm448_vm15, %vm449_vm14  ;;  %vm458_vm3 = vweird.f32 %v370_v33 }
 0x1b8   :  { %v441_v57 = vsel %vm440_vm13, %v715_v13, %v437_v34  ;;  %v444_v36 = vmul.f32 %v717_v30, %v443_v35 }
 0x1b9   :  { %v565_v37 = vmul.f32 %v441_v57, %v893_v60 }
 0x1ba   :  { %v445_v38 = vmul.f32 0.5, %v444_v36 }
 0x1bb   :  { %v585_v39 = vmul.f32 %v963_v48, %v565_v37 }
 0x1bc   :  { %v446_v40 = vsub.f32 1.5, %v445_v38  ;;  %v372_v41 = vpop.f32.mrf.mxu2 }
 0x1bd   :  { %v719_v42 = vpop.eup %718  ;;  %v605_v43 = vadd.f32 %v969_v53, %v585_v39  ;;  %v373_v44 = vadd.f32 1e-05, %v372_v41 }
 0x1be   :  { %v447_v45 = vmul.f32 %v717_v30, %v446_v40  ;;  %v453_v46 = vmul.f32 %v719_v42, %v370_v33  ;;  %vm459_vm2 = vweird.f32 %v719_v42 }
 0x1bf   :  { %621 = vst.msk [vmem:[%s1087_s5 + $0x18] sm:$0xff] %vm143_vm1, %v605_v43  ;;  %720 = vrsqrt.f32 %v373_v44  ;;  %vm460_vm4 = vmor %vm458_vm3, %vm459_vm2  ;;  %vm468_vm6 = vweird.f32 %v373_v44 }
 0x1c0   :  { %v451_v60 = vsel %vm450_vm0, %v717_v30, %v447_v45  ;;  %v454_v47 = vmul.f32 %v719_v42, %v453_v46 }
 0x1c1   :  { %v566_v49 = vmul.f32 %v451_v60, %v898_v63 }
 0x1c2   :  { %v455_v50 = vmul.f32 0.5, %v454_v47 }
 0x1c3   :  { %v586_v52 = vmul.f32 %v963_v48, %v566_v49 }
 0x1c4   :  { %v456_v55 = vsub.f32 1.5, %v455_v50  ;;  %v375_v56 = vpop.f32.mrf.mxu2 }
 0x1c5   :  { %v721_v58 = vpop.eup %720  ;;  %v606_v59 = vadd.f32 %v969_v53, %v586_v52  ;;  %v376_v61 = vadd.f32 1e-05, %v375_v56 }
 0x1c6   :  { %v457_v62 = vmul.f32 %v719_v42, %v456_v55  ;;  %v463_v0 = vmul.f32 %v721_v58, %v373_v44  ;;  %vm469_vm5 = vweird.f32 %v721_v58 }
 0x1c7   :  { %622 = vst.msk [vmem:[%s1087_s5 + $0x20] sm:$0xff] %vm143_vm1, %v606_v59  ;;  %722 = vrsqrt.f32 %v376_v61  ;;  %vm470_vm7 = vmor %vm468_vm6, %vm469_vm5  ;;  %vm478_vm9 = vweird.f32 %v376_v61 }
 0x1c8   :  { %v461_v63 = vsel %vm460_vm4, %v719_v42, %v457_v62  ;;  %v464_v1 = vmul.f32 %v721_v58, %v463_v0 }
 0x1c9   :  { %v567_v3 = vmul.f32 %v461_v63, %v903_v2 }
 0x1ca   :  { %v465_v51 = vmul.f32 0.5, %v464_v1 }
 0x1cb   :  { %v587_v4 = vmul.f32 %v963_v48, %v567_v3 }
 0x1cc   :  { %v466_v6 = vsub.f32 1.5, %v465_v51  ;;  %v378_v7 = vpop.f32.mrf.mxu2 }
 0x1cd   :  { %v723_v9 = vpop.eup %722  ;;  %v607_v10 = vadd.f32 %v969_v53, %v587_v4  ;;  %v379_v12 = vadd.f32 1e-05, %v378_v7 }
 0x1ce   :  { %v467_v13 = vmul.f32 %v721_v58, %v466_v6  ;;  %v473_v15 = vmul.f32 %v723_v9, %v376_v61  ;;  %vm479_vm8 = vweird.f32 %v723_v9 }
 0x1cf   :  { %623 = vst.msk [vmem:[%s1087_s5 + $0x28] sm:$0xff] %vm143_vm1, %v607_v10  ;;  %724 = vrsqrt.f32 %v379_v12  ;;  %vm480_vm10 = vmor %vm478_vm9, %vm479_vm8  ;;  %vm488_vm12 = vweird.f32 %v379_v12 }
 0x1d0   :  { %v471_v2 = vsel %vm470_vm7, %v721_v58, %v467_v13  ;;  %v474_v16 = vmul.f32 %v723_v9, %v473_v15 }
 0x1d1   :  { %v568_v18 = vmul.f32 %v471_v2, %v908_v5 }
 0x1d2   :  { %v475_v19 = vmul.f32 0.5, %v474_v16 }
 0x1d3   :  { %v588_v54 = vmul.f32 %v963_v48, %v568_v18 }
 0x1d4   :  { %v476_v21 = vsub.f32 1.5, %v475_v19  ;;  %v381_v22 = vpop.f32.mrf.mxu2 }
 0x1d5   :  { %v725_v24 = vpop.eup %724  ;;  %v608_v25 = vadd.f32 %v969_v53, %v588_v54  ;;  %v382_v27 = vadd.f32 1e-05, %v381_v22 }
 0x1d6   :  { %v477_v28 = vmul.f32 %v723_v9, %v476_v21  ;;  %v483_v30 = vmul.f32 %v725_v24, %v379_v12  ;;  %vm489_vm11 = vweird.f32 %v725_v24 }
 0x1d7   :  { %624 = vst.msk [vmem:[%s1087_s5 + $0x30] sm:$0xff] %vm143_vm1, %v608_v25  ;;  %726 = vrsqrt.f32 %v382_v27  ;;  %vm490_vm13 = vmor %vm488_vm12, %vm489_vm11  ;;  %vm498_vm15 = vweird.f32 %v382_v27 }
 0x1d8   :  { %v481_v5 = vsel %vm480_vm10, %v723_v9, %v477_v28  ;;  %v484_v31 = vmul.f32 %v725_v24, %v483_v30 }
 0x1d9   :  { %v569_v33 = vmul.f32 %v481_v5, %v913_v8 }
 0x1da   :  { %v485_v34 = vmul.f32 0.5, %v484_v31 }
 0x1db   :  { %v589_v35 = vmul.f32 %v963_v48, %v569_v33 }
 0x1dc   :  { %v486_v57 = vsub.f32 1.5, %v485_v34  ;;  %v384_v36 = vpop.f32.mrf.mxu2 }
 0x1dd   :  { %v727_v37 = vpop.eup %726  ;;  %v609_v38 = vadd.f32 %v969_v53, %v589_v35  ;;  %v385_v39 = vadd.f32 1e-05, %v384_v36 }
 0x1de   :  { %v487_v40 = vmul.f32 %v725_v24, %v486_v57  ;;  %v493_v41 = vmul.f32 %v727_v37, %v382_v27  ;;  %vm499_vm14 = vweird.f32 %v727_v37 }
 0x1df   :  { %625 = vst.msk [vmem:[%s1087_s5 + $0x38] sm:$0xff] %vm143_vm1, %v609_v38  ;;  %728 = vrsqrt.f32 %v385_v39  ;;  %vm500_vm0 = vmor %vm498_vm15, %vm499_vm14  ;;  %vm508_vm3 = vweird.f32 %v385_v39 }
 0x1e0   :  { %v491_v8 = vsel %vm490_vm13, %v725_v24, %v487_v40  ;;  %v494_v42 = vmul.f32 %v727_v37, %v493_v41 }
 0x1e1   :  { %v570_v43 = vmul.f32 %v491_v8, %v918_v11 }
 0x1e2   :  { %v495_v44 = vmul.f32 0.5, %v494_v42 }
 0x1e3   :  { %v590_v45 = vmul.f32 %v963_v48, %v570_v43 }
 0x1e4   :  { %v496_v46 = vsub.f32 1.5, %v495_v44  ;;  %v387_v60 = vpop.f32.mrf.mxu2 }
 0x1e5   :  { %v729_v47 = vpop.eup %728  ;;  %v610_v49 = vadd.f32 %v969_v53, %v590_v45  ;;  %v388_v50 = vadd.f32 1e-05, %v387_v60 }
 0x1e6   :  { %v497_v52 = vmul.f32 %v727_v37, %v496_v46  ;;  %v503_v55 = vmul.f32 %v729_v47, %v385_v39  ;;  %vm509_vm2 = vweird.f32 %v729_v47 }
 0x1e7   :  { %626 = vst.msk [vmem:[%s1087_s5 + $0x40] sm:$0xff] %vm143_vm1, %v610_v49  ;;  %730 = vrsqrt.f32 %v388_v50  ;;  %vm510_vm4 = vmor %vm508_vm3, %vm509_vm2  ;;  %vm518_vm6 = vweird.f32 %v388_v50 }
 0x1e8   :  { %v501_v11 = vsel %vm500_vm0, %v727_v37, %v497_v52  ;;  %v504_v56 = vmul.f32 %v729_v47, %v503_v55 }
 0x1e9   :  { %v571_v58 = vmul.f32 %v501_v11, %v923_v14 }
 0x1ea   :  { %v505_v59 = vmul.f32 0.5, %v504_v56 }
 0x1eb   :  { %v591_v61 = vmul.f32 %v963_v48, %v571_v58 }
 0x1ec   :  { %v506_v62 = vsub.f32 1.5, %v505_v59 }
 0x1ed   :  { %v731_v0 = vpop.eup %730  ;;  %v611_v63 = vadd.f32 %v969_v53, %v591_v61 }
 0x1ee   :  { %v507_v1 = vmul.f32 %v729_v47, %v506_v62  ;;  %v513_v3 = vmul.f32 %v731_v0, %v388_v50  ;;  %vm519_vm5 = vweird.f32 %v731_v0 }
 0x1ef   :  { %627 = vst.msk [vmem:[%s1087_s5 + $0x48] sm:$0xff] %vm143_vm1, %v611_v63  ;;  %vm520_vm7 = vmor %vm518_vm6, %vm519_vm5 }
 0x1f0   :  { %v511_v51 = vsel %vm510_vm4, %v729_v47, %v507_v1  ;;  %v514_v4 = vmul.f32 %v731_v0, %v513_v3 }
 0x1f1   :  { %v572_v14 = vmul.f32 %v511_v51, %v928_v17 }
 0x1f2   :  { %v515_v6 = vmul.f32 0.5, %v514_v4  ;;  %v390_v7 = vpop.f32.mrf.mxu3 }
 0x1f3   :  { %v592_v9 = vmul.f32 %v963_v48, %v572_v14  ;;  %v391_v10 = vadd.f32 1e-05, %v390_v7 }
 0x1f4   :  { %v516_v12 = vsub.f32 1.5, %v515_v6 }
 0x1f5   :  { %v612_v13 = vadd.f32 %v969_v53, %v592_v9  ;;  %732 = vrsqrt.f32 %v391_v10  ;;  %vm528_vm9 = vweird.f32 %v391_v10 }
 0x1f6   :  { %v517_v15 = vmul.f32 %v731_v0, %v516_v12 }
 0x1f7   :  { %628 = vst.msk [vmem:[%s1087_s5 + $0x50] sm:$0xff] %vm143_vm1, %v612_v13 }
 0x1f8   :  { %v521_v2 = vsel %vm520_vm7, %v731_v0, %v517_v15 }
 0x1f9   :  { %v573_v17 = vmul.f32 %v521_v2, %v933_v20 }
 0x1fa   :  { %v393_v16 = vpop.f32.mrf.mxu3 }
 0x1fb   :  { %v733_v18 = vpop.eup %732  ;;  %v593_v19 = vmul.f32 %v963_v48, %v573_v17  ;;  %v394_v54 = vadd.f32 1e-05, %v393_v16 }
 0x1fc   :  { %v523_v21 = vmul.f32 %v733_v18, %v391_v10  ;;  %vm529_vm8 = vweird.f32 %v733_v18 }
 0x1fd   :  { %v613_v22 = vadd.f32 %v969_v53, %v593_v19  ;;  %734 = vrsqrt.f32 %v394_v54  ;;  %vm530_vm10 = vmor %vm528_vm9, %vm529_vm8  ;;  %vm538_vm12 = vweird.f32 %v394_v54 }
 0x1fe   :  { %v524_v24 = vmul.f32 %v733_v18, %v523_v21 }
 0x1ff   :  { %629 = vst.msk [vmem:[%s1087_s5 + $0x58] sm:$0xff] %vm143_vm1, %v613_v22 }
 0x200   :  { %v525_v25 = vmul.f32 0.5, %v524_v24 }
 0x202   :  { %v526_v27 = vsub.f32 1.5, %v525_v25  ;;  %v396_v28 = vpop.f32.mrf.mxu3 }
 0x203   :  { %v735_v20 = vpop.eup %734  ;;  %v397_v30 = vadd.f32 1e-05, %v396_v28 }
 0x204   :  { %v527_v5 = vmul.f32 %v733_v18, %v526_v27  ;;  %v533_v31 = vmul.f32 %v735_v20, %v394_v54  ;;  %vm539_vm11 = vweird.f32 %v735_v20 }
 0x205   :  { %736 = vrsqrt.f32 %v397_v30  ;;  %vm540_vm13 = vmor %vm538_vm12, %vm539_vm11  ;;  %vm548_vm15 = vweird.f32 %v397_v30 }
 0x206   :  { %v531_v33 = vsel %vm530_vm10, %v733_v18, %v527_v5  ;;  %v534_v34 = vmul.f32 %v735_v20, %v533_v31 }
 0x207   :  { %v574_v35 = vmul.f32 %v531_v33, %v938_v23 }
 0x208   :  { %v535_v57 = vmul.f32 0.5, %v534_v34 }
 0x209   :  { %v594_v36 = vmul.f32 %v963_v48, %v574_v35 }
 0x20a   :  { %v536_v37 = vsub.f32 1.5, %v535_v57  ;;  %v399_v38 = vpop.f32.mrf.mxu3 }
 0x20b   :  { %v737_v39 = vpop.eup %736  ;;  %v614_v40 = vadd.f32 %v969_v53, %v594_v36  ;;  %v400_v41 = vadd.f32 1e-05, %v399_v38 }
 0x20c   :  { %v537_v8 = vmul.f32 %v735_v20, %v536_v37  ;;  %v543_v42 = vmul.f32 %v737_v39, %v397_v30  ;;  %vm549_vm14 = vweird.f32 %v737_v39 }
 0x20d   :  { %630 = vst.msk [vmem:[%s1087_s5 + $0x60] sm:$0xff] %vm143_vm1, %v614_v40  ;;  %738 = vrsqrt.f32 %v400_v41  ;;  %vm550_vm0 = vmor %vm548_vm15, %vm549_vm14  ;;  %vm558_vm3 = vweird.f32 %v400_v41 }
 0x20e   :  { %v541_v23 = vsel %vm540_vm13, %v735_v20, %v537_v8  ;;  %v544_v43 = vmul.f32 %v737_v39, %v543_v42 }
 0x20f   :  { %v575_v44 = vmul.f32 %v541_v23, %v943_v26 }
 0x210   :  { %v545_v45 = vmul.f32 0.5, %v544_v43 }
 0x211   :  { %v595_v46 = vmul.f32 %v963_v48, %v575_v44 }
 0x212   :  { %v546_v60 = vsub.f32 1.5, %v545_v45 }
 0x213   :  { %v739_v47 = vpop.eup %738  ;;  %v615_v49 = vadd.f32 %v969_v53, %v595_v46 }
 0x214   :  { %v547_v50 = vmul.f32 %v737_v39, %v546_v60  ;;  %v553_v52 = vmul.f32 %v739_v47, %v400_v41  ;;  %vm559_vm2 = vweird.f32 %v739_v47 }
 0x215   :  { %631 = vst.msk [vmem:[%s1087_s5 + $0x68] sm:$0xff] %vm143_vm1, %v615_v49  ;;  %vm560_vm4 = vmor %vm558_vm3, %vm559_vm2 }
 0x216   :  { %v551_v55 = vsel %vm550_vm0, %v737_v39, %v547_v50  ;;  %v554_v11 = vmul.f32 %v739_v47, %v553_v52 }
 0x217   :  { %v576_v26 = vmul.f32 %v551_v55, %v949_v29 }
 0x218   :  { %v555_v56 = vmul.f32 0.5, %v554_v11 }
 0x219   :  { %v596_v58 = vmul.f32 %v963_v48, %v576_v26 }
 0x21a   :  { %v556_v59 = vsub.f32 1.5, %v555_v56 }
 0x21b   :  { %v616_v61 = vadd.f32 %v969_v53, %v596_v58 }
 0x21c   :  { %v557_v62 = vmul.f32 %v739_v47, %v556_v59 }
 0x21d   :  { %632 = vst.msk [vmem:[%s1087_s5 + $0x70] sm:$0xff] %vm143_vm1, %v616_v61 }
 0x21e   :  { %v561_v0 = vsel %vm560_vm4, %v739_v47, %v557_v62 }
 0x21f   :  { %v577_v63 = vmul.f32 %v561_v0, %v955_v32 }
 0x221   :  { %v597_v29 = vmul.f32 %v963_v48, %v577_v63 }
 0x223   :  { %v617_v1 = vadd.f32 %v969_v53, %v597_v29 }
 0x225   :  { %633 = vst.msk [vmem:[%s1087_s5 + $0x78] sm:$0xff] %vm143_vm1, %v617_v1 }

</bundles_post_ra>
